<compile_context>
chip_gen: v5e
topology: v5e:2x2
jax: 0.10.0
libtpu: 0.0.40
codegen_flags: <defaults>
</compile_context>

<pallas_src>
import jax
import jax.numpy as jnp
from jax import lax
from jax.experimental import pallas as pl
from jax.experimental.pallas import tpu as pltpu

H, W = 6, 7
HW = H * W                    # 42
C_IN = 128
C_V = 3                       # value-head conv channels
C_P = 32                      # policy-head conv channels
C_ALL = C_V + C_P             # 35 fused conv output channels
FC1_OUT = 32
N_ACTIONS = 7
K_ALL = FC1_OUT + N_ACTIONS   # 39 fused fc output columns
OUT_COLS = N_ACTIONS + 1      # 8: policy logits' softmax (7) | value (1)
BN_EPS = 1e-5
BLOCK_B_CAP = 256             # boards per grid step (cap; safe on v5e/v6e/v7x)


def outblock_kernel(s_ref, wct_ref, bc_ref, w3_ref, bhk_ref, w2t_ref, b2_ref,
                    o_ref):
    bb = s_ref.shape[1]                               # boards in this block

    wct = wct_ref[...]                                # (128, 35) bf16
    bc = bc_ref[...]                                  # (1, 35)   f32

    # Fused 1x1 conv (+ folded BN) + relu + fused fc contraction, accumulated
    # over the 42 board cells.  No (42*B, 35) / (42, B, 39) slabs materialized.
    acc = jnp.zeros((bb, K_ALL), jnp.float32)
    for h in range(HW):                               # static, fully unrolled
        feat_h = jnp.dot(s_ref[h], wct,
                         preferred_element_type=jnp.float32) + bc
        feat_h = jnp.maximum(feat_h, 0.0)             # (B, 35) f32
        acc = acc + jnp.dot(feat_h.astype(w3_ref.dtype), w3_ref[h],
                            preferred_element_type=jnp.float32)
    hv = acc + bhk_ref[...]                           # (B, 39)

    # Value head: relu -> fc2 -> tanh.
    h_val = jnp.maximum(hv[:, :FC1_OUT], 0.0)         # (B, 32)
    v = jnp.tanh(jnp.dot(h_val, w2t_ref[...],
                         preferred_element_type=jnp.float32) + b2_ref[...])

    # Policy head: exp(log_softmax(x)) == softmax(x), along the lane axis.
    logits = hv[:, FC1_OUT:]                          # (B, 7)
    m = jnp.max(logits, axis=-1, keepdims=True)
    e = jnp.exp(logits - m)
    inv = pl.reciprocal(jnp.sum(e, axis=-1, keepdims=True), approx=True)
    p = e * inv

    # Single merged output slab: cols 0:7 policy, col 7 value.
    o_ref[...] = jnp.concatenate([p, v], axis=-1)     # (B, 8)


def _round_up(x, m):
    return ((x + m - 1) // m) * m


def _choose_block(n, cap=BLOCK_B_CAP):
    """Boards per grid step: multiple of 16 (bf16 packing), <= cap, balanced
    to minimize tail padding, and >= 2 steps for N > 64 (v7x megacore)."""
    n16 = _round_up(max(n, 1), 16)
    steps = max(1, -(-n16 // cap))
    if n16 > 64:
        steps = max(steps, 2)
    return _round_up(-(-n16 // steps), 16)


def init_params(key):
    ks = jax.random.split(key, 18)

    def rn(k, shape, scale=0.1):
        return scale * jax.random.normal(k, shape, dtype=jnp.float32)

    return dict(
        conv_w=rn(ks[0], (C_V, C_IN, 1, 1)),
        conv_b=rn(ks[1], (C_V,)),
        bn_g=1.0 + rn(ks[2], (C_V,)),
        bn_b=rn(ks[3], (C_V,)),
        bn_m=rn(ks[4], (C_V,)),
        bn_v=jax.random.uniform(ks[5], (C_V,), minval=0.5, maxval=1.5,
                                dtype=jnp.float32),
        fc1_w=rn(ks[6], (FC1_OUT, C_V * HW)),
        fc1_b=rn(ks[7], (FC1_OUT,)),
        fc2_w=rn(ks[8], (1, FC1_OUT)),
        fc2_b=rn(ks[9], (1,)),
        conv1_w=rn(ks[10], (C_P, C_IN, 1, 1)),
        conv1_b=rn(ks[11], (C_P,)),
        bn1_g=1.0 + rn(ks[12], (C_P,)),
        bn1_b=rn(ks[13], (C_P,)),
        bn1_m=rn(ks[14], (C_P,)),
        bn1_v=jax.random.uniform(ks[15], (C_P,), minval=0.5, maxval=1.5,
                                 dtype=jnp.float32),
        fc_w=rn(ks[16], (N_ACTIONS, C_P * HW)),
        fc_b=rn(ks[17], (N_ACTIONS,)),
    )


def outblock_forward(x, params, block_cap=BLOCK_B_CAP):
    """x: (N, 128, 6, 7) float32 NCHW.  Returns (p: (N,7), v: (N,1)) float32."""
    N = x.shape[0]

    # --- fold eval-mode BN + conv bias into effective 1x1-conv weight/bias ---
    def fold(conv_w, conv_b, g, b, m, var):
        scale = g / jnp.sqrt(var + BN_EPS)
        w_eff = conv_w.reshape(conv_w.shape[0], C_IN) * scale[:, None]
        b_eff = scale * (conv_b - m) + b
        return w_eff, b_eff

    wv_eff, bv_eff = fold(params['conv_w'], params['conv_b'], params['bn_g'],
                          params['bn_b'], params['bn_m'], params['bn_v'])
    wp_eff, bp_eff = fold(params['conv1_w'], params['conv1_b'], params['bn1_g'],
                          params['bn1_b'], params['bn1_m'], params['bn1_v'])

    # Fused conv weight (128, 35): feat cols 0:3 = value head, 3:35 = policy.
    wct = jnp.concatenate([wv_eff, wp_eff], axis=0).T.astype(jnp.bfloat16)
    bc = jnp.concatenate([bv_eff, bp_eff])[None, :]             # (1, 35) f32

    # Fused fc weight, per board cell: (42, 35, 39).
    #   cols 0:32  <- fc1 (value head, reads feat channels 0:3)
    #   cols 32:39 <- fc  (policy head, reads feat channels 3:35)
    # PyTorch flatten order is channel-major (c*42 + hw), honored here.
    w1_hck = params['fc1_w'].reshape(FC1_OUT, C_V, HW).transpose(2, 1, 0)
    wfc_hck = params['fc_w'].reshape(N_ACTIONS, C_P, HW).transpose(2, 1, 0)
    w3 = jnp.zeros((HW, C_ALL, K_ALL), jnp.float32)
    w3 = w3.at[:, :C_V, :FC1_OUT].set(w1_hck)
    w3 = w3.at[:, C_V:, FC1_OUT:].set(wfc_hck)
    w3 = w3.astype(jnp.bfloat16)
    bhk = jnp.concatenate([params['fc1_b'], params['fc_b']])[None, :]  # (1,39)

    w2t = params['fc2_w'].T                                     # (32, 1) f32
    b2 = params['fc2_b'][None, :]                               # (1, 1)  f32

    # --- layout plumbing: lane-dense (HW, N, C) bf16 board tensor.  The cast
    # is fused into the transpose copy; no explicit padding (edge block). ---
    s = jnp.transpose(x.astype(jnp.bfloat16).reshape(N, C_IN, HW), (2, 0, 1))

    B = _choose_block(N, block_cap)
    grid = pl.cdiv(N, B)

    out = pl.pallas_call(
        outblock_kernel,
        out_shape=jax.ShapeDtypeStruct((N, OUT_COLS), jnp.float32),
        grid=(grid,),
        in_specs=[
            pl.BlockSpec((HW, B, C_IN), lambda i: (0, i, 0)),        # boards
            pl.BlockSpec((C_IN, C_ALL), lambda i: (0, 0)),           # wct
            pl.BlockSpec((1, C_ALL), lambda i: (0, 0)),              # bc
            pl.BlockSpec((HW, C_ALL, K_ALL), lambda i: (0, 0, 0)),   # w3
            pl.BlockSpec((1, K_ALL), lambda i: (0, 0)),              # bhk
            pl.BlockSpec((FC1_OUT, 1), lambda i: (0, 0)),            # w2t
            pl.BlockSpec((1, 1), lambda i: (0, 0)),                  # b2
        ],
        out_specs=pl.BlockSpec((B, OUT_COLS), lambda i: (i, 0)),
        compiler_params=pltpu.CompilerParams(
            dimension_semantics=("parallel",),
            vmem_limit_bytes=48 * 1024 * 1024),
    )(s, wct, bc, w3, bhk, w2t, b2)

    return out[:, :N_ACTIONS], out[:, N_ACTIONS:]


def reference_forward(x, P):
    """Plain-JAX f32 reference matching the PyTorch forward (eval-mode BN)."""
    N = x.shape[0]

    def conv1x1(t, w, b):
        return (jnp.einsum('nchw,oc->nohw', t, w.reshape(w.shape[0], w.shape[1]))
                + b[None, :, None, None])

    def bn(t, g, be, m, v):
        return (g[None, :, None, None] * (t - m[None, :, None, None])
                / jnp.sqrt(v[None, :, None, None] + BN_EPS)
                + be[None, :, None, None])

    v = jax.nn.relu(bn(conv1x1(x, P['conv_w'], P['conv_b']),
                       P['bn_g'], P['bn_b'], P['bn_m'], P['bn_v']))
    v = v.reshape(N, C_V * HW)
    v = jax.nn.relu(v @ P['fc1_w'].T + P['fc1_b'])
    v = jnp.tanh(v @ P['fc2_w'].T + P['fc2_b'])

    p = jax.nn.relu(bn(conv1x1(x, P['conv1_w'], P['conv1_b']),
                       P['bn1_g'], P['bn1_b'], P['bn1_m'], P['bn1_v']))
    p = p.reshape(N, C_P * HW)
    p = p @ P['fc_w'].T + P['fc_b']
    p = jnp.exp(jax.nn.log_softmax(p, axis=1))
    return p, v


if __name__ == "__main__":
    key = jax.random.PRNGKey(0)
    pkey, xkey = jax.random.split(key)
    params = init_params(pkey)

    # N=12: single partial block (B=16).  N=100: two grid steps (B=64) with a
    # partial edge block -> exercises the megacore/edge-padding paths.
    for N in (12, 100):
        x = jax.random.normal(jax.random.fold_in(xkey, N),
                              (N, C_IN, H, W), dtype=jnp.float32)

        p, v = outblock_forward(x, params)
        jax.block_until_ready((p, v))

        p_ref, v_ref = reference_forward(x, params)
        assert p.shape == (N, N_ACTIONS) and v.shape == (N, 1)
        # bf16 data path -> loosened tolerance vs the f32 reference.
        assert jnp.allclose(p, p_ref, atol=2e-2, rtol=2e-2), f"policy mismatch N={N}"
        assert jnp.allclose(v, v_ref, atol=2e-2, rtol=2e-2), f"value mismatch N={N}"

    print("KERNEL_OK")
</pallas_src>

<mosaic_0001>
module attributes {stable_mosaic.version = 11 : i64} {
  func.func @outblock_kernel(%arg0: i32, %arg1: memref<42x16x128xbf16, #tpu.memory_space<vmem>>, %arg2: memref<128x35xbf16, #tpu.memory_space<vmem>>, %arg3: memref<1x35xf32, #tpu.memory_space<vmem>>, %arg4: memref<42x35x39xbf16, #tpu.memory_space<vmem>>, %arg5: memref<1x39xf32, #tpu.memory_space<vmem>>, %arg6: memref<32x1xf32, #tpu.memory_space<vmem>>, %arg7: memref<1x1xf32, #tpu.memory_space<vmem>>, %arg8: memref<16x8xf32, #tpu.memory_space<vmem>>) attributes {dimension_semantics = [#tpu.dimension_semantics<parallel>], iteration_bounds = array<i64: 1>, scalar_prefetch = 0 : i64, scratch_operands = 0 : i64, tpu.core_type = #tpu.core_type<tc>, window_params = [{transform_indices = @transform_0, window_bounds = array<i64: 42, 16, 128>}, {pipeline_mode = #tpu.pipeline_mode<synchronous>, transform_indices = @transform_1, window_bounds = array<i64: 128, 35>}, {pipeline_mode = #tpu.pipeline_mode<synchronous>, transform_indices = @transform_2, window_bounds = array<i64: 1, 35>}, {pipeline_mode = #tpu.pipeline_mode<synchronous>, transform_indices = @transform_3, window_bounds = array<i64: 42, 35, 39>}, {pipeline_mode = #tpu.pipeline_mode<synchronous>, transform_indices = @transform_4, window_bounds = array<i64: 1, 39>}, {pipeline_mode = #tpu.pipeline_mode<synchronous>, transform_indices = @transform_5, window_bounds = array<i64: 32, 1>}, {pipeline_mode = #tpu.pipeline_mode<synchronous>, transform_indices = @transform_6, window_bounds = array<i64: 1, 1>}, {transform_indices = @transform_7, window_bounds = array<i64: 16, 8>}]} {
    %c0 = arith.constant 0 : index
    %c0_0 = arith.constant 0 : index
    %0 = vector.load %arg2[%c0, %c0_0] : memref<128x35xbf16, #tpu.memory_space<vmem>>, vector<128x35xbf16>
    %c0_1 = arith.constant 0 : index
    %c0_2 = arith.constant 0 : index
    %1 = vector.load %arg3[%c0_1, %c0_2] : memref<1x35xf32, #tpu.memory_space<vmem>>, vector<1x35xf32>
    %cst = arith.constant 0.000000e+00 : f32
    %2 = vector.broadcast %cst : f32 to vector<16x39xf32>
    %c0_3 = arith.constant 0 : index
    %c0_4 = arith.constant 0 : index
    %c0_5 = arith.constant 0 : index
    %3 = vector.load %arg1[%c0_3, %c0_4, %c0_5] : memref<42x16x128xbf16, #tpu.memory_space<vmem>>, vector<1x16x128xbf16>
    %4 = vector.shape_cast %3 : vector<1x16x128xbf16> to vector<16x128xbf16>
    %cst_6 = arith.constant dense<0.000000e+00> : vector<16x35xf32>
    %5 = tpu.matmul %4, %0, %cst_6 {dimension_numbers = #tpu.dot_dimension_numbers<[1], [0], [0], [1], [0, 0, 1, 1], [], []>} : vector<16x128xbf16>, vector<128x35xbf16>, vector<16x35xf32> -> vector<16x35xf32>
    %6 = vector.broadcast %1 : vector<1x35xf32> to vector<16x35xf32>
    %7 = arith.addf %5, %6 : vector<16x35xf32>
    %cst_7 = arith.constant 0.000000e+00 : f32
    %8 = vector.broadcast %cst_7 : f32 to vector<16x35xf32>
    %9 = arith.maximumf %7, %8 : vector<16x35xf32>
    %10 = arith.truncf %9 : vector<16x35xf32> to vector<16x35xbf16>
    %c0_8 = arith.constant 0 : index
    %c0_9 = arith.constant 0 : index
    %c0_10 = arith.constant 0 : index
    %11 = vector.load %arg4[%c0_8, %c0_9, %c0_10] : memref<42x35x39xbf16, #tpu.memory_space<vmem>>, vector<1x35x39xbf16>
    %12 = vector.shape_cast %11 : vector<1x35x39xbf16> to vector<35x39xbf16>
    %cst_11 = arith.constant dense<0.000000e+00> : vector<16x39xf32>
    %13 = tpu.matmul %10, %12, %cst_11 {dimension_numbers = #tpu.dot_dimension_numbers<[1], [0], [0], [1], [0, 0, 1, 1], [], []>} : vector<16x35xbf16>, vector<35x39xbf16>, vector<16x39xf32> -> vector<16x39xf32>
    %14 = arith.addf %2, %13 : vector<16x39xf32>
    %c1 = arith.constant 1 : index
    %c0_12 = arith.constant 0 : index
    %c0_13 = arith.constant 0 : index
    %15 = vector.load %arg1[%c1, %c0_12, %c0_13] : memref<42x16x128xbf16, #tpu.memory_space<vmem>>, vector<1x16x128xbf16>
    %16 = vector.shape_cast %15 : vector<1x16x128xbf16> to vector<16x128xbf16>
    %cst_14 = arith.constant dense<0.000000e+00> : vector<16x35xf32>
    %17 = tpu.matmul %16, %0, %cst_14 {dimension_numbers = #tpu.dot_dimension_numbers<[1], [0], [0], [1], [0, 0, 1, 1], [], []>} : vector<16x128xbf16>, vector<128x35xbf16>, vector<16x35xf32> -> vector<16x35xf32>
    %18 = vector.broadcast %1 : vector<1x35xf32> to vector<16x35xf32>
    %19 = arith.addf %17, %18 : vector<16x35xf32>
    %cst_15 = arith.constant 0.000000e+00 : f32
    %20 = vector.broadcast %cst_15 : f32 to vector<16x35xf32>
    %21 = arith.maximumf %19, %20 : vector<16x35xf32>
    %22 = arith.truncf %21 : vector<16x35xf32> to vector<16x35xbf16>
    %c1_16 = arith.constant 1 : index
    %c0_17 = arith.constant 0 : index
    %c0_18 = arith.constant 0 : index
    %23 = vector.load %arg4[%c1_16, %c0_17, %c0_18] : memref<42x35x39xbf16, #tpu.memory_space<vmem>>, vector<1x35x39xbf16>
    %24 = vector.shape_cast %23 : vector<1x35x39xbf16> to vector<35x39xbf16>
    %cst_19 = arith.constant dense<0.000000e+00> : vector<16x39xf32>
    %25 = tpu.matmul %22, %24, %cst_19 {dimension_numbers = #tpu.dot_dimension_numbers<[1], [0], [0], [1], [0, 0, 1, 1], [], []>} : vector<16x35xbf16>, vector<35x39xbf16>, vector<16x39xf32> -> vector<16x39xf32>
    %26 = arith.addf %14, %25 : vector<16x39xf32>
    %c2 = arith.constant 2 : index
    %c0_20 = arith.constant 0 : index
    %c0_21 = arith.constant 0 : index
    %27 = vector.load %arg1[%c2, %c0_20, %c0_21] : memref<42x16x128xbf16, #tpu.memory_space<vmem>>, vector<1x16x128xbf16>
    %28 = vector.shape_cast %27 : vector<1x16x128xbf16> to vector<16x128xbf16>
    %cst_22 = arith.constant dense<0.000000e+00> : vector<16x35xf32>
    %29 = tpu.matmul %28, %0, %cst_22 {dimension_numbers = #tpu.dot_dimension_numbers<[1], [0], [0], [1], [0, 0, 1, 1], [], []>} : vector<16x128xbf16>, vector<128x35xbf16>, vector<16x35xf32> -> vector<16x35xf32>
    %30 = vector.broadcast %1 : vector<1x35xf32> to vector<16x35xf32>
    %31 = arith.addf %29, %30 : vector<16x35xf32>
    %cst_23 = arith.constant 0.000000e+00 : f32
    %32 = vector.broadcast %cst_23 : f32 to vector<16x35xf32>
    %33 = arith.maximumf %31, %32 : vector<16x35xf32>
    %34 = arith.truncf %33 : vector<16x35xf32> to vector<16x35xbf16>
    %c2_24 = arith.constant 2 : index
    %c0_25 = arith.constant 0 : index
    %c0_26 = arith.constant 0 : index
    %35 = vector.load %arg4[%c2_24, %c0_25, %c0_26] : memref<42x35x39xbf16, #tpu.memory_space<vmem>>, vector<1x35x39xbf16>
    %36 = vector.shape_cast %35 : vector<1x35x39xbf16> to vector<35x39xbf16>
    %cst_27 = arith.constant dense<0.000000e+00> : vector<16x39xf32>
    %37 = tpu.matmul %34, %36, %cst_27 {dimension_numbers = #tpu.dot_dimension_numbers<[1], [0], [0], [1], [0, 0, 1, 1], [], []>} : vector<16x35xbf16>, vector<35x39xbf16>, vector<16x39xf32> -> vector<16x39xf32>
    %38 = arith.addf %26, %37 : vector<16x39xf32>
    %c3 = arith.constant 3 : index
    %c0_28 = arith.constant 0 : index
    %c0_29 = arith.constant 0 : index
    %39 = vector.load %arg1[%c3, %c0_28, %c0_29] : memref<42x16x128xbf16, #tpu.memory_space<vmem>>, vector<1x16x128xbf16>
    %40 = vector.shape_cast %39 : vector<1x16x128xbf16> to vector<16x128xbf16>
    %cst_30 = arith.constant dense<0.000000e+00> : vector<16x35xf32>
    %41 = tpu.matmul %40, %0, %cst_30 {dimension_numbers = #tpu.dot_dimension_numbers<[1], [0], [0], [1], [0, 0, 1, 1], [], []>} : vector<16x128xbf16>, vector<128x35xbf16>, vector<16x35xf32> -> vector<16x35xf32>
    %42 = vector.broadcast %1 : vector<1x35xf32> to vector<16x35xf32>
    %43 = arith.addf %41, %42 : vector<16x35xf32>
    %cst_31 = arith.constant 0.000000e+00 : f32
    %44 = vector.broadcast %cst_31 : f32 to vector<16x35xf32>
    %45 = arith.maximumf %43, %44 : vector<16x35xf32>
    %46 = arith.truncf %45 : vector<16x35xf32> to vector<16x35xbf16>
    %c3_32 = arith.constant 3 : index
    %c0_33 = arith.constant 0 : index
    %c0_34 = arith.constant 0 : index
    %47 = vector.load %arg4[%c3_32, %c0_33, %c0_34] : memref<42x35x39xbf16, #tpu.memory_space<vmem>>, vector<1x35x39xbf16>
    %48 = vector.shape_cast %47 : vector<1x35x39xbf16> to vector<35x39xbf16>
    %cst_35 = arith.constant dense<0.000000e+00> : vector<16x39xf32>
    %49 = tpu.matmul %46, %48, %cst_35 {dimension_numbers = #tpu.dot_dimension_numbers<[1], [0], [0], [1], [0, 0, 1, 1], [], []>} : vector<16x35xbf16>, vector<35x39xbf16>, vector<16x39xf32> -> vector<16x39xf32>
    %50 = arith.addf %38, %49 : vector<16x39xf32>
    %c4 = arith.constant 4 : index
    %c0_36 = arith.constant 0 : index
    %c0_37 = arith.constant 0 : index
    %51 = vector.load %arg1[%c4, %c0_36, %c0_37] : memref<42x16x128xbf16, #tpu.memory_space<vmem>>, vector<1x16x128xbf16>
    %52 = vector.shape_cast %51 : vector<1x16x128xbf16> to vector<16x128xbf16>
    %cst_38 = arith.constant dense<0.000000e+00> : vector<16x35xf32>
    %53 = tpu.matmul %52, %0, %cst_38 {dimension_numbers = #tpu.dot_dimension_numbers<[1], [0], [0], [1], [0, 0, 1, 1], [], []>} : vector<16x128xbf16>, vector<128x35xbf16>, vector<16x35xf32> -> vector<16x35xf32>
    %54 = vector.broadcast %1 : vector<1x35xf32> to vector<16x35xf32>
    %55 = arith.addf %53, %54 : vector<16x35xf32>
    %cst_39 = arith.constant 0.000000e+00 : f32
    %56 = vector.broadcast %cst_39 : f32 to vector<16x35xf32>
    %57 = arith.maximumf %55, %56 : vector<16x35xf32>
    %58 = arith.truncf %57 : vector<16x35xf32> to vector<16x35xbf16>
    %c4_40 = arith.constant 4 : index
    %c0_41 = arith.constant 0 : index
    %c0_42 = arith.constant 0 : index
    %59 = vector.load %arg4[%c4_40, %c0_41, %c0_42] : memref<42x35x39xbf16, #tpu.memory_space<vmem>>, vector<1x35x39xbf16>
    %60 = vector.shape_cast %59 : vector<1x35x39xbf16> to vector<35x39xbf16>
    %cst_43 = arith.constant dense<0.000000e+00> : vector<16x39xf32>
    %61 = tpu.matmul %58, %60, %cst_43 {dimension_numbers = #tpu.dot_dimension_numbers<[1], [0], [0], [1], [0, 0, 1, 1], [], []>} : vector<16x35xbf16>, vector<35x39xbf16>, vector<16x39xf32> -> vector<16x39xf32>
    %62 = arith.addf %50, %61 : vector<16x39xf32>
    %c5 = arith.constant 5 : index
    %c0_44 = arith.constant 0 : index
    %c0_45 = arith.constant 0 : index
    %63 = vector.load %arg1[%c5, %c0_44, %c0_45] : memref<42x16x128xbf16, #tpu.memory_space<vmem>>, vector<1x16x128xbf16>
    %64 = vector.shape_cast %63 : vector<1x16x128xbf16> to vector<16x128xbf16>
    %cst_46 = arith.constant dense<0.000000e+00> : vector<16x35xf32>
    %65 = tpu.matmul %64, %0, %cst_46 {dimension_numbers = #tpu.dot_dimension_numbers<[1], [0], [0], [1], [0, 0, 1, 1], [], []>} : vector<16x128xbf16>, vector<128x35xbf16>, vector<16x35xf32> -> vector<16x35xf32>
    %66 = vector.broadcast %1 : vector<1x35xf32> to vector<16x35xf32>
    %67 = arith.addf %65, %66 : vector<16x35xf32>
    %cst_47 = arith.constant 0.000000e+00 : f32
    %68 = vector.broadcast %cst_47 : f32 to vector<16x35xf32>
    %69 = arith.maximumf %67, %68 : vector<16x35xf32>
    %70 = arith.truncf %69 : vector<16x35xf32> to vector<16x35xbf16>
    %c5_48 = arith.constant 5 : index
    %c0_49 = arith.constant 0 : index
    %c0_50 = arith.constant 0 : index
    %71 = vector.load %arg4[%c5_48, %c0_49, %c0_50] : memref<42x35x39xbf16, #tpu.memory_space<vmem>>, vector<1x35x39xbf16>
    %72 = vector.shape_cast %71 : vector<1x35x39xbf16> to vector<35x39xbf16>
    %cst_51 = arith.constant dense<0.000000e+00> : vector<16x39xf32>
    %73 = tpu.matmul %70, %72, %cst_51 {dimension_numbers = #tpu.dot_dimension_numbers<[1], [0], [0], [1], [0, 0, 1, 1], [], []>} : vector<16x35xbf16>, vector<35x39xbf16>, vector<16x39xf32> -> vector<16x39xf32>
    %74 = arith.addf %62, %73 : vector<16x39xf32>
    %c6 = arith.constant 6 : index
    %c0_52 = arith.constant 0 : index
    %c0_53 = arith.constant 0 : index
    %75 = vector.load %arg1[%c6, %c0_52, %c0_53] : memref<42x16x128xbf16, #tpu.memory_space<vmem>>, vector<1x16x128xbf16>
    %76 = vector.shape_cast %75 : vector<1x16x128xbf16> to vector<16x128xbf16>
    %cst_54 = arith.constant dense<0.000000e+00> : vector<16x35xf32>
    %77 = tpu.matmul %76, %0, %cst_54 {dimension_numbers = #tpu.dot_dimension_numbers<[1], [0], [0], [1], [0, 0, 1, 1], [], []>} : vector<16x128xbf16>, vector<128x35xbf16>, vector<16x35xf32> -> vector<16x35xf32>
    %78 = vector.broadcast %1 : vector<1x35xf32> to vector<16x35xf32>
    %79 = arith.addf %77, %78 : vector<16x35xf32>
    %cst_55 = arith.constant 0.000000e+00 : f32
    %80 = vector.broadcast %cst_55 : f32 to vector<16x35xf32>
    %81 = arith.maximumf %79, %80 : vector<16x35xf32>
    %82 = arith.truncf %81 : vector<16x35xf32> to vector<16x35xbf16>
    %c6_56 = arith.constant 6 : index
    %c0_57 = arith.constant 0 : index
    %c0_58 = arith.constant 0 : index
    %83 = vector.load %arg4[%c6_56, %c0_57, %c0_58] : memref<42x35x39xbf16, #tpu.memory_space<vmem>>, vector<1x35x39xbf16>
    %84 = vector.shape_cast %83 : vector<1x35x39xbf16> to vector<35x39xbf16>
    %cst_59 = arith.constant dense<0.000000e+00> : vector<16x39xf32>
    %85 = tpu.matmul %82, %84, %cst_59 {dimension_numbers = #tpu.dot_dimension_numbers<[1], [0], [0], [1], [0, 0, 1, 1], [], []>} : vector<16x35xbf16>, vector<35x39xbf16>, vector<16x39xf32> -> vector<16x39xf32>
    %86 = arith.addf %74, %85 : vector<16x39xf32>
    %c7 = arith.constant 7 : index
    %c0_60 = arith.constant 0 : index
    %c0_61 = arith.constant 0 : index
    %87 = vector.load %arg1[%c7, %c0_60, %c0_61] : memref<42x16x128xbf16, #tpu.memory_space<vmem>>, vector<1x16x128xbf16>
    %88 = vector.shape_cast %87 : vector<1x16x128xbf16> to vector<16x128xbf16>
    %cst_62 = arith.constant dense<0.000000e+00> : vector<16x35xf32>
    %89 = tpu.matmul %88, %0, %cst_62 {dimension_numbers = #tpu.dot_dimension_numbers<[1], [0], [0], [1], [0, 0, 1, 1], [], []>} : vector<16x128xbf16>, vector<128x35xbf16>, vector<16x35xf32> -> vector<16x35xf32>
    %90 = vector.broadcast %1 : vector<1x35xf32> to vector<16x35xf32>
    %91 = arith.addf %89, %90 : vector<16x35xf32>
    %cst_63 = arith.constant 0.000000e+00 : f32
    %92 = vector.broadcast %cst_63 : f32 to vector<16x35xf32>
    %93 = arith.maximumf %91, %92 : vector<16x35xf32>
    %94 = arith.truncf %93 : vector<16x35xf32> to vector<16x35xbf16>
    %c7_64 = arith.constant 7 : index
    %c0_65 = arith.constant 0 : index
    %c0_66 = arith.constant 0 : index
    %95 = vector.load %arg4[%c7_64, %c0_65, %c0_66] : memref<42x35x39xbf16, #tpu.memory_space<vmem>>, vector<1x35x39xbf16>
    %96 = vector.shape_cast %95 : vector<1x35x39xbf16> to vector<35x39xbf16>
    %cst_67 = arith.constant dense<0.000000e+00> : vector<16x39xf32>
    %97 = tpu.matmul %94, %96, %cst_67 {dimension_numbers = #tpu.dot_dimension_numbers<[1], [0], [0], [1], [0, 0, 1, 1], [], []>} : vector<16x35xbf16>, vector<35x39xbf16>, vector<16x39xf32> -> vector<16x39xf32>
    %98 = arith.addf %86, %97 : vector<16x39xf32>
    %c8 = arith.constant 8 : index
    %c0_68 = arith.constant 0 : index
    %c0_69 = arith.constant 0 : index
    %99 = vector.load %arg1[%c8, %c0_68, %c0_69] : memref<42x16x128xbf16, #tpu.memory_space<vmem>>, vector<1x16x128xbf16>
    %100 = vector.shape_cast %99 : vector<1x16x128xbf16> to vector<16x128xbf16>
    %cst_70 = arith.constant dense<0.000000e+00> : vector<16x35xf32>
    %101 = tpu.matmul %100, %0, %cst_70 {dimension_numbers = #tpu.dot_dimension_numbers<[1], [0], [0], [1], [0, 0, 1, 1], [], []>} : vector<16x128xbf16>, vector<128x35xbf16>, vector<16x35xf32> -> vector<16x35xf32>
    %102 = vector.broadcast %1 : vector<1x35xf32> to vector<16x35xf32>
    %103 = arith.addf %101, %102 : vector<16x35xf32>
    %cst_71 = arith.constant 0.000000e+00 : f32
    %104 = vector.broadcast %cst_71 : f32 to vector<16x35xf32>
    %105 = arith.maximumf %103, %104 : vector<16x35xf32>
    %106 = arith.truncf %105 : vector<16x35xf32> to vector<16x35xbf16>
    %c8_72 = arith.constant 8 : index
    %c0_73 = arith.constant 0 : index
    %c0_74 = arith.constant 0 : index
    %107 = vector.load %arg4[%c8_72, %c0_73, %c0_74] : memref<42x35x39xbf16, #tpu.memory_space<vmem>>, vector<1x35x39xbf16>
    %108 = vector.shape_cast %107 : vector<1x35x39xbf16> to vector<35x39xbf16>
    %cst_75 = arith.constant dense<0.000000e+00> : vector<16x39xf32>
    %109 = tpu.matmul %106, %108, %cst_75 {dimension_numbers = #tpu.dot_dimension_numbers<[1], [0], [0], [1], [0, 0, 1, 1], [], []>} : vector<16x35xbf16>, vector<35x39xbf16>, vector<16x39xf32> -> vector<16x39xf32>
    %110 = arith.addf %98, %109 : vector<16x39xf32>
    %c9 = arith.constant 9 : index
    %c0_76 = arith.constant 0 : index
    %c0_77 = arith.constant 0 : index
    %111 = vector.load %arg1[%c9, %c0_76, %c0_77] : memref<42x16x128xbf16, #tpu.memory_space<vmem>>, vector<1x16x128xbf16>
    %112 = vector.shape_cast %111 : vector<1x16x128xbf16> to vector<16x128xbf16>
    %cst_78 = arith.constant dense<0.000000e+00> : vector<16x35xf32>
    %113 = tpu.matmul %112, %0, %cst_78 {dimension_numbers = #tpu.dot_dimension_numbers<[1], [0], [0], [1], [0, 0, 1, 1], [], []>} : vector<16x128xbf16>, vector<128x35xbf16>, vector<16x35xf32> -> vector<16x35xf32>
    %114 = vector.broadcast %1 : vector<1x35xf32> to vector<16x35xf32>
    %115 = arith.addf %113, %114 : vector<16x35xf32>
    %cst_79 = arith.constant 0.000000e+00 : f32
    %116 = vector.broadcast %cst_79 : f32 to vector<16x35xf32>
    %117 = arith.maximumf %115, %116 : vector<16x35xf32>
    %118 = arith.truncf %117 : vector<16x35xf32> to vector<16x35xbf16>
    %c9_80 = arith.constant 9 : index
    %c0_81 = arith.constant 0 : index
    %c0_82 = arith.constant 0 : index
    %119 = vector.load %arg4[%c9_80, %c0_81, %c0_82] : memref<42x35x39xbf16, #tpu.memory_space<vmem>>, vector<1x35x39xbf16>
    %120 = vector.shape_cast %119 : vector<1x35x39xbf16> to vector<35x39xbf16>
    %cst_83 = arith.constant dense<0.000000e+00> : vector<16x39xf32>
    %121 = tpu.matmul %118, %120, %cst_83 {dimension_numbers = #tpu.dot_dimension_numbers<[1], [0], [0], [1], [0, 0, 1, 1], [], []>} : vector<16x35xbf16>, vector<35x39xbf16>, vector<16x39xf32> -> vector<16x39xf32>
    %122 = arith.addf %110, %121 : vector<16x39xf32>
    %c10 = arith.constant 10 : index
    %c0_84 = arith.constant 0 : index
    %c0_85 = arith.constant 0 : index
    %123 = vector.load %arg1[%c10, %c0_84, %c0_85] : memref<42x16x128xbf16, #tpu.memory_space<vmem>>, vector<1x16x128xbf16>
    %124 = vector.shape_cast %123 : vector<1x16x128xbf16> to vector<16x128xbf16>
    %cst_86 = arith.constant dense<0.000000e+00> : vector<16x35xf32>
    %125 = tpu.matmul %124, %0, %cst_86 {dimension_numbers = #tpu.dot_dimension_numbers<[1], [0], [0], [1], [0, 0, 1, 1], [], []>} : vector<16x128xbf16>, vector<128x35xbf16>, vector<16x35xf32> -> vector<16x35xf32>
    %126 = vector.broadcast %1 : vector<1x35xf32> to vector<16x35xf32>
    %127 = arith.addf %125, %126 : vector<16x35xf32>
    %cst_87 = arith.constant 0.000000e+00 : f32
    %128 = vector.broadcast %cst_87 : f32 to vector<16x35xf32>
    %129 = arith.maximumf %127, %128 : vector<16x35xf32>
    %130 = arith.truncf %129 : vector<16x35xf32> to vector<16x35xbf16>
    %c10_88 = arith.constant 10 : index
    %c0_89 = arith.constant 0 : index
    %c0_90 = arith.constant 0 : index
    %131 = vector.load %arg4[%c10_88, %c0_89, %c0_90] : memref<42x35x39xbf16, #tpu.memory_space<vmem>>, vector<1x35x39xbf16>
    %132 = vector.shape_cast %131 : vector<1x35x39xbf16> to vector<35x39xbf16>
    %cst_91 = arith.constant dense<0.000000e+00> : vector<16x39xf32>
    %133 = tpu.matmul %130, %132, %cst_91 {dimension_numbers = #tpu.dot_dimension_numbers<[1], [0], [0], [1], [0, 0, 1, 1], [], []>} : vector<16x35xbf16>, vector<35x39xbf16>, vector<16x39xf32> -> vector<16x39xf32>
    %134 = arith.addf %122, %133 : vector<16x39xf32>
    %c11 = arith.constant 11 : index
    %c0_92 = arith.constant 0 : index
    %c0_93 = arith.constant 0 : index
    %135 = vector.load %arg1[%c11, %c0_92, %c0_93] : memref<42x16x128xbf16, #tpu.memory_space<vmem>>, vector<1x16x128xbf16>
    %136 = vector.shape_cast %135 : vector<1x16x128xbf16> to vector<16x128xbf16>
    %cst_94 = arith.constant dense<0.000000e+00> : vector<16x35xf32>
    %137 = tpu.matmul %136, %0, %cst_94 {dimension_numbers = #tpu.dot_dimension_numbers<[1], [0], [0], [1], [0, 0, 1, 1], [], []>} : vector<16x128xbf16>, vector<128x35xbf16>, vector<16x35xf32> -> vector<16x35xf32>
    %138 = vector.broadcast %1 : vector<1x35xf32> to vector<16x35xf32>
    %139 = arith.addf %137, %138 : vector<16x35xf32>
    %cst_95 = arith.constant 0.000000e+00 : f32
    %140 = vector.broadcast %cst_95 : f32 to vector<16x35xf32>
    %141 = arith.maximumf %139, %140 : vector<16x35xf32>
    %142 = arith.truncf %141 : vector<16x35xf32> to vector<16x35xbf16>
    %c11_96 = arith.constant 11 : index
    %c0_97 = arith.constant 0 : index
    %c0_98 = arith.constant 0 : index
    %143 = vector.load %arg4[%c11_96, %c0_97, %c0_98] : memref<42x35x39xbf16, #tpu.memory_space<vmem>>, vector<1x35x39xbf16>
    %144 = vector.shape_cast %143 : vector<1x35x39xbf16> to vector<35x39xbf16>
    %cst_99 = arith.constant dense<0.000000e+00> : vector<16x39xf32>
    %145 = tpu.matmul %142, %144, %cst_99 {dimension_numbers = #tpu.dot_dimension_numbers<[1], [0], [0], [1], [0, 0, 1, 1], [], []>} : vector<16x35xbf16>, vector<35x39xbf16>, vector<16x39xf32> -> vector<16x39xf32>
    %146 = arith.addf %134, %145 : vector<16x39xf32>
    %c12 = arith.constant 12 : index
    %c0_100 = arith.constant 0 : index
    %c0_101 = arith.constant 0 : index
    %147 = vector.load %arg1[%c12, %c0_100, %c0_101] : memref<42x16x128xbf16, #tpu.memory_space<vmem>>, vector<1x16x128xbf16>
    %148 = vector.shape_cast %147 : vector<1x16x128xbf16> to vector<16x128xbf16>
    %cst_102 = arith.constant dense<0.000000e+00> : vector<16x35xf32>
    %149 = tpu.matmul %148, %0, %cst_102 {dimension_numbers = #tpu.dot_dimension_numbers<[1], [0], [0], [1], [0, 0, 1, 1], [], []>} : vector<16x128xbf16>, vector<128x35xbf16>, vector<16x35xf32> -> vector<16x35xf32>
    %150 = vector.broadcast %1 : vector<1x35xf32> to vector<16x35xf32>
    %151 = arith.addf %149, %150 : vector<16x35xf32>
    %cst_103 = arith.constant 0.000000e+00 : f32
    %152 = vector.broadcast %cst_103 : f32 to vector<16x35xf32>
    %153 = arith.maximumf %151, %152 : vector<16x35xf32>
    %154 = arith.truncf %153 : vector<16x35xf32> to vector<16x35xbf16>
    %c12_104 = arith.constant 12 : index
    %c0_105 = arith.constant 0 : index
    %c0_106 = arith.constant 0 : index
    %155 = vector.load %arg4[%c12_104, %c0_105, %c0_106] : memref<42x35x39xbf16, #tpu.memory_space<vmem>>, vector<1x35x39xbf16>
    %156 = vector.shape_cast %155 : vector<1x35x39xbf16> to vector<35x39xbf16>
    %cst_107 = arith.constant dense<0.000000e+00> : vector<16x39xf32>
    %157 = tpu.matmul %154, %156, %cst_107 {dimension_numbers = #tpu.dot_dimension_numbers<[1], [0], [0], [1], [0, 0, 1, 1], [], []>} : vector<16x35xbf16>, vector<35x39xbf16>, vector<16x39xf32> -> vector<16x39xf32>
    %158 = arith.addf %146, %157 : vector<16x39xf32>
    %c13 = arith.constant 13 : index
    %c0_108 = arith.constant 0 : index
    %c0_109 = arith.constant 0 : index
    %159 = vector.load %arg1[%c13, %c0_108, %c0_109] : memref<42x16x128xbf16, #tpu.memory_space<vmem>>, vector<1x16x128xbf16>
    %160 = vector.shape_cast %159 : vector<1x16x128xbf16> to vector<16x128xbf16>
    %cst_110 = arith.constant dense<0.000000e+00> : vector<16x35xf32>
    %161 = tpu.matmul %160, %0, %cst_110 {dimension_numbers = #tpu.dot_dimension_numbers<[1], [0], [0], [1], [0, 0, 1, 1], [], []>} : vector<16x128xbf16>, vector<128x35xbf16>, vector<16x35xf32> -> vector<16x35xf32>
    %162 = vector.broadcast %1 : vector<1x35xf32> to vector<16x35xf32>
    %163 = arith.addf %161, %162 : vector<16x35xf32>
    %cst_111 = arith.constant 0.000000e+00 : f32
    %164 = vector.broadcast %cst_111 : f32 to vector<16x35xf32>
    %165 = arith.maximumf %163, %164 : vector<16x35xf32>
    %166 = arith.truncf %165 : vector<16x35xf32> to vector<16x35xbf16>
    %c13_112 = arith.constant 13 : index
    %c0_113 = arith.constant 0 : index
    %c0_114 = arith.constant 0 : index
    %167 = vector.load %arg4[%c13_112, %c0_113, %c0_114] : memref<42x35x39xbf16, #tpu.memory_space<vmem>>, vector<1x35x39xbf16>
    %168 = vector.shape_cast %167 : vector<1x35x39xbf16> to vector<35x39xbf16>
    %cst_115 = arith.constant dense<0.000000e+00> : vector<16x39xf32>
    %169 = tpu.matmul %166, %168, %cst_115 {dimension_numbers = #tpu.dot_dimension_numbers<[1], [0], [0], [1], [0, 0, 1, 1], [], []>} : vector<16x35xbf16>, vector<35x39xbf16>, vector<16x39xf32> -> vector<16x39xf32>
    %170 = arith.addf %158, %169 : vector<16x39xf32>
    %c14 = arith.constant 14 : index
    %c0_116 = arith.constant 0 : index
    %c0_117 = arith.constant 0 : index
    %171 = vector.load %arg1[%c14, %c0_116, %c0_117] : memref<42x16x128xbf16, #tpu.memory_space<vmem>>, vector<1x16x128xbf16>
    %172 = vector.shape_cast %171 : vector<1x16x128xbf16> to vector<16x128xbf16>
    %cst_118 = arith.constant dense<0.000000e+00> : vector<16x35xf32>
    %173 = tpu.matmul %172, %0, %cst_118 {dimension_numbers = #tpu.dot_dimension_numbers<[1], [0], [0], [1], [0, 0, 1, 1], [], []>} : vector<16x128xbf16>, vector<128x35xbf16>, vector<16x35xf32> -> vector<16x35xf32>
    %174 = vector.broadcast %1 : vector<1x35xf32> to vector<16x35xf32>
    %175 = arith.addf %173, %174 : vector<16x35xf32>
    %cst_119 = arith.constant 0.000000e+00 : f32
    %176 = vector.broadcast %cst_119 : f32 to vector<16x35xf32>
    %177 = arith.maximumf %175, %176 : vector<16x35xf32>
    %178 = arith.truncf %177 : vector<16x35xf32> to vector<16x35xbf16>
    %c14_120 = arith.constant 14 : index
    %c0_121 = arith.constant 0 : index
    %c0_122 = arith.constant 0 : index
    %179 = vector.load %arg4[%c14_120, %c0_121, %c0_122] : memref<42x35x39xbf16, #tpu.memory_space<vmem>>, vector<1x35x39xbf16>
    %180 = vector.shape_cast %179 : vector<1x35x39xbf16> to vector<35x39xbf16>
    %cst_123 = arith.constant dense<0.000000e+00> : vector<16x39xf32>
    %181 = tpu.matmul %178, %180, %cst_123 {dimension_numbers = #tpu.dot_dimension_numbers<[1], [0], [0], [1], [0, 0, 1, 1], [], []>} : vector<16x35xbf16>, vector<35x39xbf16>, vector<16x39xf32> -> vector<16x39xf32>
    %182 = arith.addf %170, %181 : vector<16x39xf32>
    %c15 = arith.constant 15 : index
    %c0_124 = arith.constant 0 : index
    %c0_125 = arith.constant 0 : index
    %183 = vector.load %arg1[%c15, %c0_124, %c0_125] : memref<42x16x128xbf16, #tpu.memory_space<vmem>>, vector<1x16x128xbf16>
    %184 = vector.shape_cast %183 : vector<1x16x128xbf16> to vector<16x128xbf16>
    %cst_126 = arith.constant dense<0.000000e+00> : vector<16x35xf32>
    %185 = tpu.matmul %184, %0, %cst_126 {dimension_numbers = #tpu.dot_dimension_numbers<[1], [0], [0], [1], [0, 0, 1, 1], [], []>} : vector<16x128xbf16>, vector<128x35xbf16>, vector<16x35xf32> -> vector<16x35xf32>
    %186 = vector.broadcast %1 : vector<1x35xf32> to vector<16x35xf32>
    %187 = arith.addf %185, %186 : vector<16x35xf32>
    %cst_127 = arith.constant 0.000000e+00 : f32
    %188 = vector.broadcast %cst_127 : f32 to vector<16x35xf32>
    %189 = arith.maximumf %187, %188 : vector<16x35xf32>
    %190 = arith.truncf %189 : vector<16x35xf32> to vector<16x35xbf16>
    %c15_128 = arith.constant 15 : index
    %c0_129 = arith.constant 0 : index
    %c0_130 = arith.constant 0 : index
    %191 = vector.load %arg4[%c15_128, %c0_129, %c0_130] : memref<42x35x39xbf16, #tpu.memory_space<vmem>>, vector<1x35x39xbf16>
    %192 = vector.shape_cast %191 : vector<1x35x39xbf16> to vector<35x39xbf16>
    %cst_131 = arith.constant dense<0.000000e+00> : vector<16x39xf32>
    %193 = tpu.matmul %190, %192, %cst_131 {dimension_numbers = #tpu.dot_dimension_numbers<[1], [0], [0], [1], [0, 0, 1, 1], [], []>} : vector<16x35xbf16>, vector<35x39xbf16>, vector<16x39xf32> -> vector<16x39xf32>
    %194 = arith.addf %182, %193 : vector<16x39xf32>
    %c16 = arith.constant 16 : index
    %c0_132 = arith.constant 0 : index
    %c0_133 = arith.constant 0 : index
    %195 = vector.load %arg1[%c16, %c0_132, %c0_133] : memref<42x16x128xbf16, #tpu.memory_space<vmem>>, vector<1x16x128xbf16>
    %196 = vector.shape_cast %195 : vector<1x16x128xbf16> to vector<16x128xbf16>
    %cst_134 = arith.constant dense<0.000000e+00> : vector<16x35xf32>
    %197 = tpu.matmul %196, %0, %cst_134 {dimension_numbers = #tpu.dot_dimension_numbers<[1], [0], [0], [1], [0, 0, 1, 1], [], []>} : vector<16x128xbf16>, vector<128x35xbf16>, vector<16x35xf32> -> vector<16x35xf32>
    %198 = vector.broadcast %1 : vector<1x35xf32> to vector<16x35xf32>
    %199 = arith.addf %197, %198 : vector<16x35xf32>
    %cst_135 = arith.constant 0.000000e+00 : f32
    %200 = vector.broadcast %cst_135 : f32 to vector<16x35xf32>
    %201 = arith.maximumf %199, %200 : vector<16x35xf32>
    %202 = arith.truncf %201 : vector<16x35xf32> to vector<16x35xbf16>
    %c16_136 = arith.constant 16 : index
    %c0_137 = arith.constant 0 : index
    %c0_138 = arith.constant 0 : index
    %203 = vector.load %arg4[%c16_136, %c0_137, %c0_138] : memref<42x35x39xbf16, #tpu.memory_space<vmem>>, vector<1x35x39xbf16>
    %204 = vector.shape_cast %203 : vector<1x35x39xbf16> to vector<35x39xbf16>
    %cst_139 = arith.constant dense<0.000000e+00> : vector<16x39xf32>
    %205 = tpu.matmul %202, %204, %cst_139 {dimension_numbers = #tpu.dot_dimension_numbers<[1], [0], [0], [1], [0, 0, 1, 1], [], []>} : vector<16x35xbf16>, vector<35x39xbf16>, vector<16x39xf32> -> vector<16x39xf32>
    %206 = arith.addf %194, %205 : vector<16x39xf32>
    %c17 = arith.constant 17 : index
    %c0_140 = arith.constant 0 : index
    %c0_141 = arith.constant 0 : index
    %207 = vector.load %arg1[%c17, %c0_140, %c0_141] : memref<42x16x128xbf16, #tpu.memory_space<vmem>>, vector<1x16x128xbf16>
    %208 = vector.shape_cast %207 : vector<1x16x128xbf16> to vector<16x128xbf16>
    %cst_142 = arith.constant dense<0.000000e+00> : vector<16x35xf32>
    %209 = tpu.matmul %208, %0, %cst_142 {dimension_numbers = #tpu.dot_dimension_numbers<[1], [0], [0], [1], [0, 0, 1, 1], [], []>} : vector<16x128xbf16>, vector<128x35xbf16>, vector<16x35xf32> -> vector<16x35xf32>
    %210 = vector.broadcast %1 : vector<1x35xf32> to vector<16x35xf32>
    %211 = arith.addf %209, %210 : vector<16x35xf32>
    %cst_143 = arith.constant 0.000000e+00 : f32
    %212 = vector.broadcast %cst_143 : f32 to vector<16x35xf32>
    %213 = arith.maximumf %211, %212 : vector<16x35xf32>
    %214 = arith.truncf %213 : vector<16x35xf32> to vector<16x35xbf16>
    %c17_144 = arith.constant 17 : index
    %c0_145 = arith.constant 0 : index
    %c0_146 = arith.constant 0 : index
    %215 = vector.load %arg4[%c17_144, %c0_145, %c0_146] : memref<42x35x39xbf16, #tpu.memory_space<vmem>>, vector<1x35x39xbf16>
    %216 = vector.shape_cast %215 : vector<1x35x39xbf16> to vector<35x39xbf16>
    %cst_147 = arith.constant dense<0.000000e+00> : vector<16x39xf32>
    %217 = tpu.matmul %214, %216, %cst_147 {dimension_numbers = #tpu.dot_dimension_numbers<[1], [0], [0], [1], [0, 0, 1, 1], [], []>} : vector<16x35xbf16>, vector<35x39xbf16>, vector<16x39xf32> -> vector<16x39xf32>
    %218 = arith.addf %206, %217 : vector<16x39xf32>
    %c18 = arith.constant 18 : index
    %c0_148 = arith.constant 0 : index
    %c0_149 = arith.constant 0 : index
    %219 = vector.load %arg1[%c18, %c0_148, %c0_149] : memref<42x16x128xbf16, #tpu.memory_space<vmem>>, vector<1x16x128xbf16>
    %220 = vector.shape_cast %219 : vector<1x16x128xbf16> to vector<16x128xbf16>
    %cst_150 = arith.constant dense<0.000000e+00> : vector<16x35xf32>
    %221 = tpu.matmul %220, %0, %cst_150 {dimension_numbers = #tpu.dot_dimension_numbers<[1], [0], [0], [1], [0, 0, 1, 1], [], []>} : vector<16x128xbf16>, vector<128x35xbf16>, vector<16x35xf32> -> vector<16x35xf32>
    %222 = vector.broadcast %1 : vector<1x35xf32> to vector<16x35xf32>
    %223 = arith.addf %221, %222 : vector<16x35xf32>
    %cst_151 = arith.constant 0.000000e+00 : f32
    %224 = vector.broadcast %cst_151 : f32 to vector<16x35xf32>
    %225 = arith.maximumf %223, %224 : vector<16x35xf32>
    %226 = arith.truncf %225 : vector<16x35xf32> to vector<16x35xbf16>
    %c18_152 = arith.constant 18 : index
    %c0_153 = arith.constant 0 : index
    %c0_154 = arith.constant 0 : index
    %227 = vector.load %arg4[%c18_152, %c0_153, %c0_154] : memref<42x35x39xbf16, #tpu.memory_space<vmem>>, vector<1x35x39xbf16>
    %228 = vector.shape_cast %227 : vector<1x35x39xbf16> to vector<35x39xbf16>
    %cst_155 = arith.constant dense<0.000000e+00> : vector<16x39xf32>
    %229 = tpu.matmul %226, %228, %cst_155 {dimension_numbers = #tpu.dot_dimension_numbers<[1], [0], [0], [1], [0, 0, 1, 1], [], []>} : vector<16x35xbf16>, vector<35x39xbf16>, vector<16x39xf32> -> vector<16x39xf32>
    %230 = arith.addf %218, %229 : vector<16x39xf32>
    %c19 = arith.constant 19 : index
    %c0_156 = arith.constant 0 : index
    %c0_157 = arith.constant 0 : index
    %231 = vector.load %arg1[%c19, %c0_156, %c0_157] : memref<42x16x128xbf16, #tpu.memory_space<vmem>>, vector<1x16x128xbf16>
    %232 = vector.shape_cast %231 : vector<1x16x128xbf16> to vector<16x128xbf16>
    %cst_158 = arith.constant dense<0.000000e+00> : vector<16x35xf32>
    %233 = tpu.matmul %232, %0, %cst_158 {dimension_numbers = #tpu.dot_dimension_numbers<[1], [0], [0], [1], [0, 0, 1, 1], [], []>} : vector<16x128xbf16>, vector<128x35xbf16>, vector<16x35xf32> -> vector<16x35xf32>
    %234 = vector.broadcast %1 : vector<1x35xf32> to vector<16x35xf32>
    %235 = arith.addf %233, %234 : vector<16x35xf32>
    %cst_159 = arith.constant 0.000000e+00 : f32
    %236 = vector.broadcast %cst_159 : f32 to vector<16x35xf32>
    %237 = arith.maximumf %235, %236 : vector<16x35xf32>
    %238 = arith.truncf %237 : vector<16x35xf32> to vector<16x35xbf16>
    %c19_160 = arith.constant 19 : index
    %c0_161 = arith.constant 0 : index
    %c0_162 = arith.constant 0 : index
    %239 = vector.load %arg4[%c19_160, %c0_161, %c0_162] : memref<42x35x39xbf16, #tpu.memory_space<vmem>>, vector<1x35x39xbf16>
    %240 = vector.shape_cast %239 : vector<1x35x39xbf16> to vector<35x39xbf16>
    %cst_163 = arith.constant dense<0.000000e+00> : vector<16x39xf32>
    %241 = tpu.matmul %238, %240, %cst_163 {dimension_numbers = #tpu.dot_dimension_numbers<[1], [0], [0], [1], [0, 0, 1, 1], [], []>} : vector<16x35xbf16>, vector<35x39xbf16>, vector<16x39xf32> -> vector<16x39xf32>
    %242 = arith.addf %230, %241 : vector<16x39xf32>
    %c20 = arith.constant 20 : index
    %c0_164 = arith.constant 0 : index
    %c0_165 = arith.constant 0 : index
    %243 = vector.load %arg1[%c20, %c0_164, %c0_165] : memref<42x16x128xbf16, #tpu.memory_space<vmem>>, vector<1x16x128xbf16>
    %244 = vector.shape_cast %243 : vector<1x16x128xbf16> to vector<16x128xbf16>
    %cst_166 = arith.constant dense<0.000000e+00> : vector<16x35xf32>
    %245 = tpu.matmul %244, %0, %cst_166 {dimension_numbers = #tpu.dot_dimension_numbers<[1], [0], [0], [1], [0, 0, 1, 1], [], []>} : vector<16x128xbf16>, vector<128x35xbf16>, vector<16x35xf32> -> vector<16x35xf32>
    %246 = vector.broadcast %1 : vector<1x35xf32> to vector<16x35xf32>
    %247 = arith.addf %245, %246 : vector<16x35xf32>
    %cst_167 = arith.constant 0.000000e+00 : f32
    %248 = vector.broadcast %cst_167 : f32 to vector<16x35xf32>
    %249 = arith.maximumf %247, %248 : vector<16x35xf32>
    %250 = arith.truncf %249 : vector<16x35xf32> to vector<16x35xbf16>
    %c20_168 = arith.constant 20 : index
    %c0_169 = arith.constant 0 : index
    %c0_170 = arith.constant 0 : index
    %251 = vector.load %arg4[%c20_168, %c0_169, %c0_170] : memref<42x35x39xbf16, #tpu.memory_space<vmem>>, vector<1x35x39xbf16>
    %252 = vector.shape_cast %251 : vector<1x35x39xbf16> to vector<35x39xbf16>
    %cst_171 = arith.constant dense<0.000000e+00> : vector<16x39xf32>
    %253 = tpu.matmul %250, %252, %cst_171 {dimension_numbers = #tpu.dot_dimension_numbers<[1], [0], [0], [1], [0, 0, 1, 1], [], []>} : vector<16x35xbf16>, vector<35x39xbf16>, vector<16x39xf32> -> vector<16x39xf32>
    %254 = arith.addf %242, %253 : vector<16x39xf32>
    %c21 = arith.constant 21 : index
    %c0_172 = arith.constant 0 : index
    %c0_173 = arith.constant 0 : index
    %255 = vector.load %arg1[%c21, %c0_172, %c0_173] : memref<42x16x128xbf16, #tpu.memory_space<vmem>>, vector<1x16x128xbf16>
    %256 = vector.shape_cast %255 : vector<1x16x128xbf16> to vector<16x128xbf16>
    %cst_174 = arith.constant dense<0.000000e+00> : vector<16x35xf32>
    %257 = tpu.matmul %256, %0, %cst_174 {dimension_numbers = #tpu.dot_dimension_numbers<[1], [0], [0], [1], [0, 0, 1, 1], [], []>} : vector<16x128xbf16>, vector<128x35xbf16>, vector<16x35xf32> -> vector<16x35xf32>
    %258 = vector.broadcast %1 : vector<1x35xf32> to vector<16x35xf32>
    %259 = arith.addf %257, %258 : vector<16x35xf32>
    %cst_175 = arith.constant 0.000000e+00 : f32
    %260 = vector.broadcast %cst_175 : f32 to vector<16x35xf32>
    %261 = arith.maximumf %259, %260 : vector<16x35xf32>
    %262 = arith.truncf %261 : vector<16x35xf32> to vector<16x35xbf16>
    %c21_176 = arith.constant 21 : index
    %c0_177 = arith.constant 0 : index
    %c0_178 = arith.constant 0 : index
    %263 = vector.load %arg4[%c21_176, %c0_177, %c0_178] : memref<42x35x39xbf16, #tpu.memory_space<vmem>>, vector<1x35x39xbf16>
    %264 = vector.shape_cast %263 : vector<1x35x39xbf16> to vector<35x39xbf16>
    %cst_179 = arith.constant dense<0.000000e+00> : vector<16x39xf32>
    %265 = tpu.matmul %262, %264, %cst_179 {dimension_numbers = #tpu.dot_dimension_numbers<[1], [0], [0], [1], [0, 0, 1, 1], [], []>} : vector<16x35xbf16>, vector<35x39xbf16>, vector<16x39xf32> -> vector<16x39xf32>
    %266 = arith.addf %254, %265 : vector<16x39xf32>
    %c22 = arith.constant 22 : index
    %c0_180 = arith.constant 0 : index
    %c0_181 = arith.constant 0 : index
    %267 = vector.load %arg1[%c22, %c0_180, %c0_181] : memref<42x16x128xbf16, #tpu.memory_space<vmem>>, vector<1x16x128xbf16>
    %268 = vector.shape_cast %267 : vector<1x16x128xbf16> to vector<16x128xbf16>
    %cst_182 = arith.constant dense<0.000000e+00> : vector<16x35xf32>
    %269 = tpu.matmul %268, %0, %cst_182 {dimension_numbers = #tpu.dot_dimension_numbers<[1], [0], [0], [1], [0, 0, 1, 1], [], []>} : vector<16x128xbf16>, vector<128x35xbf16>, vector<16x35xf32> -> vector<16x35xf32>
    %270 = vector.broadcast %1 : vector<1x35xf32> to vector<16x35xf32>
    %271 = arith.addf %269, %270 : vector<16x35xf32>
    %cst_183 = arith.constant 0.000000e+00 : f32
    %272 = vector.broadcast %cst_183 : f32 to vector<16x35xf32>
    %273 = arith.maximumf %271, %272 : vector<16x35xf32>
    %274 = arith.truncf %273 : vector<16x35xf32> to vector<16x35xbf16>
    %c22_184 = arith.constant 22 : index
    %c0_185 = arith.constant 0 : index
    %c0_186 = arith.constant 0 : index
    %275 = vector.load %arg4[%c22_184, %c0_185, %c0_186] : memref<42x35x39xbf16, #tpu.memory_space<vmem>>, vector<1x35x39xbf16>
    %276 = vector.shape_cast %275 : vector<1x35x39xbf16> to vector<35x39xbf16>
    %cst_187 = arith.constant dense<0.000000e+00> : vector<16x39xf32>
    %277 = tpu.matmul %274, %276, %cst_187 {dimension_numbers = #tpu.dot_dimension_numbers<[1], [0], [0], [1], [0, 0, 1, 1], [], []>} : vector<16x35xbf16>, vector<35x39xbf16>, vector<16x39xf32> -> vector<16x39xf32>
    %278 = arith.addf %266, %277 : vector<16x39xf32>
    %c23 = arith.constant 23 : index
    %c0_188 = arith.constant 0 : index
    %c0_189 = arith.constant 0 : index
    %279 = vector.load %arg1[%c23, %c0_188, %c0_189] : memref<42x16x128xbf16, #tpu.memory_space<vmem>>, vector<1x16x128xbf16>
    %280 = vector.shape_cast %279 : vector<1x16x128xbf16> to vector<16x128xbf16>
    %cst_190 = arith.constant dense<0.000000e+00> : vector<16x35xf32>
    %281 = tpu.matmul %280, %0, %cst_190 {dimension_numbers = #tpu.dot_dimension_numbers<[1], [0], [0], [1], [0, 0, 1, 1], [], []>} : vector<16x128xbf16>, vector<128x35xbf16>, vector<16x35xf32> -> vector<16x35xf32>
    %282 = vector.broadcast %1 : vector<1x35xf32> to vector<16x35xf32>
    %283 = arith.addf %281, %282 : vector<16x35xf32>
    %cst_191 = arith.constant 0.000000e+00 : f32
    %284 = vector.broadcast %cst_191 : f32 to vector<16x35xf32>
    %285 = arith.maximumf %283, %284 : vector<16x35xf32>
    %286 = arith.truncf %285 : vector<16x35xf32> to vector<16x35xbf16>
    %c23_192 = arith.constant 23 : index
    %c0_193 = arith.constant 0 : index
    %c0_194 = arith.constant 0 : index
    %287 = vector.load %arg4[%c23_192, %c0_193, %c0_194] : memref<42x35x39xbf16, #tpu.memory_space<vmem>>, vector<1x35x39xbf16>
    %288 = vector.shape_cast %287 : vector<1x35x39xbf16> to vector<35x39xbf16>
    %cst_195 = arith.constant dense<0.000000e+00> : vector<16x39xf32>
    %289 = tpu.matmul %286, %288, %cst_195 {dimension_numbers = #tpu.dot_dimension_numbers<[1], [0], [0], [1], [0, 0, 1, 1], [], []>} : vector<16x35xbf16>, vector<35x39xbf16>, vector<16x39xf32> -> vector<16x39xf32>
    %290 = arith.addf %278, %289 : vector<16x39xf32>
    %c24 = arith.constant 24 : index
    %c0_196 = arith.constant 0 : index
    %c0_197 = arith.constant 0 : index
    %291 = vector.load %arg1[%c24, %c0_196, %c0_197] : memref<42x16x128xbf16, #tpu.memory_space<vmem>>, vector<1x16x128xbf16>
    %292 = vector.shape_cast %291 : vector<1x16x128xbf16> to vector<16x128xbf16>
    %cst_198 = arith.constant dense<0.000000e+00> : vector<16x35xf32>
    %293 = tpu.matmul %292, %0, %cst_198 {dimension_numbers = #tpu.dot_dimension_numbers<[1], [0], [0], [1], [0, 0, 1, 1], [], []>} : vector<16x128xbf16>, vector<128x35xbf16>, vector<16x35xf32> -> vector<16x35xf32>
    %294 = vector.broadcast %1 : vector<1x35xf32> to vector<16x35xf32>
    %295 = arith.addf %293, %294 : vector<16x35xf32>
    %cst_199 = arith.constant 0.000000e+00 : f32
    %296 = vector.broadcast %cst_199 : f32 to vector<16x35xf32>
    %297 = arith.maximumf %295, %296 : vector<16x35xf32>
    %298 = arith.truncf %297 : vector<16x35xf32> to vector<16x35xbf16>
    %c24_200 = arith.constant 24 : index
    %c0_201 = arith.constant 0 : index
    %c0_202 = arith.constant 0 : index
    %299 = vector.load %arg4[%c24_200, %c0_201, %c0_202] : memref<42x35x39xbf16, #tpu.memory_space<vmem>>, vector<1x35x39xbf16>
    %300 = vector.shape_cast %299 : vector<1x35x39xbf16> to vector<35x39xbf16>
    %cst_203 = arith.constant dense<0.000000e+00> : vector<16x39xf32>
    %301 = tpu.matmul %298, %300, %cst_203 {dimension_numbers = #tpu.dot_dimension_numbers<[1], [0], [0], [1], [0, 0, 1, 1], [], []>} : vector<16x35xbf16>, vector<35x39xbf16>, vector<16x39xf32> -> vector<16x39xf32>
    %302 = arith.addf %290, %301 : vector<16x39xf32>
    %c25 = arith.constant 25 : index
    %c0_204 = arith.constant 0 : index
    %c0_205 = arith.constant 0 : index
    %303 = vector.load %arg1[%c25, %c0_204, %c0_205] : memref<42x16x128xbf16, #tpu.memory_space<vmem>>, vector<1x16x128xbf16>
    %304 = vector.shape_cast %303 : vector<1x16x128xbf16> to vector<16x128xbf16>
    %cst_206 = arith.constant dense<0.000000e+00> : vector<16x35xf32>
    %305 = tpu.matmul %304, %0, %cst_206 {dimension_numbers = #tpu.dot_dimension_numbers<[1], [0], [0], [1], [0, 0, 1, 1], [], []>} : vector<16x128xbf16>, vector<128x35xbf16>, vector<16x35xf32> -> vector<16x35xf32>
    %306 = vector.broadcast %1 : vector<1x35xf32> to vector<16x35xf32>
    %307 = arith.addf %305, %306 : vector<16x35xf32>
    %cst_207 = arith.constant 0.000000e+00 : f32
    %308 = vector.broadcast %cst_207 : f32 to vector<16x35xf32>
    %309 = arith.maximumf %307, %308 : vector<16x35xf32>
    %310 = arith.truncf %309 : vector<16x35xf32> to vector<16x35xbf16>
    %c25_208 = arith.constant 25 : index
    %c0_209 = arith.constant 0 : index
    %c0_210 = arith.constant 0 : index
    %311 = vector.load %arg4[%c25_208, %c0_209, %c0_210] : memref<42x35x39xbf16, #tpu.memory_space<vmem>>, vector<1x35x39xbf16>
    %312 = vector.shape_cast %311 : vector<1x35x39xbf16> to vector<35x39xbf16>
    %cst_211 = arith.constant dense<0.000000e+00> : vector<16x39xf32>
    %313 = tpu.matmul %310, %312, %cst_211 {dimension_numbers = #tpu.dot_dimension_numbers<[1], [0], [0], [1], [0, 0, 1, 1], [], []>} : vector<16x35xbf16>, vector<35x39xbf16>, vector<16x39xf32> -> vector<16x39xf32>
    %314 = arith.addf %302, %313 : vector<16x39xf32>
    %c26 = arith.constant 26 : index
    %c0_212 = arith.constant 0 : index
    %c0_213 = arith.constant 0 : index
    %315 = vector.load %arg1[%c26, %c0_212, %c0_213] : memref<42x16x128xbf16, #tpu.memory_space<vmem>>, vector<1x16x128xbf16>
    %316 = vector.shape_cast %315 : vector<1x16x128xbf16> to vector<16x128xbf16>
    %cst_214 = arith.constant dense<0.000000e+00> : vector<16x35xf32>
    %317 = tpu.matmul %316, %0, %cst_214 {dimension_numbers = #tpu.dot_dimension_numbers<[1], [0], [0], [1], [0, 0, 1, 1], [], []>} : vector<16x128xbf16>, vector<128x35xbf16>, vector<16x35xf32> -> vector<16x35xf32>
    %318 = vector.broadcast %1 : vector<1x35xf32> to vector<16x35xf32>
    %319 = arith.addf %317, %318 : vector<16x35xf32>
    %cst_215 = arith.constant 0.000000e+00 : f32
    %320 = vector.broadcast %cst_215 : f32 to vector<16x35xf32>
    %321 = arith.maximumf %319, %320 : vector<16x35xf32>
    %322 = arith.truncf %321 : vector<16x35xf32> to vector<16x35xbf16>
    %c26_216 = arith.constant 26 : index
    %c0_217 = arith.constant 0 : index
    %c0_218 = arith.constant 0 : index
    %323 = vector.load %arg4[%c26_216, %c0_217, %c0_218] : memref<42x35x39xbf16, #tpu.memory_space<vmem>>, vector<1x35x39xbf16>
    %324 = vector.shape_cast %323 : vector<1x35x39xbf16> to vector<35x39xbf16>
    %cst_219 = arith.constant dense<0.000000e+00> : vector<16x39xf32>
    %325 = tpu.matmul %322, %324, %cst_219 {dimension_numbers = #tpu.dot_dimension_numbers<[1], [0], [0], [1], [0, 0, 1, 1], [], []>} : vector<16x35xbf16>, vector<35x39xbf16>, vector<16x39xf32> -> vector<16x39xf32>
    %326 = arith.addf %314, %325 : vector<16x39xf32>
    %c27 = arith.constant 27 : index
    %c0_220 = arith.constant 0 : index
    %c0_221 = arith.constant 0 : index
    %327 = vector.load %arg1[%c27, %c0_220, %c0_221] : memref<42x16x128xbf16, #tpu.memory_space<vmem>>, vector<1x16x128xbf16>
    %328 = vector.shape_cast %327 : vector<1x16x128xbf16> to vector<16x128xbf16>
    %cst_222 = arith.constant dense<0.000000e+00> : vector<16x35xf32>
    %329 = tpu.matmul %328, %0, %cst_222 {dimension_numbers = #tpu.dot_dimension_numbers<[1], [0], [0], [1], [0, 0, 1, 1], [], []>} : vector<16x128xbf16>, vector<128x35xbf16>, vector<16x35xf32> -> vector<16x35xf32>
    %330 = vector.broadcast %1 : vector<1x35xf32> to vector<16x35xf32>
    %331 = arith.addf %329, %330 : vector<16x35xf32>
    %cst_223 = arith.constant 0.000000e+00 : f32
    %332 = vector.broadcast %cst_223 : f32 to vector<16x35xf32>
    %333 = arith.maximumf %331, %332 : vector<16x35xf32>
    %334 = arith.truncf %333 : vector<16x35xf32> to vector<16x35xbf16>
    %c27_224 = arith.constant 27 : index
    %c0_225 = arith.constant 0 : index
    %c0_226 = arith.constant 0 : index
    %335 = vector.load %arg4[%c27_224, %c0_225, %c0_226] : memref<42x35x39xbf16, #tpu.memory_space<vmem>>, vector<1x35x39xbf16>
    %336 = vector.shape_cast %335 : vector<1x35x39xbf16> to vector<35x39xbf16>
    %cst_227 = arith.constant dense<0.000000e+00> : vector<16x39xf32>
    %337 = tpu.matmul %334, %336, %cst_227 {dimension_numbers = #tpu.dot_dimension_numbers<[1], [0], [0], [1], [0, 0, 1, 1], [], []>} : vector<16x35xbf16>, vector<35x39xbf16>, vector<16x39xf32> -> vector<16x39xf32>
    %338 = arith.addf %326, %337 : vector<16x39xf32>
    %c28 = arith.constant 28 : index
    %c0_228 = arith.constant 0 : index
    %c0_229 = arith.constant 0 : index
    %339 = vector.load %arg1[%c28, %c0_228, %c0_229] : memref<42x16x128xbf16, #tpu.memory_space<vmem>>, vector<1x16x128xbf16>
    %340 = vector.shape_cast %339 : vector<1x16x128xbf16> to vector<16x128xbf16>
    %cst_230 = arith.constant dense<0.000000e+00> : vector<16x35xf32>
    %341 = tpu.matmul %340, %0, %cst_230 {dimension_numbers = #tpu.dot_dimension_numbers<[1], [0], [0], [1], [0, 0, 1, 1], [], []>} : vector<16x128xbf16>, vector<128x35xbf16>, vector<16x35xf32> -> vector<16x35xf32>
    %342 = vector.broadcast %1 : vector<1x35xf32> to vector<16x35xf32>
    %343 = arith.addf %341, %342 : vector<16x35xf32>
    %cst_231 = arith.constant 0.000000e+00 : f32
    %344 = vector.broadcast %cst_231 : f32 to vector<16x35xf32>
    %345 = arith.maximumf %343, %344 : vector<16x35xf32>
    %346 = arith.truncf %345 : vector<16x35xf32> to vector<16x35xbf16>
    %c28_232 = arith.constant 28 : index
    %c0_233 = arith.constant 0 : index
    %c0_234 = arith.constant 0 : index
    %347 = vector.load %arg4[%c28_232, %c0_233, %c0_234] : memref<42x35x39xbf16, #tpu.memory_space<vmem>>, vector<1x35x39xbf16>
    %348 = vector.shape_cast %347 : vector<1x35x39xbf16> to vector<35x39xbf16>
    %cst_235 = arith.constant dense<0.000000e+00> : vector<16x39xf32>
    %349 = tpu.matmul %346, %348, %cst_235 {dimension_numbers = #tpu.dot_dimension_numbers<[1], [0], [0], [1], [0, 0, 1, 1], [], []>} : vector<16x35xbf16>, vector<35x39xbf16>, vector<16x39xf32> -> vector<16x39xf32>
    %350 = arith.addf %338, %349 : vector<16x39xf32>
    %c29 = arith.constant 29 : index
    %c0_236 = arith.constant 0 : index
    %c0_237 = arith.constant 0 : index
    %351 = vector.load %arg1[%c29, %c0_236, %c0_237] : memref<42x16x128xbf16, #tpu.memory_space<vmem>>, vector<1x16x128xbf16>
    %352 = vector.shape_cast %351 : vector<1x16x128xbf16> to vector<16x128xbf16>
    %cst_238 = arith.constant dense<0.000000e+00> : vector<16x35xf32>
    %353 = tpu.matmul %352, %0, %cst_238 {dimension_numbers = #tpu.dot_dimension_numbers<[1], [0], [0], [1], [0, 0, 1, 1], [], []>} : vector<16x128xbf16>, vector<128x35xbf16>, vector<16x35xf32> -> vector<16x35xf32>
    %354 = vector.broadcast %1 : vector<1x35xf32> to vector<16x35xf32>
    %355 = arith.addf %353, %354 : vector<16x35xf32>
    %cst_239 = arith.constant 0.000000e+00 : f32
    %356 = vector.broadcast %cst_239 : f32 to vector<16x35xf32>
    %357 = arith.maximumf %355, %356 : vector<16x35xf32>
    %358 = arith.truncf %357 : vector<16x35xf32> to vector<16x35xbf16>
    %c29_240 = arith.constant 29 : index
    %c0_241 = arith.constant 0 : index
    %c0_242 = arith.constant 0 : index
    %359 = vector.load %arg4[%c29_240, %c0_241, %c0_242] : memref<42x35x39xbf16, #tpu.memory_space<vmem>>, vector<1x35x39xbf16>
    %360 = vector.shape_cast %359 : vector<1x35x39xbf16> to vector<35x39xbf16>
    %cst_243 = arith.constant dense<0.000000e+00> : vector<16x39xf32>
    %361 = tpu.matmul %358, %360, %cst_243 {dimension_numbers = #tpu.dot_dimension_numbers<[1], [0], [0], [1], [0, 0, 1, 1], [], []>} : vector<16x35xbf16>, vector<35x39xbf16>, vector<16x39xf32> -> vector<16x39xf32>
    %362 = arith.addf %350, %361 : vector<16x39xf32>
    %c30 = arith.constant 30 : index
    %c0_244 = arith.constant 0 : index
    %c0_245 = arith.constant 0 : index
    %363 = vector.load %arg1[%c30, %c0_244, %c0_245] : memref<42x16x128xbf16, #tpu.memory_space<vmem>>, vector<1x16x128xbf16>
    %364 = vector.shape_cast %363 : vector<1x16x128xbf16> to vector<16x128xbf16>
    %cst_246 = arith.constant dense<0.000000e+00> : vector<16x35xf32>
    %365 = tpu.matmul %364, %0, %cst_246 {dimension_numbers = #tpu.dot_dimension_numbers<[1], [0], [0], [1], [0, 0, 1, 1], [], []>} : vector<16x128xbf16>, vector<128x35xbf16>, vector<16x35xf32> -> vector<16x35xf32>
    %366 = vector.broadcast %1 : vector<1x35xf32> to vector<16x35xf32>
    %367 = arith.addf %365, %366 : vector<16x35xf32>
    %cst_247 = arith.constant 0.000000e+00 : f32
    %368 = vector.broadcast %cst_247 : f32 to vector<16x35xf32>
    %369 = arith.maximumf %367, %368 : vector<16x35xf32>
    %370 = arith.truncf %369 : vector<16x35xf32> to vector<16x35xbf16>
    %c30_248 = arith.constant 30 : index
    %c0_249 = arith.constant 0 : index
    %c0_250 = arith.constant 0 : index
    %371 = vector.load %arg4[%c30_248, %c0_249, %c0_250] : memref<42x35x39xbf16, #tpu.memory_space<vmem>>, vector<1x35x39xbf16>
    %372 = vector.shape_cast %371 : vector<1x35x39xbf16> to vector<35x39xbf16>
    %cst_251 = arith.constant dense<0.000000e+00> : vector<16x39xf32>
    %373 = tpu.matmul %370, %372, %cst_251 {dimension_numbers = #tpu.dot_dimension_numbers<[1], [0], [0], [1], [0, 0, 1, 1], [], []>} : vector<16x35xbf16>, vector<35x39xbf16>, vector<16x39xf32> -> vector<16x39xf32>
    %374 = arith.addf %362, %373 : vector<16x39xf32>
    %c31 = arith.constant 31 : index
    %c0_252 = arith.constant 0 : index
    %c0_253 = arith.constant 0 : index
    %375 = vector.load %arg1[%c31, %c0_252, %c0_253] : memref<42x16x128xbf16, #tpu.memory_space<vmem>>, vector<1x16x128xbf16>
    %376 = vector.shape_cast %375 : vector<1x16x128xbf16> to vector<16x128xbf16>
    %cst_254 = arith.constant dense<0.000000e+00> : vector<16x35xf32>
    %377 = tpu.matmul %376, %0, %cst_254 {dimension_numbers = #tpu.dot_dimension_numbers<[1], [0], [0], [1], [0, 0, 1, 1], [], []>} : vector<16x128xbf16>, vector<128x35xbf16>, vector<16x35xf32> -> vector<16x35xf32>
    %378 = vector.broadcast %1 : vector<1x35xf32> to vector<16x35xf32>
    %379 = arith.addf %377, %378 : vector<16x35xf32>
    %cst_255 = arith.constant 0.000000e+00 : f32
    %380 = vector.broadcast %cst_255 : f32 to vector<16x35xf32>
    %381 = arith.maximumf %379, %380 : vector<16x35xf32>
    %382 = arith.truncf %381 : vector<16x35xf32> to vector<16x35xbf16>
    %c31_256 = arith.constant 31 : index
    %c0_257 = arith.constant 0 : index
    %c0_258 = arith.constant 0 : index
    %383 = vector.load %arg4[%c31_256, %c0_257, %c0_258] : memref<42x35x39xbf16, #tpu.memory_space<vmem>>, vector<1x35x39xbf16>
    %384 = vector.shape_cast %383 : vector<1x35x39xbf16> to vector<35x39xbf16>
    %cst_259 = arith.constant dense<0.000000e+00> : vector<16x39xf32>
    %385 = tpu.matmul %382, %384, %cst_259 {dimension_numbers = #tpu.dot_dimension_numbers<[1], [0], [0], [1], [0, 0, 1, 1], [], []>} : vector<16x35xbf16>, vector<35x39xbf16>, vector<16x39xf32> -> vector<16x39xf32>
    %386 = arith.addf %374, %385 : vector<16x39xf32>
    %c32 = arith.constant 32 : index
    %c0_260 = arith.constant 0 : index
    %c0_261 = arith.constant 0 : index
    %387 = vector.load %arg1[%c32, %c0_260, %c0_261] : memref<42x16x128xbf16, #tpu.memory_space<vmem>>, vector<1x16x128xbf16>
    %388 = vector.shape_cast %387 : vector<1x16x128xbf16> to vector<16x128xbf16>
    %cst_262 = arith.constant dense<0.000000e+00> : vector<16x35xf32>
    %389 = tpu.matmul %388, %0, %cst_262 {dimension_numbers = #tpu.dot_dimension_numbers<[1], [0], [0], [1], [0, 0, 1, 1], [], []>} : vector<16x128xbf16>, vector<128x35xbf16>, vector<16x35xf32> -> vector<16x35xf32>
    %390 = vector.broadcast %1 : vector<1x35xf32> to vector<16x35xf32>
    %391 = arith.addf %389, %390 : vector<16x35xf32>
    %cst_263 = arith.constant 0.000000e+00 : f32
    %392 = vector.broadcast %cst_263 : f32 to vector<16x35xf32>
    %393 = arith.maximumf %391, %392 : vector<16x35xf32>
    %394 = arith.truncf %393 : vector<16x35xf32> to vector<16x35xbf16>
    %c32_264 = arith.constant 32 : index
    %c0_265 = arith.constant 0 : index
    %c0_266 = arith.constant 0 : index
    %395 = vector.load %arg4[%c32_264, %c0_265, %c0_266] : memref<42x35x39xbf16, #tpu.memory_space<vmem>>, vector<1x35x39xbf16>
    %396 = vector.shape_cast %395 : vector<1x35x39xbf16> to vector<35x39xbf16>
    %cst_267 = arith.constant dense<0.000000e+00> : vector<16x39xf32>
    %397 = tpu.matmul %394, %396, %cst_267 {dimension_numbers = #tpu.dot_dimension_numbers<[1], [0], [0], [1], [0, 0, 1, 1], [], []>} : vector<16x35xbf16>, vector<35x39xbf16>, vector<16x39xf32> -> vector<16x39xf32>
    %398 = arith.addf %386, %397 : vector<16x39xf32>
    %c33 = arith.constant 33 : index
    %c0_268 = arith.constant 0 : index
    %c0_269 = arith.constant 0 : index
    %399 = vector.load %arg1[%c33, %c0_268, %c0_269] : memref<42x16x128xbf16, #tpu.memory_space<vmem>>, vector<1x16x128xbf16>
    %400 = vector.shape_cast %399 : vector<1x16x128xbf16> to vector<16x128xbf16>
    %cst_270 = arith.constant dense<0.000000e+00> : vector<16x35xf32>
    %401 = tpu.matmul %400, %0, %cst_270 {dimension_numbers = #tpu.dot_dimension_numbers<[1], [0], [0], [1], [0, 0, 1, 1], [], []>} : vector<16x128xbf16>, vector<128x35xbf16>, vector<16x35xf32> -> vector<16x35xf32>
    %402 = vector.broadcast %1 : vector<1x35xf32> to vector<16x35xf32>
    %403 = arith.addf %401, %402 : vector<16x35xf32>
    %cst_271 = arith.constant 0.000000e+00 : f32
    %404 = vector.broadcast %cst_271 : f32 to vector<16x35xf32>
    %405 = arith.maximumf %403, %404 : vector<16x35xf32>
    %406 = arith.truncf %405 : vector<16x35xf32> to vector<16x35xbf16>
    %c33_272 = arith.constant 33 : index
    %c0_273 = arith.constant 0 : index
    %c0_274 = arith.constant 0 : index
    %407 = vector.load %arg4[%c33_272, %c0_273, %c0_274] : memref<42x35x39xbf16, #tpu.memory_space<vmem>>, vector<1x35x39xbf16>
    %408 = vector.shape_cast %407 : vector<1x35x39xbf16> to vector<35x39xbf16>
    %cst_275 = arith.constant dense<0.000000e+00> : vector<16x39xf32>
    %409 = tpu.matmul %406, %408, %cst_275 {dimension_numbers = #tpu.dot_dimension_numbers<[1], [0], [0], [1], [0, 0, 1, 1], [], []>} : vector<16x35xbf16>, vector<35x39xbf16>, vector<16x39xf32> -> vector<16x39xf32>
    %410 = arith.addf %398, %409 : vector<16x39xf32>
    %c34 = arith.constant 34 : index
    %c0_276 = arith.constant 0 : index
    %c0_277 = arith.constant 0 : index
    %411 = vector.load %arg1[%c34, %c0_276, %c0_277] : memref<42x16x128xbf16, #tpu.memory_space<vmem>>, vector<1x16x128xbf16>
    %412 = vector.shape_cast %411 : vector<1x16x128xbf16> to vector<16x128xbf16>
    %cst_278 = arith.constant dense<0.000000e+00> : vector<16x35xf32>
    %413 = tpu.matmul %412, %0, %cst_278 {dimension_numbers = #tpu.dot_dimension_numbers<[1], [0], [0], [1], [0, 0, 1, 1], [], []>} : vector<16x128xbf16>, vector<128x35xbf16>, vector<16x35xf32> -> vector<16x35xf32>
    %414 = vector.broadcast %1 : vector<1x35xf32> to vector<16x35xf32>
    %415 = arith.addf %413, %414 : vector<16x35xf32>
    %cst_279 = arith.constant 0.000000e+00 : f32
    %416 = vector.broadcast %cst_279 : f32 to vector<16x35xf32>
    %417 = arith.maximumf %415, %416 : vector<16x35xf32>
    %418 = arith.truncf %417 : vector<16x35xf32> to vector<16x35xbf16>
    %c34_280 = arith.constant 34 : index
    %c0_281 = arith.constant 0 : index
    %c0_282 = arith.constant 0 : index
    %419 = vector.load %arg4[%c34_280, %c0_281, %c0_282] : memref<42x35x39xbf16, #tpu.memory_space<vmem>>, vector<1x35x39xbf16>
    %420 = vector.shape_cast %419 : vector<1x35x39xbf16> to vector<35x39xbf16>
    %cst_283 = arith.constant dense<0.000000e+00> : vector<16x39xf32>
    %421 = tpu.matmul %418, %420, %cst_283 {dimension_numbers = #tpu.dot_dimension_numbers<[1], [0], [0], [1], [0, 0, 1, 1], [], []>} : vector<16x35xbf16>, vector<35x39xbf16>, vector<16x39xf32> -> vector<16x39xf32>
    %422 = arith.addf %410, %421 : vector<16x39xf32>
    %c35 = arith.constant 35 : index
    %c0_284 = arith.constant 0 : index
    %c0_285 = arith.constant 0 : index
    %423 = vector.load %arg1[%c35, %c0_284, %c0_285] : memref<42x16x128xbf16, #tpu.memory_space<vmem>>, vector<1x16x128xbf16>
    %424 = vector.shape_cast %423 : vector<1x16x128xbf16> to vector<16x128xbf16>
    %cst_286 = arith.constant dense<0.000000e+00> : vector<16x35xf32>
    %425 = tpu.matmul %424, %0, %cst_286 {dimension_numbers = #tpu.dot_dimension_numbers<[1], [0], [0], [1], [0, 0, 1, 1], [], []>} : vector<16x128xbf16>, vector<128x35xbf16>, vector<16x35xf32> -> vector<16x35xf32>
    %426 = vector.broadcast %1 : vector<1x35xf32> to vector<16x35xf32>
    %427 = arith.addf %425, %426 : vector<16x35xf32>
    %cst_287 = arith.constant 0.000000e+00 : f32
    %428 = vector.broadcast %cst_287 : f32 to vector<16x35xf32>
    %429 = arith.maximumf %427, %428 : vector<16x35xf32>
    %430 = arith.truncf %429 : vector<16x35xf32> to vector<16x35xbf16>
    %c35_288 = arith.constant 35 : index
    %c0_289 = arith.constant 0 : index
    %c0_290 = arith.constant 0 : index
    %431 = vector.load %arg4[%c35_288, %c0_289, %c0_290] : memref<42x35x39xbf16, #tpu.memory_space<vmem>>, vector<1x35x39xbf16>
    %432 = vector.shape_cast %431 : vector<1x35x39xbf16> to vector<35x39xbf16>
    %cst_291 = arith.constant dense<0.000000e+00> : vector<16x39xf32>
    %433 = tpu.matmul %430, %432, %cst_291 {dimension_numbers = #tpu.dot_dimension_numbers<[1], [0], [0], [1], [0, 0, 1, 1], [], []>} : vector<16x35xbf16>, vector<35x39xbf16>, vector<16x39xf32> -> vector<16x39xf32>
    %434 = arith.addf %422, %433 : vector<16x39xf32>
    %c36 = arith.constant 36 : index
    %c0_292 = arith.constant 0 : index
    %c0_293 = arith.constant 0 : index
    %435 = vector.load %arg1[%c36, %c0_292, %c0_293] : memref<42x16x128xbf16, #tpu.memory_space<vmem>>, vector<1x16x128xbf16>
    %436 = vector.shape_cast %435 : vector<1x16x128xbf16> to vector<16x128xbf16>
    %cst_294 = arith.constant dense<0.000000e+00> : vector<16x35xf32>
    %437 = tpu.matmul %436, %0, %cst_294 {dimension_numbers = #tpu.dot_dimension_numbers<[1], [0], [0], [1], [0, 0, 1, 1], [], []>} : vector<16x128xbf16>, vector<128x35xbf16>, vector<16x35xf32> -> vector<16x35xf32>
    %438 = vector.broadcast %1 : vector<1x35xf32> to vector<16x35xf32>
    %439 = arith.addf %437, %438 : vector<16x35xf32>
    %cst_295 = arith.constant 0.000000e+00 : f32
    %440 = vector.broadcast %cst_295 : f32 to vector<16x35xf32>
    %441 = arith.maximumf %439, %440 : vector<16x35xf32>
    %442 = arith.truncf %441 : vector<16x35xf32> to vector<16x35xbf16>
    %c36_296 = arith.constant 36 : index
    %c0_297 = arith.constant 0 : index
    %c0_298 = arith.constant 0 : index
    %443 = vector.load %arg4[%c36_296, %c0_297, %c0_298] : memref<42x35x39xbf16, #tpu.memory_space<vmem>>, vector<1x35x39xbf16>
    %444 = vector.shape_cast %443 : vector<1x35x39xbf16> to vector<35x39xbf16>
    %cst_299 = arith.constant dense<0.000000e+00> : vector<16x39xf32>
    %445 = tpu.matmul %442, %444, %cst_299 {dimension_numbers = #tpu.dot_dimension_numbers<[1], [0], [0], [1], [0, 0, 1, 1], [], []>} : vector<16x35xbf16>, vector<35x39xbf16>, vector<16x39xf32> -> vector<16x39xf32>
    %446 = arith.addf %434, %445 : vector<16x39xf32>
    %c37 = arith.constant 37 : index
    %c0_300 = arith.constant 0 : index
    %c0_301 = arith.constant 0 : index
    %447 = vector.load %arg1[%c37, %c0_300, %c0_301] : memref<42x16x128xbf16, #tpu.memory_space<vmem>>, vector<1x16x128xbf16>
    %448 = vector.shape_cast %447 : vector<1x16x128xbf16> to vector<16x128xbf16>
    %cst_302 = arith.constant dense<0.000000e+00> : vector<16x35xf32>
    %449 = tpu.matmul %448, %0, %cst_302 {dimension_numbers = #tpu.dot_dimension_numbers<[1], [0], [0], [1], [0, 0, 1, 1], [], []>} : vector<16x128xbf16>, vector<128x35xbf16>, vector<16x35xf32> -> vector<16x35xf32>
    %450 = vector.broadcast %1 : vector<1x35xf32> to vector<16x35xf32>
    %451 = arith.addf %449, %450 : vector<16x35xf32>
    %cst_303 = arith.constant 0.000000e+00 : f32
    %452 = vector.broadcast %cst_303 : f32 to vector<16x35xf32>
    %453 = arith.maximumf %451, %452 : vector<16x35xf32>
    %454 = arith.truncf %453 : vector<16x35xf32> to vector<16x35xbf16>
    %c37_304 = arith.constant 37 : index
    %c0_305 = arith.constant 0 : index
    %c0_306 = arith.constant 0 : index
    %455 = vector.load %arg4[%c37_304, %c0_305, %c0_306] : memref<42x35x39xbf16, #tpu.memory_space<vmem>>, vector<1x35x39xbf16>
    %456 = vector.shape_cast %455 : vector<1x35x39xbf16> to vector<35x39xbf16>
    %cst_307 = arith.constant dense<0.000000e+00> : vector<16x39xf32>
    %457 = tpu.matmul %454, %456, %cst_307 {dimension_numbers = #tpu.dot_dimension_numbers<[1], [0], [0], [1], [0, 0, 1, 1], [], []>} : vector<16x35xbf16>, vector<35x39xbf16>, vector<16x39xf32> -> vector<16x39xf32>
    %458 = arith.addf %446, %457 : vector<16x39xf32>
    %c38 = arith.constant 38 : index
    %c0_308 = arith.constant 0 : index
    %c0_309 = arith.constant 0 : index
    %459 = vector.load %arg1[%c38, %c0_308, %c0_309] : memref<42x16x128xbf16, #tpu.memory_space<vmem>>, vector<1x16x128xbf16>
    %460 = vector.shape_cast %459 : vector<1x16x128xbf16> to vector<16x128xbf16>
    %cst_310 = arith.constant dense<0.000000e+00> : vector<16x35xf32>
    %461 = tpu.matmul %460, %0, %cst_310 {dimension_numbers = #tpu.dot_dimension_numbers<[1], [0], [0], [1], [0, 0, 1, 1], [], []>} : vector<16x128xbf16>, vector<128x35xbf16>, vector<16x35xf32> -> vector<16x35xf32>
    %462 = vector.broadcast %1 : vector<1x35xf32> to vector<16x35xf32>
    %463 = arith.addf %461, %462 : vector<16x35xf32>
    %cst_311 = arith.constant 0.000000e+00 : f32
    %464 = vector.broadcast %cst_311 : f32 to vector<16x35xf32>
    %465 = arith.maximumf %463, %464 : vector<16x35xf32>
    %466 = arith.truncf %465 : vector<16x35xf32> to vector<16x35xbf16>
    %c38_312 = arith.constant 38 : index
    %c0_313 = arith.constant 0 : index
    %c0_314 = arith.constant 0 : index
    %467 = vector.load %arg4[%c38_312, %c0_313, %c0_314] : memref<42x35x39xbf16, #tpu.memory_space<vmem>>, vector<1x35x39xbf16>
    %468 = vector.shape_cast %467 : vector<1x35x39xbf16> to vector<35x39xbf16>
    %cst_315 = arith.constant dense<0.000000e+00> : vector<16x39xf32>
    %469 = tpu.matmul %466, %468, %cst_315 {dimension_numbers = #tpu.dot_dimension_numbers<[1], [0], [0], [1], [0, 0, 1, 1], [], []>} : vector<16x35xbf16>, vector<35x39xbf16>, vector<16x39xf32> -> vector<16x39xf32>
    %470 = arith.addf %458, %469 : vector<16x39xf32>
    %c39 = arith.constant 39 : index
    %c0_316 = arith.constant 0 : index
    %c0_317 = arith.constant 0 : index
    %471 = vector.load %arg1[%c39, %c0_316, %c0_317] : memref<42x16x128xbf16, #tpu.memory_space<vmem>>, vector<1x16x128xbf16>
    %472 = vector.shape_cast %471 : vector<1x16x128xbf16> to vector<16x128xbf16>
    %cst_318 = arith.constant dense<0.000000e+00> : vector<16x35xf32>
    %473 = tpu.matmul %472, %0, %cst_318 {dimension_numbers = #tpu.dot_dimension_numbers<[1], [0], [0], [1], [0, 0, 1, 1], [], []>} : vector<16x128xbf16>, vector<128x35xbf16>, vector<16x35xf32> -> vector<16x35xf32>
    %474 = vector.broadcast %1 : vector<1x35xf32> to vector<16x35xf32>
    %475 = arith.addf %473, %474 : vector<16x35xf32>
    %cst_319 = arith.constant 0.000000e+00 : f32
    %476 = vector.broadcast %cst_319 : f32 to vector<16x35xf32>
    %477 = arith.maximumf %475, %476 : vector<16x35xf32>
    %478 = arith.truncf %477 : vector<16x35xf32> to vector<16x35xbf16>
    %c39_320 = arith.constant 39 : index
    %c0_321 = arith.constant 0 : index
    %c0_322 = arith.constant 0 : index
    %479 = vector.load %arg4[%c39_320, %c0_321, %c0_322] : memref<42x35x39xbf16, #tpu.memory_space<vmem>>, vector<1x35x39xbf16>
    %480 = vector.shape_cast %479 : vector<1x35x39xbf16> to vector<35x39xbf16>
    %cst_323 = arith.constant dense<0.000000e+00> : vector<16x39xf32>
    %481 = tpu.matmul %478, %480, %cst_323 {dimension_numbers = #tpu.dot_dimension_numbers<[1], [0], [0], [1], [0, 0, 1, 1], [], []>} : vector<16x35xbf16>, vector<35x39xbf16>, vector<16x39xf32> -> vector<16x39xf32>
    %482 = arith.addf %470, %481 : vector<16x39xf32>
    %c40 = arith.constant 40 : index
    %c0_324 = arith.constant 0 : index
    %c0_325 = arith.constant 0 : index
    %483 = vector.load %arg1[%c40, %c0_324, %c0_325] : memref<42x16x128xbf16, #tpu.memory_space<vmem>>, vector<1x16x128xbf16>
    %484 = vector.shape_cast %483 : vector<1x16x128xbf16> to vector<16x128xbf16>
    %cst_326 = arith.constant dense<0.000000e+00> : vector<16x35xf32>
    %485 = tpu.matmul %484, %0, %cst_326 {dimension_numbers = #tpu.dot_dimension_numbers<[1], [0], [0], [1], [0, 0, 1, 1], [], []>} : vector<16x128xbf16>, vector<128x35xbf16>, vector<16x35xf32> -> vector<16x35xf32>
    %486 = vector.broadcast %1 : vector<1x35xf32> to vector<16x35xf32>
    %487 = arith.addf %485, %486 : vector<16x35xf32>
    %cst_327 = arith.constant 0.000000e+00 : f32
    %488 = vector.broadcast %cst_327 : f32 to vector<16x35xf32>
    %489 = arith.maximumf %487, %488 : vector<16x35xf32>
    %490 = arith.truncf %489 : vector<16x35xf32> to vector<16x35xbf16>
    %c40_328 = arith.constant 40 : index
    %c0_329 = arith.constant 0 : index
    %c0_330 = arith.constant 0 : index
    %491 = vector.load %arg4[%c40_328, %c0_329, %c0_330] : memref<42x35x39xbf16, #tpu.memory_space<vmem>>, vector<1x35x39xbf16>
    %492 = vector.shape_cast %491 : vector<1x35x39xbf16> to vector<35x39xbf16>
    %cst_331 = arith.constant dense<0.000000e+00> : vector<16x39xf32>
    %493 = tpu.matmul %490, %492, %cst_331 {dimension_numbers = #tpu.dot_dimension_numbers<[1], [0], [0], [1], [0, 0, 1, 1], [], []>} : vector<16x35xbf16>, vector<35x39xbf16>, vector<16x39xf32> -> vector<16x39xf32>
    %494 = arith.addf %482, %493 : vector<16x39xf32>
    %c41 = arith.constant 41 : index
    %c0_332 = arith.constant 0 : index
    %c0_333 = arith.constant 0 : index
    %495 = vector.load %arg1[%c41, %c0_332, %c0_333] : memref<42x16x128xbf16, #tpu.memory_space<vmem>>, vector<1x16x128xbf16>
    %496 = vector.shape_cast %495 : vector<1x16x128xbf16> to vector<16x128xbf16>
    %cst_334 = arith.constant dense<0.000000e+00> : vector<16x35xf32>
    %497 = tpu.matmul %496, %0, %cst_334 {dimension_numbers = #tpu.dot_dimension_numbers<[1], [0], [0], [1], [0, 0, 1, 1], [], []>} : vector<16x128xbf16>, vector<128x35xbf16>, vector<16x35xf32> -> vector<16x35xf32>
    %498 = vector.broadcast %1 : vector<1x35xf32> to vector<16x35xf32>
    %499 = arith.addf %497, %498 : vector<16x35xf32>
    %cst_335 = arith.constant 0.000000e+00 : f32
    %500 = vector.broadcast %cst_335 : f32 to vector<16x35xf32>
    %501 = arith.maximumf %499, %500 : vector<16x35xf32>
    %502 = arith.truncf %501 : vector<16x35xf32> to vector<16x35xbf16>
    %c41_336 = arith.constant 41 : index
    %c0_337 = arith.constant 0 : index
    %c0_338 = arith.constant 0 : index
    %503 = vector.load %arg4[%c41_336, %c0_337, %c0_338] : memref<42x35x39xbf16, #tpu.memory_space<vmem>>, vector<1x35x39xbf16>
    %504 = vector.shape_cast %503 : vector<1x35x39xbf16> to vector<35x39xbf16>
    %cst_339 = arith.constant dense<0.000000e+00> : vector<16x39xf32>
    %505 = tpu.matmul %502, %504, %cst_339 {dimension_numbers = #tpu.dot_dimension_numbers<[1], [0], [0], [1], [0, 0, 1, 1], [], []>} : vector<16x35xbf16>, vector<35x39xbf16>, vector<16x39xf32> -> vector<16x39xf32>
    %506 = arith.addf %494, %505 : vector<16x39xf32>
    %c0_340 = arith.constant 0 : index
    %c0_341 = arith.constant 0 : index
    %507 = vector.load %arg5[%c0_340, %c0_341] : memref<1x39xf32, #tpu.memory_space<vmem>>, vector<1x39xf32>
    %508 = vector.broadcast %507 : vector<1x39xf32> to vector<16x39xf32>
    %509 = arith.addf %506, %508 : vector<16x39xf32>
    %510 = vector.extract_strided_slice %509 {offsets = [0, 0], sizes = [16, 32], strides = [1, 1]} : vector<16x39xf32> to vector<16x32xf32>
    %cst_342 = arith.constant 0.000000e+00 : f32
    %511 = vector.broadcast %cst_342 : f32 to vector<16x32xf32>
    %512 = arith.maximumf %510, %511 : vector<16x32xf32>
    %c0_343 = arith.constant 0 : index
    %c0_344 = arith.constant 0 : index
    %513 = vector.load %arg6[%c0_343, %c0_344] : memref<32x1xf32, #tpu.memory_space<vmem>>, vector<32x1xf32>
    %cst_345 = arith.constant dense<0.000000e+00> : vector<16x1xf32>
    %514 = tpu.matmul %512, %513, %cst_345 {dimension_numbers = #tpu.dot_dimension_numbers<[1], [0], [0], [1], [0, 0, 1, 1], [], []>} : vector<16x32xf32>, vector<32x1xf32>, vector<16x1xf32> -> vector<16x1xf32>
    %c0_346 = arith.constant 0 : index
    %c0_347 = arith.constant 0 : index
    %515 = vector.load %arg7[%c0_346, %c0_347] : memref<1x1xf32, #tpu.memory_space<vmem>>, vector<1x1xf32>
    %516 = vector.broadcast %515 : vector<1x1xf32> to vector<16x1xf32>
    %517 = arith.addf %514, %516 : vector<16x1xf32>
    %518 = math.tanh %517 : vector<16x1xf32>
    %519 = vector.extract_strided_slice %509 {offsets = [0, 32], sizes = [16, 7], strides = [1, 1]} : vector<16x39xf32> to vector<16x7xf32>
    %cst_348 = arith.constant dense<0xFF800000> : vector<16xf32>
    %520 = vector.multi_reduction <maximumf>, %519, %cst_348 [1] : vector<16x7xf32> to vector<16xf32>
    %521 = vector.shape_cast %520 : vector<16xf32> to vector<16x1xf32>
    %522 = vector.broadcast %521 : vector<16x1xf32> to vector<16x7xf32>
    %523 = arith.subf %519, %522 : vector<16x7xf32>
    %524 = math.exp %523 : vector<16x7xf32>
    %cst_349 = arith.constant dense<0.000000e+00> : vector<16xf32>
    %525 = vector.multi_reduction <add>, %524, %cst_349 [1] : vector<16x7xf32> to vector<16xf32>
    %526 = vector.shape_cast %525 : vector<16xf32> to vector<16x1xf32>
    %527 = tpu.reciprocal %526 {approx = true} : vector<16x1xf32> -> vector<16x1xf32>
    %528 = vector.broadcast %527 : vector<16x1xf32> to vector<16x7xf32>
    %529 = arith.mulf %524, %528 : vector<16x7xf32>
    %530 = tpu.concatenate %529, %518 in 1 : vector<16x7xf32>, vector<16x1xf32> -> vector<16x8xf32>
    %c0_350 = arith.constant 0 : index
    %c0_351 = arith.constant 0 : index
    %531 = vector.load %arg8[%c0_350, %c0_351] : memref<16x8xf32, #tpu.memory_space<vmem>>, vector<16x8xf32>
    tpu.vector_store %arg8[%c0_350, %c0_351], %530 {strides = array<i32>} : memref<16x8xf32, #tpu.memory_space<vmem>>, vector<16x8xf32>,
    return
  }
  func.func @transform_0(%arg0: i32) -> (i32, i32, i32) {
    %c0_i32 = arith.constant 0 : i32
    %c0_i32_0 = arith.constant 0 : i32
    %c0_i32_1 = arith.constant 0 : i32
    return %c0_i32, %arg0, %c0_i32_0 : i32, i32, i32
  }
  func.func @transform_1(%arg0: i32) -> (i32, i32) {
    %c0_i32 = arith.constant 0 : i32
    %c0_i32_0 = arith.constant 0 : i32
    %c0_i32_1 = arith.constant 0 : i32
    return %c0_i32, %c0_i32_0 : i32, i32
  }
  func.func @transform_2(%arg0: i32) -> (i32, i32) {
    %c0_i32 = arith.constant 0 : i32
    %c0_i32_0 = arith.constant 0 : i32
    %c0_i32_1 = arith.constant 0 : i32
    return %c0_i32, %c0_i32_0 : i32, i32
  }
  func.func @transform_3(%arg0: i32) -> (i32, i32, i32) {
    %c0_i32 = arith.constant 0 : i32
    %c0_i32_0 = arith.constant 0 : i32
    %c0_i32_1 = arith.constant 0 : i32
    %c0_i32_2 = arith.constant 0 : i32
    return %c0_i32, %c0_i32_0, %c0_i32_1 : i32, i32, i32
  }
  func.func @transform_4(%arg0: i32) -> (i32, i32) {
    %c0_i32 = arith.constant 0 : i32
    %c0_i32_0 = arith.constant 0 : i32
    %c0_i32_1 = arith.constant 0 : i32
    return %c0_i32, %c0_i32_0 : i32, i32
  }
  func.func @transform_5(%arg0: i32) -> (i32, i32) {
    %c0_i32 = arith.constant 0 : i32
    %c0_i32_0 = arith.constant 0 : i32
    %c0_i32_1 = arith.constant 0 : i32
    return %c0_i32, %c0_i32_0 : i32, i32
  }
  func.func @transform_6(%arg0: i32) -> (i32, i32) {
    %c0_i32 = arith.constant 0 : i32
    %c0_i32_0 = arith.constant 0 : i32
    %c0_i32_1 = arith.constant 0 : i32
    return %c0_i32, %c0_i32_0 : i32, i32
  }
  func.func @transform_7(%arg0: i32) -> (i32, i32) {
    %c0_i32 = arith.constant 0 : i32
    %c0_i32_0 = arith.constant 0 : i32
    return %arg0, %c0_i32 : i32, i32
  }
}

</mosaic_0001>

<bundles_post_ra>
// kernel: tpu_custom_call.1
= control target key start
LH: loop header
LB: loop body
LE: loop exit
PB: predicated region body
PF: predicated region fallthrough
CT: control target
= control target key end

     0   :  { %vm178_vm0 = vcmask 1040384   ;;  %vm179_vm1 = vcmask 1041408   ;;  %v4136_v2 = vmov 65535   ;;  %vm174_vm2 = vcmask 285696   ;;  %s4137_s26 = smov 96   ;;  %s5433_s1 = inlined_call_operand.vmem [shape: bf16[128,35], index: 1, kind: input, shape index: {}]   ;;  %s5434_s3 = inlined_call_operand.vmem [shape: bf16[42,35,39], index: 3, kind: input, shape index: {}]   ;;  %s5435_s2 = inlined_call_operand.vmem [shape: f32[1,35], index: 2, kind: input, shape index: {}]   ;;  %s5436_s0 = inlined_call_operand.vmem [shape: bf16[42,12,128], index: 0, kind: input, shape index: {}]   ;;  %s5437_s4 = inlined_call_operand.vmem [shape: f32[1,39], index: 4, kind: input, shape index: {}]   ;;  %s5438_s5 = inlined_call_operand.vmem [shape: f32[32,1], index: 5, kind: input, shape index: {}]   ;;  %s5439_s6 = inlined_call_operand.<no memory space> [shape: f32[1,1], index: 6, kind: input, shape index: {}]   ;;  %s5440_s7 = inlined_call_operand.vmem [shape: f32[12,8], index: 7, kind: output, shape index: {}]  }
   0x1   :  { %v4182_v0 = vld [vmem:[%s5433_s1 + $0x38] sm:$0xff]  ;;  %v4189_v1 = vld [vmem:[%s5433_s1 + $0x30] sm:$0xff]  ;;  %v180_v3 = vsel %vm178_vm0, 4294967295, %v4136_v2  ;;  %v3145_v4 = vld [vmem:[%s5434_s3 + $0x24] sm:$0x3]  ;;  %vm3042_vm3 = vcmask 318720  }
   0x2   :  { %105 = vmatpush.bf16.msra.mxu0 %v4182_v0  ;;  %136 = vmatpush.bf16.msra.mxu1 %v4182_v0  ;;  %v168_v5 = vunpack.c.l.b16 %v3145_v4  ;;  %v4194_v6 = vsel %vm179_vm1, %v180_v3, 0  ;;  %v4201_v7 = vld [vmem:[%s5433_s1 + $0x28] sm:$0xff]  ;;  %v4209_v10 = vld [vmem:[%s5433_s1 + $0x20] sm:$0xff]  ;;  %v4219_v12 = vld [vmem:[%s5433_s1 + $0x18] sm:$0xff]  ;;  %vm3010_vm4 = vcmask 261120   ;;  %vm3063_vm5 = vcmask 56320  }
   0x3   :  { %v3979_v11 = vld [vmem:[%s5434_s3 + $0x1c] sm:$0xff]  ;;  %v3978_v13 = vld [vmem:[%s5434_s3 + $0x14] sm:$0xff]  ;;  %v4237_v15 = vld [vmem:[%s5433_s1 + $0x8] sm:$0xff]  ;;  %vm3092_vm6 = vcmask 64512  }
   0x4   :  { %v171_v8 = vpack.c.b16 %v168_v5, %v168_v5  ;;  %v4229_v14 = vld [vmem:[%s5433_s1 + $0x10] sm:$0xff]  ;;  %v4245_v16 = vld [vmem:[%s5433_s1] sm:$0xff]  ;;  %v3977_v18 = vld [vmem:[%s5436_s0 + $0x8] sm:$0xff] }
   0x5   :  { %v3974_v17 = vld [vmem:[%s5436_s0] sm:$0xff]  ;;  %v126_v19 = vld [vmem:[%s5434_s3 + $0x10] sm:$0x3]  ;;  %v3976_v23 = vld [vmem:[%s5434_s3 + $0x8] sm:$0xff] }
   0x6   :  { %106 = vmatpush.bf16.msra.mxu0 %v4189_v1  ;;  %137 = vmatpush.bf16.msra.mxu1 %v4189_v1  ;;  %v183_v9 = vand.u32 %v4194_v6, %v171_v8  ;;  %v208_v20 = vunpack.c.l.b16 %v126_v19  ;;  %v3975_v24 = vld [vmem:[%s5434_s3] sm:$0xff]  ;;  %v3980_v40 = vld [vmem:[%s5436_s0 + $0x10] sm:$0xff]  ;;  %v3174_v41 = vld [vmem:[%s5434_s3 + $0x38] sm:$0x3] }
   0x7   :  { %v4282_v27 = vld [vmem:[%s5435_s2] ss:$0 sm:$0xff]  ;;  %v275_v42 = vunpack.c.l.b16 %v3174_v41  ;;  %v3982_v45 = vld [vmem:[%s5434_s3 + $0x30] sm:$0xff]  ;;  %v3981_v46 = vld [vmem:[%s5434_s3 + $0x28] sm:$0xff] }
   0x8   :  { %190 = vmatpush.bf16.msra.mxu2 %v183_v9  ;;  %v211_v21 = vpack.c.b16 %v208_v20, %v208_v20  ;;  %v3986_v51 = vld [vmem:[%s5436_s0 + $0x20] sm:$0xff]  ;;  %v3983_v59 = vld [vmem:[%s5436_s0 + $0x18] sm:$0xff]  ;;  %v3194_v60 = vld [vmem:[%s5434_s3 + $0x4c] sm:$0x3] }
   0x9   :  { %v278_v43 = vpack.c.b16 %v275_v42, %v275_v42  ;;  %v344_v61 = vunpack.c.l.b16 %v3194_v60  ;;  %v3985_v2 = vld [vmem:[%s5434_s3 + $0x44] sm:$0xff]  ;;  %v3214_v3 = vld [vmem:[%s5434_s3 + $0x60] sm:$0x3] }
   0xa   :  { %107 = vmatpush.bf16.msra.mxu0 %v4201_v7  ;;  %138 = vmatpush.bf16.msra.mxu1 %v4201_v7  ;;  %v218_v22 = vand.u32 %v211_v21, %v4194_v6  ;;  %v413_v4 = vunpack.c.l.b16 %v3214_v3  ;;  %v3984_v5 = vld [vmem:[%s5434_s3 + $0x3c] sm:$0xff]  ;;  %v3987_v21 = vld [vmem:[%s5434_s3 + $0x50] sm:$0xff] }
   0xb   :  { %v285_v44 = vand.u32 %v278_v43, %v4194_v6  ;;  %v347_v62 = vpack.c.b16 %v344_v61, %v344_v61 }
   0xc   :  { %191 = vmatpush.bf16.msra.mxu2 %v3979_v11  ;;  %225 = vmatpush.bf16.msra.mxu3 %v218_v22  ;;  %v416_v9 = vpack.c.b16 %v413_v4, %v413_v4 }
   0xd   :  { %v354_v63 = vand.u32 %v347_v62, %v4194_v6 }
   0xe   :  { %108 = vmatpush.bf16.msra.mxu0 %v4209_v10  ;;  %139 = vmatpush.bf16.msra.mxu1 %v4209_v10  ;;  %v423_v11 = vand.u32 %v416_v9, %v4194_v6 }
  0x10   :  { %192 = vmatpush.bf16.msra.mxu2 %v3978_v13  ;;  %226 = vmatpush.bf16.msra.mxu3 %v3976_v23 }
  0x12   :  { %109 = vmatpush.bf16.msra.mxu0 %v4219_v12  ;;  %140 = vmatpush.bf16.msra.mxu1 %v4219_v12 }
  0x14   :  { %243 = vmatpush.bf16.msrb.mxu2 %v4182_v0  ;;  %227 = vmatpush.bf16.msra.mxu3 %v3975_v24 }
  0x16   :  { %110 = vmatpush.bf16.msra.mxu0 %v4229_v14  ;;  %141 = vmatpush.bf16.msra.mxu1 %v4229_v14 }
  0x18   :  { %244 = vmatpush.bf16.msrb.mxu2 %v4189_v1  ;;  %292 = vmatpush.bf16.msrb.mxu3 %v285_v44 }
  0x1a   :  { %111 = vmatpush.bf16.msra.mxu0 %v4237_v15  ;;  %142 = vmatpush.bf16.msra.mxu1 %v4237_v15 }
  0x1c   :  { %245 = vmatpush.bf16.msrb.mxu2 %v4201_v7  ;;  %293 = vmatpush.bf16.msrb.mxu3 %v3982_v45 }
  0x1e   :  { %112 = vmatpush.bf16.msra.mxu0 %v4245_v16  ;;  %143 = vmatpush.bf16.msra.mxu1 %v4245_v16 }
  0x20   :  { %246 = vmatpush.bf16.msrb.mxu2 %v4209_v10  ;;  %294 = vmatpush.bf16.msrb.mxu3 %v3981_v46  ;;  %v3991_v46 = vld [vmem:[%s5434_s3 + $0x6c] sm:$0xff] }
  0x21   :  { %113 = vmatmul.bf16.vlgmr.msra.gmra.mxu0 %v3974_v17  ;;  %144 = vmatmul.bf16.vlgmr.msra.gmra.mxu1 %v3977_v18  ;;  %v3988_v17 = vld [vmem:[%s5434_s3 + $0x58] sm:$0xff] }
  0x22   :  { %381 = vmatpush.bf16.msrb.mxu1 %v4182_v0  ;;  %361 = vmatpush.bf16.msrb.mxu0 %v354_v63  ;;  %v3998_v63 = vld [vmem:[%s5436_s0 + $0x40] sm:$0xff] }
  0x24   :  { %247 = vmatpush.bf16.msrb.mxu2 %v4219_v12 }
  0x26   :  { %382 = vmatpush.bf16.msrb.mxu1 %v4189_v1  ;;  %362 = vmatpush.bf16.msrb.mxu0 %v3985_v2 }
  0x28   :  { %248 = vmatpush.bf16.msrb.mxu2 %v4229_v14 }
  0x2a   :  { %383 = vmatpush.bf16.msrb.mxu1 %v4201_v7  ;;  %363 = vmatpush.bf16.msrb.mxu0 %v3984_v5 }
  0x2c   :  { %249 = vmatpush.bf16.msrb.mxu2 %v4237_v15 }
  0x2e   :  { %384 = vmatpush.bf16.msrb.mxu1 %v4209_v10  ;;  %450 = vmatpush.bf16.msra.mxu0 %v4182_v0 }
  0x30   :  { %250 = vmatpush.bf16.msrb.mxu2 %v4245_v16 }
  0x32   :  { %385 = vmatpush.bf16.msrb.mxu1 %v4219_v12  ;;  %451 = vmatpush.bf16.msra.mxu0 %v4189_v1 }
  0x36   :  { %386 = vmatpush.bf16.msrb.mxu1 %v4229_v14  ;;  %452 = vmatpush.bf16.msra.mxu0 %v4201_v7 }
  0x3a   :  { %387 = vmatpush.bf16.msrb.mxu1 %v4237_v15  ;;  %453 = vmatpush.bf16.msra.mxu0 %v4209_v10 }
  0x3e   :  { %388 = vmatpush.bf16.msrb.mxu1 %v4245_v16  ;;  %454 = vmatpush.bf16.msra.mxu0 %v4219_v12 }
  0x41   :  { %389 = vmatmul.bf16.vlgmr.msrb.gmra.mxu1 %v3986_v51 }
  0x42   :  { %455 = vmatpush.bf16.msra.mxu0 %v4229_v14 }
  0x46   :  { %456 = vmatpush.bf16.msra.mxu0 %v4237_v15 }
  0x4a   :  { %457 = vmatpush.bf16.msra.mxu0 %v4245_v16 }
  0x9e   :  { %v114_v25 = vpop.f32.mrf.mxu0  ;;  %v145_v26 = vpop.f32.mrf.mxu1 }
  0x9f   :  { %v115_v28 = vadd.f32 %v4282_v27, %v114_v25  ;;  %v146_v29 = vadd.f32 %v4282_v27, %v145_v26  ;;  %v3992_v25 = vld [vmem:[%s5436_s0 + $0x30] sm:$0xff] }
  0xa1   :  { %v119_v32 = vmax.f32 %v115_v28, 0.0  ;;  %v150_v35 = vmax.f32 %v146_v29, 0.0 }
  0xa6   :  { %v116_v30 = vpop.f32.mrf.mxu0  ;;  %v147_v31 = vpop.f32.mrf.mxu1 }
  0xa7   :  { %v117_v33 = vadd.f32 %v4282_v27, %v116_v30  ;;  %v148_v34 = vadd.f32 %v4282_v27, %v147_v31 }
  0xa9   :  { %v120_v36 = vmax.f32 %v117_v33, 0.0  ;;  %v151_v37 = vmax.f32 %v148_v34, 0.0 }
  0xab   :  { %v152_v38 = vpack.c.bf16 %v151_v37, %v150_v35  ;;  %v121_v39 = vpack.c.bf16 %v120_v36, %v119_v32  ;;  %v3989_v37 = vld [vmem:[%s5436_s0 + $0x28] sm:$0xff] }
  0xad   :  { %3154 = vmatmul.msk.bf16.vlgmr.msra.gmra.mxu2 %vm174_vm2, %v152_v38  ;;  %3163 = vmatmul.msk.bf16.vlgmr.msra.gmra.mxu3 %vm174_vm2, %v121_v39  ;;  %v3234_v38 = vld [vmem:[%s5434_s3 + $0x74] sm:$0x3] }
  0xae   :  { %312 = vmatpush.bf16.msra.mxu3 %v4182_v0  ;;  %430 = vmatpush.bf16.msra.mxu2 %v423_v11  ;;  %v482_v39 = vunpack.c.l.b16 %v3234_v38 }
  0xb0   :  { %v485_v41 = vpack.c.b16 %v482_v39, %v482_v39 }
  0xb2   :  { %313 = vmatpush.bf16.msra.mxu3 %v4189_v1  ;;  %431 = vmatpush.bf16.msra.mxu2 %v3988_v17  ;;  %v492_v43 = vand.u32 %v485_v41, %v4194_v6 }
  0xb6   :  { %314 = vmatpush.bf16.msra.mxu3 %v4201_v7  ;;  %432 = vmatpush.bf16.msra.mxu2 %v3987_v21  ;;  %v3274_v21 = vld [vmem:[%s5434_s3 + $0x9c] sm:$0x3] }
  0xba   :  { %315 = vmatpush.bf16.msra.mxu3 %v4209_v10 }
  0xbd   :  { %251 = vmatmul.bf16.vlgmr.msrb.gmra.mxu2 %v3980_v40  ;;  %v3254_v40 = vld [vmem:[%s5434_s3 + $0x88] sm:$0x3] }
  0xbe   :  { %316 = vmatpush.bf16.msra.mxu3 %v4219_v12  ;;  %v390_v8 = vpop.f32.mrf.mxu1  ;;  %v551_v42 = vunpack.c.l.b16 %v3254_v40  ;;  %499 = vmatpush.bf16.msrb.mxu2 %v492_v43 }
  0xbf   :  { %v391_v13 = vadd.f32 %v4282_v27, %v390_v8 }
  0xc0   :  { %v554_v44 = vpack.c.b16 %v551_v42, %v551_v42 }
  0xc1   :  { %v395_v19 = vmax.f32 %v391_v13, 0.0  ;;  %v3995_v13 = vld [vmem:[%s5436_s0 + $0x38] sm:$0xff] }
  0xc2   :  { %317 = vmatpush.bf16.msra.mxu3 %v4229_v14  ;;  %v561_v45 = vand.u32 %v554_v44, %v4194_v6  ;;  %500 = vmatpush.bf16.msrb.mxu2 %v3991_v46 }
  0xc4   :  { %568 = vmatpush.bf16.msra.mxu1 %v561_v45  ;;  %v4004_v45 = vld [vmem:[%s5436_s0 + $0x50] sm:$0xff] }
  0xc6   :  { %318 = vmatpush.bf16.msra.mxu3 %v4237_v15  ;;  %v392_v18 = vpop.f32.mrf.mxu1 }
  0xc7   :  { %v393_v20 = vadd.f32 %v4282_v27, %v392_v18  ;;  %v3294_v18 = vld [vmem:[%s5434_s3 + $0xb0] sm:$0x3] }
  0xc9   :  { %v396_v22 = vmax.f32 %v393_v20, 0.0 }
  0xca   :  { %319 = vmatpush.bf16.msra.mxu3 %v4245_v16 }
  0xcb   :  { %v397_v24 = vpack.c.bf16 %v396_v22, %v395_v19  ;;  %v689_v19 = vunpack.c.l.b16 %v3294_v18 }
  0xcd   :  { %3223 = vmatmul.msk.bf16.vlgmr.msra.gmra.mxu2 %vm174_vm2, %v397_v24  ;;  %v692_v20 = vpack.c.b16 %v689_v19, %v689_v19  ;;  %v620_v24 = vunpack.c.l.b16 %v3274_v21 }
  0xcf   :  { %v699_v22 = vand.u32 %v692_v20, %v4194_v6 }
 0x130   :  { %v194_v47 = vpop.f32.mrf.mxu2  ;;  %v229_v48 = vpop.f32.mrf.mxu3 }
 0x131   :  { %v230_v49 = vadd.f32 %v229_v48, %v194_v47  ;;  %v3994_v47 = vld [vmem:[%s5434_s3 + $0x80] sm:$0xff] }
 0x132   :  { %v3990_v48 = vld [vmem:[%s5434_s3 + $0x64] sm:$0xff]  ;;  %569 = vmatpush.bf16.msra.mxu1 %v3994_v47 }
 0x133   :  { %501 = vmatpush.bf16.msrb.mxu2 %v3990_v48 }
 0x137   :  { %588 = vmatpush.bf16.msra.mxu2 %v4182_v0 }
 0x138   :  { %v4309_v50 = vpop.f32.mrf.mxu2  ;;  %v4354_v23 = vpop.f32.mrf.mxu3 }
 0x13b   :  { %589 = vmatpush.bf16.msra.mxu2 %v4189_v1 }
 0x13f   :  { %590 = vmatpush.bf16.msra.mxu2 %v4201_v7 }
 0x140   :  { %v252_v52 = vpop.f32.mrf.mxu2 }
 0x141   :  { %v253_v53 = vadd.f32 %v4282_v27, %v252_v52 }
 0x143   :  { %v257_v56 = vmax.f32 %v253_v53, 0.0  ;;  %591 = vmatpush.bf16.msra.mxu2 %v4209_v10 }
 0x147   :  { %592 = vmatpush.bf16.msra.mxu2 %v4219_v12 }
 0x148   :  { %v254_v54 = vpop.f32.mrf.mxu2 }
 0x149   :  { %v255_v55 = vadd.f32 %v4282_v27, %v254_v54 }
 0x14b   :  { %v258_v57 = vmax.f32 %v255_v55, 0.0  ;;  %593 = vmatpush.bf16.msra.mxu2 %v4229_v14 }
 0x14d   :  { %v259_v58 = vpack.c.bf16 %v258_v57, %v257_v56 }
 0x14f   :  { %3183 = vmatmul.msk.bf16.vlgmr.msrb.gmra.mxu3 %vm174_vm2, %v259_v58  ;;  %594 = vmatpush.bf16.msra.mxu2 %v4237_v15 }
 0x150   :  { %519 = vmatpush.bf16.msrb.mxu3 %v4182_v0 }
 0x153   :  { %595 = vmatpush.bf16.msra.mxu2 %v4245_v16 }
 0x154   :  { %520 = vmatpush.bf16.msrb.mxu3 %v4189_v1 }
 0x158   :  { %521 = vmatpush.bf16.msrb.mxu3 %v4201_v7 }
 0x15c   :  { %522 = vmatpush.bf16.msrb.mxu3 %v4209_v10 }
 0x15f   :  { %320 = vmatmul.bf16.vlgmr.msra.gmra.mxu3 %v3983_v59  ;;  %v434_v59 = vpop.f32.mrf.mxu2 }
 0x160   :  { %523 = vmatpush.bf16.msrb.mxu3 %v4219_v12 }
 0x164   :  { %524 = vmatpush.bf16.msrb.mxu3 %v4229_v14 }
 0x167   :  { %v4453_v40 = vpop.f32.mrf.mxu2 }
 0x168   :  { %525 = vmatpush.bf16.msrb.mxu3 %v4237_v15 }
 0x16c   :  { %526 = vmatpush.bf16.msrb.mxu3 %v4245_v16 }
 0x16f   :  { %527 = vmatmul.bf16.vlgmr.msrb.gmra.mxu3 %v3992_v25  ;;  %v623_v25 = vpack.c.b16 %v620_v24, %v620_v24 }
 0x170   :  { %706 = vmatpush.bf16.msra.mxu3 %v699_v22 }
 0x1d2   :  { %v296_v26 = vpop.f32.mrf.mxu3 }
 0x1d3   :  { %v301_v28 = vadd.f32 %v296_v26, %v230_v49  ;;  %v3993_v49 = vld [vmem:[%s5434_s3 + $0x78] sm:$0xff]  ;;  %v4000_v26 = vld [vmem:[%s5434_s3 + $0xa8] sm:$0xff] }
 0x1d4   :  { %570 = vmatpush.bf16.msra.mxu1 %v3993_v49  ;;  %707 = vmatpush.bf16.msra.mxu3 %v4000_v26 }
 0x1d8   :  { %657 = vmatpush.bf16.msrb.mxu1 %v4182_v0 }
 0x1da   :  { %v4364_v29 = vpop.f32.mrf.mxu3 }
 0x1dc   :  { %658 = vmatpush.bf16.msrb.mxu1 %v4189_v1 }
 0x1e0   :  { %659 = vmatpush.bf16.msrb.mxu1 %v4201_v7 }
 0x1e2   :  { %v321_v30 = vpop.f32.mrf.mxu3 }
 0x1e3   :  { %v322_v31 = vadd.f32 %v4282_v27, %v321_v30  ;;  %v630_v30 = vand.u32 %v623_v25, %v4194_v6 }
 0x1e4   :  { %660 = vmatpush.bf16.msrb.mxu1 %v4209_v10 }
 0x1e5   :  { %v326_v34 = vmax.f32 %v322_v31, 0.0  ;;  %v3997_v31 = vld [vmem:[%s5434_s3 + $0x94] sm:$0xff] }
 0x1e8   :  { %661 = vmatpush.bf16.msrb.mxu1 %v4219_v12 }
 0x1ea   :  { %v323_v32 = vpop.f32.mrf.mxu3 }
 0x1eb   :  { %v324_v33 = vadd.f32 %v4282_v27, %v323_v32  ;;  %v3999_v32 = vld [vmem:[%s5434_s3 + $0xa0] sm:$0xff] }
 0x1ec   :  { %662 = vmatpush.bf16.msrb.mxu1 %v4229_v14  ;;  %708 = vmatpush.bf16.msra.mxu3 %v3999_v32 }
 0x1ed   :  { %v327_v35 = vmax.f32 %v324_v33, 0.0  ;;  %v3996_v33 = vld [vmem:[%s5434_s3 + $0x8c] sm:$0xff] }
 0x1ef   :  { %v328_v36 = vpack.c.bf16 %v327_v35, %v326_v34 }
 0x1f0   :  { %663 = vmatpush.bf16.msrb.mxu1 %v4237_v15  ;;  %795 = vmatpush.bf16.msrb.mxu3 %v4182_v0 }
 0x1f1   :  { %3203 = vmatmul.msk.bf16.vlgmr.msrb.gmra.mxu0 %vm174_vm2, %v328_v36 }
 0x1f2   :  { %v528_v51 = vpop.f32.mrf.mxu3  ;;  %637 = vmatpush.bf16.msrb.mxu0 %v630_v30 }
 0x1f3   :  { %v529_v52 = vadd.f32 %v4282_v27, %v528_v51 }
 0x1f4   :  { %664 = vmatpush.bf16.msrb.mxu1 %v4245_v16  ;;  %796 = vmatpush.bf16.msrb.mxu3 %v4189_v1 }
 0x1f5   :  { %v533_v54 = vmax.f32 %v529_v52, 0.0 }
 0x1f6   :  { %638 = vmatpush.bf16.msrb.mxu0 %v3997_v31  ;;  %v4010_v31 = vld [vmem:[%s5436_s0 + $0x60] sm:$0xff] }
 0x1f8   :  { %797 = vmatpush.bf16.msrb.mxu3 %v4201_v7 }
 0x1fa   :  { %v530_v53 = vpop.f32.mrf.mxu3  ;;  %639 = vmatpush.bf16.msrb.mxu0 %v3996_v33 }
 0x1fb   :  { %v531_v55 = vadd.f32 %v4282_v27, %v530_v53 }
 0x1fc   :  { %798 = vmatpush.bf16.msrb.mxu3 %v4209_v10 }
 0x1fd   :  { %v534_v56 = vmax.f32 %v531_v55, 0.0  ;;  %v4001_v55 = vld [vmem:[%s5436_s0 + $0x48] sm:$0xff] }
 0x1ff   :  { %v535_v57 = vpack.c.bf16 %v534_v56, %v533_v54  ;;  %v3314_v56 = vld [vmem:[%s5434_s3 + $0xc4] sm:$0x3] }
 0x200   :  { %799 = vmatpush.bf16.msrb.mxu3 %v4219_v12 }
 0x201   :  { %458 = vmatmul.bf16.vlgmr.msra.gmra.mxu0 %v3989_v37  ;;  %3263 = vmatmul.msk.bf16.vlgmr.msra.gmra.mxu1 %vm174_vm2, %v535_v57  ;;  %v758_v57 = vunpack.c.l.b16 %v3314_v56  ;;  %v4008_v56 = vld [vmem:[%s5434_s3 + $0xdc] sm:$0xff] }
 0x202   :  { %726 = vmatpush.bf16.msra.mxu0 %v4182_v0 }
 0x204   :  { %800 = vmatpush.bf16.msrb.mxu3 %v4229_v14 }
 0x206   :  { %727 = vmatpush.bf16.msra.mxu0 %v4189_v1 }
 0x208   :  { %801 = vmatpush.bf16.msrb.mxu3 %v4237_v15 }
 0x20a   :  { %728 = vmatpush.bf16.msra.mxu0 %v4201_v7 }
 0x20c   :  { %802 = vmatpush.bf16.msrb.mxu3 %v4245_v16 }
 0x20e   :  { %729 = vmatpush.bf16.msra.mxu0 %v4209_v10 }
 0x211   :  { %665 = vmatmul.bf16.vlgmr.msrb.gmra.mxu1 %v3998_v63 }
 0x212   :  { %730 = vmatpush.bf16.msra.mxu0 %v4219_v12 }
 0x216   :  { %731 = vmatpush.bf16.msra.mxu0 %v4229_v14 }
 0x21a   :  { %732 = vmatpush.bf16.msra.mxu0 %v4237_v15 }
 0x21e   :  { %733 = vmatpush.bf16.msra.mxu0 %v4245_v16 }
 0x26e   :  { %v365_v58 = vpop.f32.mrf.mxu0 }
 0x26f   :  { %v370_v60 = vadd.f32 %v365_v58, %v301_v28 }
 0x271   :  { %v439_v61 = vadd.f32 %v434_v59, %v370_v60  ;;  %v3334_v59 = vld [vmem:[%s5434_s3 + $0xd8] sm:$0x3]  ;;  %v761_v60 = vpack.c.b16 %v758_v57, %v758_v57 }
 0x273   :  { %v768_v63 = vand.u32 %v761_v60, %v4194_v6 }
 0x276   :  { %v4409_v62 = vpop.f32.mrf.mxu0 }
 0x27e   :  { %v459_v2 = vpop.f32.mrf.mxu0  ;;  %v572_v17 = vpop.f32.mrf.mxu1 }
 0x27f   :  { %v460_v3 = vadd.f32 %v4282_v27, %v459_v2 }
 0x281   :  { %v464_v8 = vmax.f32 %v460_v3, 0.0 }
 0x286   :  { %v461_v4 = vpop.f32.mrf.mxu0  ;;  %v4434_v28 = vpop.f32.mrf.mxu1 }
 0x287   :  { %v462_v5 = vadd.f32 %v4282_v27, %v461_v4  ;;  %v4003_v4 = vld [vmem:[%s5434_s3 + $0xbc] sm:$0xff] }
 0x289   :  { %v465_v9 = vmax.f32 %v462_v5, 0.0 }
 0x28b   :  { %v466_v11 = vpack.c.bf16 %v465_v9, %v464_v8  ;;  %v4006_v8 = vld [vmem:[%s5434_s3 + $0xd0] sm:$0xff] }
 0x28c   :  { %v4002_v9 = vld [vmem:[%s5434_s3 + $0xb4] sm:$0xff] }
 0x28d   :  { %3243 = vmatmul.msk.bf16.vlgmr.msrb.gmra.mxu2 %vm174_vm2, %v466_v11  ;;  %v4005_v11 = vld [vmem:[%s5434_s3 + $0xc8] sm:$0xff] }
 0x28e   :  { %v666_v34 = vpop.f32.mrf.mxu1  ;;  %775 = vmatpush.bf16.msrb.mxu2 %v768_v63 }
 0x28f   :  { %v667_v35 = vadd.f32 %v4282_v27, %v666_v34 }
 0x291   :  { %v671_v37 = vmax.f32 %v667_v35, 0.0 }
 0x292   :  { %776 = vmatpush.bf16.msrb.mxu2 %v4003_v4 }
 0x296   :  { %v668_v36 = vpop.f32.mrf.mxu1  ;;  %777 = vmatpush.bf16.msrb.mxu2 %v4002_v9  ;;  %v4016_v9 = vld [vmem:[%s5436_s0 + $0x70] sm:$0xff] }
 0x297   :  { %v669_v38 = vadd.f32 %v4282_v27, %v668_v36 }
 0x299   :  { %v672_v39 = vmax.f32 %v669_v38, 0.0 }
 0x29b   :  { %v673_v41 = vpack.c.bf16 %v672_v39, %v671_v37  ;;  %v4007_v39 = vld [vmem:[%s5436_s0 + $0x58] sm:$0xff] }
 0x29d   :  { %596 = vmatmul.bf16.vlgmr.msra.gmra.mxu2 %v3995_v13  ;;  %3303 = vmatmul.msk.bf16.vlgmr.msra.gmra.mxu3 %vm174_vm2, %v673_v41 }
 0x29e   :  { %864 = vmatpush.bf16.msra.mxu2 %v4182_v0 }
 0x2a2   :  { %865 = vmatpush.bf16.msra.mxu2 %v4189_v1 }
 0x2a6   :  { %866 = vmatpush.bf16.msra.mxu2 %v4201_v7 }
 0x2aa   :  { %867 = vmatpush.bf16.msra.mxu2 %v4209_v10 }
 0x2ad   :  { %803 = vmatmul.bf16.vlgmr.msrb.gmra.mxu3 %v4004_v45  ;;  %v3354_v45 = vld [vmem:[%s5434_s3 + $0xec] sm:$0x3] }
 0x2ae   :  { %868 = vmatpush.bf16.msra.mxu2 %v4219_v12 }
 0x2b2   :  { %869 = vmatpush.bf16.msra.mxu2 %v4229_v14 }
 0x2b6   :  { %870 = vmatpush.bf16.msra.mxu2 %v4237_v15 }
 0x2ba   :  { %871 = vmatpush.bf16.msra.mxu2 %v4245_v16 }
 0x310   :  { %v503_v42 = vpop.f32.mrf.mxu2 }
 0x311   :  { %v508_v43 = vadd.f32 %v503_v42, %v439_v61  ;;  %v827_v61 = vunpack.c.l.b16 %v3334_v59  ;;  %v3374_v42 = vld [vmem:[%s5434_s3 + $0x100] sm:$0x3] }
 0x313   :  { %v577_v44 = vadd.f32 %v572_v17, %v508_v43  ;;  %v830_v2 = vpack.c.b16 %v827_v61, %v827_v61  ;;  %v965_v43 = vunpack.c.l.b16 %v3374_v42  ;;  %v4014_v42 = vld [vmem:[%s5434_s3 + $0x104] sm:$0xff] }
 0x315   :  { %v837_v3 = vand.u32 %v830_v2, %v4194_v6 }
 0x317   :  { %844 = vmatpush.bf16.msra.mxu1 %v837_v3 }
 0x318   :  { %v4467_v46 = vpop.f32.mrf.mxu2 }
 0x31b   :  { %845 = vmatpush.bf16.msra.mxu1 %v4006_v8 }
 0x31f   :  { %846 = vmatpush.bf16.msra.mxu1 %v4005_v11 }
 0x320   :  { %v597_v47 = vpop.f32.mrf.mxu2  ;;  %v710_v58 = vpop.f32.mrf.mxu3 }
 0x321   :  { %v598_v48 = vadd.f32 %v4282_v27, %v597_v47 }
 0x323   :  { %v602_v52 = vmax.f32 %v598_v48, 0.0  ;;  %933 = vmatpush.bf16.msrb.mxu1 %v4182_v0  ;;  %v896_v48 = vunpack.c.l.b16 %v3354_v45 }
 0x327   :  { %934 = vmatpush.bf16.msrb.mxu1 %v4189_v1 }
 0x328   :  { %v599_v49 = vpop.f32.mrf.mxu2  ;;  %v4489_v5 = vpop.f32.mrf.mxu3 }
 0x329   :  { %v600_v51 = vadd.f32 %v4282_v27, %v599_v49  ;;  %v899_v49 = vpack.c.b16 %v896_v48, %v896_v48 }
 0x32b   :  { %v603_v53 = vmax.f32 %v600_v51, 0.0  ;;  %935 = vmatpush.bf16.msrb.mxu1 %v4201_v7  ;;  %v4012_v51 = vld [vmem:[%s5434_s3 + $0xf8] sm:$0xff] }
 0x32d   :  { %v604_v54 = vpack.c.bf16 %v603_v53, %v602_v52  ;;  %v906_v53 = vand.u32 %v899_v49, %v4194_v6 }
 0x32f   :  { %3283 = vmatmul.msk.bf16.vlgmr.msrb.gmra.mxu0 %vm174_vm2, %v604_v54  ;;  %936 = vmatpush.bf16.msrb.mxu1 %v4209_v10  ;;  %v4009_v54 = vld [vmem:[%s5434_s3 + $0xe4] sm:$0xff] }
 0x330   :  { %v804_v13 = vpop.f32.mrf.mxu3  ;;  %913 = vmatpush.bf16.msrb.mxu0 %v906_v53 }
 0x331   :  { %v805_v17 = vadd.f32 %v4282_v27, %v804_v13 }
 0x333   :  { %v809_v19 = vmax.f32 %v805_v17, 0.0  ;;  %937 = vmatpush.bf16.msrb.mxu1 %v4219_v12 }
 0x334   :  { %914 = vmatpush.bf16.msrb.mxu0 %v4009_v54 }
 0x337   :  { %938 = vmatpush.bf16.msrb.mxu1 %v4229_v14 }
 0x338   :  { %v806_v18 = vpop.f32.mrf.mxu3  ;;  %915 = vmatpush.bf16.msrb.mxu0 %v4008_v56 }
 0x339   :  { %v807_v20 = vadd.f32 %v4282_v27, %v806_v18 }
 0x33b   :  { %v810_v21 = vmax.f32 %v807_v20, 0.0  ;;  %939 = vmatpush.bf16.msrb.mxu1 %v4237_v15 }
 0x33d   :  { %v811_v22 = vpack.c.bf16 %v810_v21, %v809_v19 }
 0x33f   :  { %734 = vmatmul.bf16.vlgmr.msra.gmra.mxu0 %v4001_v55  ;;  %3343 = vmatmul.msk.bf16.vlgmr.msra.gmra.mxu1 %vm174_vm2, %v811_v22  ;;  %v4011_v55 = vld [vmem:[%s5434_s3 + $0xf0] sm:$0xff] }
 0x340   :  { %940 = vmatpush.bf16.msrb.mxu1 %v4245_v16  ;;  %1002 = vmatpush.bf16.msra.mxu0 %v4182_v0 }
 0x344   :  { %1003 = vmatpush.bf16.msra.mxu0 %v4189_v1 }
 0x348   :  { %1004 = vmatpush.bf16.msra.mxu0 %v4201_v7 }
 0x34c   :  { %1005 = vmatpush.bf16.msra.mxu0 %v4209_v10 }
 0x34f   :  { %941 = vmatmul.bf16.vlgmr.msrb.gmra.mxu1 %v4010_v31 }
 0x350   :  { %1006 = vmatpush.bf16.msra.mxu0 %v4219_v12 }
 0x354   :  { %1007 = vmatpush.bf16.msra.mxu0 %v4229_v14 }
 0x358   :  { %1008 = vmatpush.bf16.msra.mxu0 %v4237_v15 }
 0x35c   :  { %1009 = vmatpush.bf16.msra.mxu0 %v4245_v16 }
 0x3ac   :  { %v641_v24 = vpop.f32.mrf.mxu0 }
 0x3ad   :  { %v646_v25 = vadd.f32 %v641_v24, %v577_v44  ;;  %v968_v44 = vpack.c.b16 %v965_v43, %v965_v43  ;;  %v4013_v24 = vld [vmem:[%s5436_s0 + $0x68] sm:$0xff]  ;;  %v4017_v43 = vld [vmem:[%s5434_s3 + $0x118] sm:$0xff] }
 0x3af   :  { %v715_v26 = vadd.f32 %v710_v58, %v646_v25  ;;  %v975_v47 = vand.u32 %v968_v44, %v4194_v6  ;;  %v3394_v25 = vld [vmem:[%s5434_s3 + $0x114] sm:$0x3] }
 0x3b1   :  { %982 = vmatpush.bf16.msra.mxu3 %v975_v47 }
 0x3b4   :  { %v4515_v30 = vpop.f32.mrf.mxu0 }
 0x3b5   :  { %983 = vmatpush.bf16.msra.mxu3 %v4012_v51 }
 0x3b9   :  { %984 = vmatpush.bf16.msra.mxu3 %v4011_v55 }
 0x3bc   :  { %v735_v32 = vpop.f32.mrf.mxu0  ;;  %v848_v41 = vpop.f32.mrf.mxu1 }
 0x3bd   :  { %v736_v33 = vadd.f32 %v4282_v27, %v735_v32  ;;  %1071 = vmatpush.bf16.msrb.mxu3 %v4182_v0  ;;  %v3414_v32 = vld [vmem:[%s5434_s3 + $0x128] sm:$0x3] }
 0x3bf   :  { %v740_v36 = vmax.f32 %v736_v33, 0.0 }
 0x3c1   :  { %1072 = vmatpush.bf16.msrb.mxu3 %v4189_v1 }
 0x3c4   :  { %v737_v34 = vpop.f32.mrf.mxu0  ;;  %v4540_v52 = vpop.f32.mrf.mxu1 }
 0x3c5   :  { %v738_v35 = vadd.f32 %v4282_v27, %v737_v34  ;;  %1073 = vmatpush.bf16.msrb.mxu3 %v4201_v7  ;;  %v1103_v34 = vunpack.c.l.b16 %v3414_v32  ;;  %v4023_v32 = vld [vmem:[%s5434_s3 + $0x140] sm:$0xff] }
 0x3c7   :  { %v741_v37 = vmax.f32 %v738_v35, 0.0 }
 0x3c9   :  { %v742_v38 = vpack.c.bf16 %v741_v37, %v740_v36  ;;  %1074 = vmatpush.bf16.msrb.mxu3 %v4209_v10  ;;  %v1106_v36 = vpack.c.b16 %v1103_v34, %v1103_v34 }
 0x3cb   :  { %3323 = vmatmul.msk.bf16.vlgmr.msrb.gmra.mxu2 %vm174_vm2, %v742_v38  ;;  %v1113_v37 = vand.u32 %v1106_v36, %v4194_v6  ;;  %v4015_v38 = vld [vmem:[%s5434_s3 + $0x10c] sm:$0xff] }
 0x3cc   :  { %v942_v57 = vpop.f32.mrf.mxu1 }
 0x3cd   :  { %v943_v58 = vadd.f32 %v4282_v27, %v942_v57  ;;  %1075 = vmatpush.bf16.msrb.mxu3 %v4219_v12  ;;  %1120 = vmatpush.bf16.msra.mxu1 %v1113_v37 }
 0x3cf   :  { %v947_v60 = vmax.f32 %v943_v58, 0.0  ;;  %v4022_v58 = vld [vmem:[%s5436_s0 + $0x80] sm:$0xff] }
 0x3d1   :  { %1076 = vmatpush.bf16.msrb.mxu3 %v4229_v14 }
 0x3d4   :  { %v944_v59 = vpop.f32.mrf.mxu1 }
 0x3d5   :  { %v945_v61 = vadd.f32 %v4282_v27, %v944_v59  ;;  %1077 = vmatpush.bf16.msrb.mxu3 %v4237_v15 }
 0x3d7   :  { %v948_v63 = vmax.f32 %v945_v61, 0.0 }
 0x3d9   :  { %v949_v2 = vpack.c.bf16 %v948_v63, %v947_v60  ;;  %1078 = vmatpush.bf16.msrb.mxu3 %v4245_v16 }
 0x3db   :  { %872 = vmatmul.bf16.vlgmr.msra.gmra.mxu2 %v4007_v39  ;;  %3383 = vmatmul.msk.bf16.vlgmr.msra.gmra.mxu3 %vm174_vm2, %v949_v2 }
 0x3eb   :  { %1079 = vmatmul.bf16.vlgmr.msrb.gmra.mxu3 %v4016_v9 }
 0x44e   :  { %v779_v3 = vpop.f32.mrf.mxu2 }
 0x44f   :  { %v784_v4 = vadd.f32 %v779_v3, %v715_v26  ;;  %v1034_v26 = vunpack.c.l.b16 %v3394_v25 }
 0x451   :  { %v853_v8 = vadd.f32 %v848_v41, %v784_v4  ;;  %v1037_v33 = vpack.c.b16 %v1034_v26, %v1034_v26  ;;  %v4018_v41 = vld [vmem:[%s5434_s3 + $0x120] sm:$0xff] }
 0x452   :  { %1121 = vmatpush.bf16.msra.mxu1 %v4018_v41 }
 0x453   :  { %v1044_v35 = vand.u32 %v1037_v33, %v4194_v6  ;;  %v4020_v33 = vld [vmem:[%s5434_s3 + $0x12c] sm:$0xff] }
 0x455   :  { %1051 = vmatpush.bf16.msrb.mxu2 %v1044_v35 }
 0x456   :  { %v4571_v11 = vpop.f32.mrf.mxu2  ;;  %1122 = vmatpush.bf16.msra.mxu1 %v4017_v43 }
 0x459   :  { %1052 = vmatpush.bf16.msrb.mxu2 %v4015_v38 }
 0x45a   :  { %1209 = vmatpush.bf16.msrb.mxu1 %v4182_v0 }
 0x45d   :  { %1053 = vmatpush.bf16.msrb.mxu2 %v4014_v42 }
 0x45e   :  { %v873_v13 = vpop.f32.mrf.mxu2  ;;  %v986_v31 = vpop.f32.mrf.mxu3  ;;  %1210 = vmatpush.bf16.msrb.mxu1 %v4189_v1 }
 0x45f   :  { %v874_v17 = vadd.f32 %v4282_v27, %v873_v13  ;;  %v3454_v13 = vld [vmem:[%s5434_s3 + $0x150] sm:$0x3] }
 0x461   :  { %v878_v20 = vmax.f32 %v874_v17, 0.0  ;;  %1140 = vmatpush.bf16.msra.mxu2 %v4182_v0  ;;  %v1241_v17 = vunpack.c.l.b16 %v3454_v13  ;;  %v4718_v13 = vld [vmem:[%s5433_s1 + $0x30] sm:$0xff] }
 0x462   :  { %1211 = vmatpush.bf16.msrb.mxu1 %v4201_v7 }
 0x465   :  { %1141 = vmatpush.bf16.msra.mxu2 %v4189_v1 }
 0x466   :  { %v875_v18 = vpop.f32.mrf.mxu2  ;;  %v4593_v39 = vpop.f32.mrf.mxu3  ;;  %1212 = vmatpush.bf16.msrb.mxu1 %v4209_v10 }
 0x467   :  { %v876_v19 = vadd.f32 %v4282_v27, %v875_v18  ;;  %v1244_v18 = vpack.c.b16 %v1241_v17, %v1241_v17 }
 0x469   :  { %v879_v21 = vmax.f32 %v876_v19, 0.0  ;;  %1142 = vmatpush.bf16.msra.mxu2 %v4201_v7  ;;  %v3434_v19 = vld [vmem:[%s5434_s3 + $0x13c] sm:$0x3] }
 0x46a   :  { %1213 = vmatpush.bf16.msrb.mxu1 %v4219_v12 }
 0x46b   :  { %v880_v22 = vpack.c.bf16 %v879_v21, %v878_v20  ;;  %v1251_v20 = vand.u32 %v1244_v18, %v4194_v6  ;;  %v1172_v21 = vunpack.c.l.b16 %v3434_v19  ;;  %v4726_v18 = vld [vmem:[%s5433_s1 + $0x28] sm:$0xff] }
 0x46d   :  { %3363 = vmatmul.msk.bf16.vlgmr.msrb.gmra.mxu0 %vm174_vm2, %v880_v22  ;;  %1143 = vmatpush.bf16.msra.mxu2 %v4209_v10  ;;  %v1175_v22 = vpack.c.b16 %v1172_v21, %v1172_v21 }
 0x46e   :  { %v1080_v44 = vpop.f32.mrf.mxu3  ;;  %1214 = vmatpush.bf16.msrb.mxu1 %v4229_v14  ;;  %1258 = vmatpush.bf16.msra.mxu3 %v1251_v20 }
 0x46f   :  { %v1081_v45 = vadd.f32 %v4282_v27, %v1080_v44  ;;  %v1182_v26 = vand.u32 %v1175_v22, %v4194_v6  ;;  %v4734_v22 = vld [vmem:[%s5433_s1 + $0x20] sm:$0xff] }
 0x471   :  { %v1085_v48 = vmax.f32 %v1081_v45, 0.0  ;;  %1144 = vmatpush.bf16.msra.mxu2 %v4219_v12  ;;  %1189 = vmatpush.bf16.msrb.mxu0 %v1182_v26 }
 0x472   :  { %1215 = vmatpush.bf16.msrb.mxu1 %v4237_v15 }
 0x475   :  { %1145 = vmatpush.bf16.msra.mxu2 %v4229_v14 }
 0x476   :  { %v1082_v47 = vpop.f32.mrf.mxu3  ;;  %1216 = vmatpush.bf16.msrb.mxu1 %v4245_v16 }
 0x477   :  { %v1083_v49 = vadd.f32 %v4282_v27, %v1082_v47 }
 0x479   :  { %v1086_v51 = vmax.f32 %v1083_v49, 0.0  ;;  %1146 = vmatpush.bf16.msra.mxu2 %v4237_v15 }
 0x47b   :  { %v1087_v53 = vpack.c.bf16 %v1086_v51, %v1085_v48 }
 0x47d   :  { %1010 = vmatmul.bf16.vlgmr.msra.gmra.mxu0 %v4013_v24  ;;  %3423 = vmatmul.msk.bf16.vlgmr.msra.gmra.mxu1 %vm174_vm2, %v1087_v53  ;;  %v4024_v24 = vld [vmem:[%s5434_s3 + $0x148] sm:$0xff] }
 0x47e   :  { %1147 = vmatpush.bf16.msra.mxu2 %v4245_v16  ;;  %1259 = vmatpush.bf16.msra.mxu3 %v4024_v24 }
 0x482   :  { %1260 = vmatpush.bf16.msra.mxu3 %v4023_v32  ;;  %v4741_v32 = vld [vmem:[%s5433_s1 + $0x18] sm:$0xff] }
 0x486   :  { %1347 = vmatpush.bf16.msrb.mxu3 %v4182_v0 }
 0x48a   :  { %1348 = vmatpush.bf16.msrb.mxu3 %v4189_v1 }
 0x48d   :  { %1217 = vmatmul.bf16.vlgmr.msrb.gmra.mxu1 %v4022_v58 }
 0x48e   :  { %1349 = vmatpush.bf16.msrb.mxu3 %v4201_v7 }
 0x492   :  { %1350 = vmatpush.bf16.msrb.mxu3 %v4209_v10 }
 0x496   :  { %1351 = vmatpush.bf16.msrb.mxu3 %v4219_v12 }
 0x49a   :  { %1352 = vmatpush.bf16.msrb.mxu3 %v4229_v14 }
 0x49e   :  { %1353 = vmatpush.bf16.msrb.mxu3 %v4237_v15 }
 0x4a2   :  { %1354 = vmatpush.bf16.msrb.mxu3 %v4245_v16 }
 0x4ea   :  { %v917_v54 = vpop.f32.mrf.mxu0 }
 0x4eb   :  { %v922_v55 = vadd.f32 %v917_v54, %v853_v8  ;;  %v4019_v8 = vld [vmem:[%s5436_s0 + $0x78] sm:$0xff] }
 0x4ec   :  { %v3494_v54 = vld [vmem:[%s5434_s3 + $0x178] sm:$0x3] }
 0x4ed   :  { %v991_v56 = vadd.f32 %v986_v31, %v922_v55  ;;  %v4021_v31 = vld [vmem:[%s5434_s3 + $0x134] sm:$0xff] }
 0x4ee   :  { %1190 = vmatpush.bf16.msrb.mxu0 %v4021_v31 }
 0x4f2   :  { %v4619_v57 = vpop.f32.mrf.mxu0  ;;  %1191 = vmatpush.bf16.msrb.mxu0 %v4020_v33 }
 0x4f6   :  { %1278 = vmatpush.bf16.msra.mxu0 %v4182_v0 }
 0x4fa   :  { %v1011_v59 = vpop.f32.mrf.mxu0  ;;  %v1124_v9 = vpop.f32.mrf.mxu1  ;;  %1279 = vmatpush.bf16.msra.mxu0 %v4189_v1 }
 0x4fb   :  { %v1012_v60 = vadd.f32 %v4282_v27, %v1011_v59 }
 0x4fd   :  { %v1016_v2 = vmax.f32 %v1012_v60, 0.0 }
 0x4fe   :  { %1280 = vmatpush.bf16.msra.mxu0 %v4201_v7  ;;  %v4028_v7 = vld [vmem:[%s5436_s0 + $0x90] sm:$0xff] }
 0x502   :  { %v1013_v61 = vpop.f32.mrf.mxu0  ;;  %v4644_v25 = vpop.f32.mrf.mxu1  ;;  %1281 = vmatpush.bf16.msra.mxu0 %v4209_v10 }
 0x503   :  { %v1014_v63 = vadd.f32 %v4282_v27, %v1013_v61  ;;  %v4027_v61 = vld [vmem:[%s5434_s3 + $0x15c] sm:$0xff] }
 0x505   :  { %v1017_v3 = vmax.f32 %v1014_v63, 0.0 }
 0x506   :  { %1282 = vmatpush.bf16.msra.mxu0 %v4219_v12 }
 0x507   :  { %v1018_v4 = vpack.c.bf16 %v1017_v3, %v1016_v2  ;;  %v4030_v2 = vld [vmem:[%s5434_s3 + $0x170] sm:$0xff] }
 0x508   :  { %v4026_v3 = vld [vmem:[%s5434_s3 + $0x154] sm:$0xff] }
 0x509   :  { %3403 = vmatmul.msk.bf16.vlgmr.msrb.gmra.mxu2 %vm174_vm2, %v1018_v4  ;;  %v4029_v4 = vld [vmem:[%s5434_s3 + $0x168] sm:$0xff] }
 0x50a   :  { %v1218_v34 = vpop.f32.mrf.mxu1  ;;  %1283 = vmatpush.bf16.msra.mxu0 %v4229_v14 }
 0x50b   :  { %v1219_v35 = vadd.f32 %v4282_v27, %v1218_v34  ;;  %v4751_v34 = vld [vmem:[%s5433_s1 + $0x10] sm:$0xff] }
 0x50d   :  { %v1223_v37 = vmax.f32 %v1219_v35, 0.0 }
 0x50e   :  { %1284 = vmatpush.bf16.msra.mxu0 %v4237_v15  ;;  %v4025_v15 = vld [vmem:[%s5436_s0 + $0x88] sm:$0xff] }
 0x512   :  { %v1220_v36 = vpop.f32.mrf.mxu1  ;;  %1285 = vmatpush.bf16.msra.mxu0 %v4245_v16  ;;  %v3474_v16 = vld [vmem:[%s5434_s3 + $0x164] sm:$0x3] }
 0x513   :  { %v1221_v38 = vadd.f32 %v4282_v27, %v1220_v36  ;;  %v1310_v51 = vunpack.c.l.b16 %v3474_v16  ;;  %v4760_v36 = vld [vmem:[%s5433_s1 + $0x8] sm:$0xff] }
 0x515   :  { %v1224_v41 = vmax.f32 %v1221_v38, 0.0  ;;  %v1313_v55 = vpack.c.b16 %v1310_v51, %v1310_v51  ;;  %v4034_v38 = vld [vmem:[%s5436_s0 + $0xa0] sm:$0xff] }
 0x517   :  { %v1225_v42 = vpack.c.bf16 %v1224_v41, %v1223_v37  ;;  %v1320_v58 = vand.u32 %v1313_v55, %v4194_v6  ;;  %v4767_v37 = vld [vmem:[%s5433_s1] sm:$0xff] }
 0x519   :  { %1148 = vmatmul.bf16.vlgmr.msra.gmra.mxu2 %v4019_v8  ;;  %3463 = vmatmul.msk.bf16.vlgmr.msra.gmra.mxu3 %vm174_vm2, %v1225_v42  ;;  %v4711_v8 = vld [vmem:[%s5433_s1 + $0x38] sm:$0xff]  ;;  %v4777_v42 = vld [vmem:[%s5435_s2] ss:$0 sm:$0xff] }
 0x51a   :  { %1327 = vmatpush.bf16.msrb.mxu2 %v1320_v58  ;;  %v4033_v58 = vld [vmem:[%s5434_s3 + $0x184] sm:$0xff] }
 0x51e   :  { %1328 = vmatpush.bf16.msrb.mxu2 %v4027_v61 }
 0x522   :  { %1329 = vmatpush.bf16.msrb.mxu2 %v4026_v3 }
 0x526   :  { %1416 = vmatpush.bf16.msra.mxu2 %v4711_v8 }
 0x529   :  { %1355 = vmatmul.bf16.vlgmr.msrb.gmra.mxu3 %v4028_v7 }
 0x52a   :  { %1417 = vmatpush.bf16.msra.mxu2 %v4718_v13 }
 0x52e   :  { %1418 = vmatpush.bf16.msra.mxu2 %v4726_v18 }
 0x532   :  { %1419 = vmatpush.bf16.msra.mxu2 %v4734_v22 }
 0x536   :  { %1420 = vmatpush.bf16.msra.mxu2 %v4741_v32 }
 0x53a   :  { %1421 = vmatpush.bf16.msra.mxu2 %v4751_v34 }
 0x53e   :  { %1422 = vmatpush.bf16.msra.mxu2 %v4760_v36 }
 0x542   :  { %1423 = vmatpush.bf16.msra.mxu2 %v4767_v37 }
 0x58c   :  { %v1055_v0 = vpop.f32.mrf.mxu2 }
 0x58d   :  { %v1060_v1 = vadd.f32 %v1055_v0, %v991_v56  ;;  %v1379_v56 = vunpack.c.l.b16 %v3494_v54  ;;  %v4036_v54 = vld [vmem:[%s5434_s3 + $0x198] sm:$0xff] }
 0x58f   :  { %v1129_v43 = vadd.f32 %v1124_v9, %v1060_v1  ;;  %v1382_v59 = vpack.c.b16 %v1379_v56, %v1379_v56 }
 0x591   :  { %v1389_v60 = vand.u32 %v1382_v59, %v4194_v6  ;;  %v4035_v59 = vld [vmem:[%s5434_s3 + $0x190] sm:$0xff] }
 0x593   :  { %1396 = vmatpush.bf16.msra.mxu1 %v1389_v60  ;;  %v4032_v60 = vld [vmem:[%s5434_s3 + $0x17c] sm:$0xff] }
 0x594   :  { %v4675_v44 = vpop.f32.mrf.mxu2 }
 0x597   :  { %1397 = vmatpush.bf16.msra.mxu1 %v4030_v2 }
 0x59b   :  { %1398 = vmatpush.bf16.msra.mxu1 %v4029_v4 }
 0x59c   :  { %v1149_v10 = vpop.f32.mrf.mxu2  ;;  %v1262_v53 = vpop.f32.mrf.mxu3 }
 0x59d   :  { %v1150_v12 = vadd.f32 %v4282_v27, %v1149_v10 }
 0x59f   :  { %v1154_v47 = vmax.f32 %v1150_v12, 0.0  ;;  %1485 = vmatpush.bf16.msrb.mxu1 %v4711_v8 }
 0x5a3   :  { %1486 = vmatpush.bf16.msrb.mxu1 %v4718_v13 }
 0x5a4   :  { %v1151_v45 = vpop.f32.mrf.mxu2  ;;  %v4697_v63 = vpop.f32.mrf.mxu3 }
 0x5a5   :  { %v1152_v14 = vadd.f32 %v4282_v27, %v1151_v45  ;;  %v4031_v45 = vld [vmem:[%s5436_s0 + $0x98] sm:$0xff] }
 0x5a7   :  { %v1155_v48 = vmax.f32 %v1152_v14, 0.0  ;;  %1487 = vmatpush.bf16.msrb.mxu1 %v4726_v18 }
 0x5a9   :  { %v1156_v49 = vpack.c.bf16 %v1155_v48, %v1154_v47  ;;  %v3534_v47 = vld [vmem:[%s5434_s3 + $0x1a0] sm:$0x3] }
 0x5aa   :  { %v1517_v48 = vunpack.c.l.b16 %v3534_v47 }
 0x5ab   :  { %3443 = vmatmul.msk.bf16.vlgmr.msrb.gmra.mxu0 %vm174_vm2, %v1156_v49  ;;  %1488 = vmatpush.bf16.msrb.mxu1 %v4734_v22 }
 0x5ac   :  { %v1356_v9 = vpop.f32.mrf.mxu3  ;;  %v1520_v49 = vpack.c.b16 %v1517_v48, %v1517_v48  ;;  %v3554_v48 = vld [vmem:[%s5434_s3 + $0x1b4] sm:$0x3] }
 0x5ad   :  { %v1357_v17 = vadd.f32 %v4282_v27, %v1356_v9 }
 0x5ae   :  { %v1527_v16 = vand.u32 %v1520_v49, %v4194_v6  ;;  %v1586_v49 = vunpack.c.l.b16 %v3554_v48 }
 0x5af   :  { %v1361_v20 = vmax.f32 %v1357_v17, 0.0  ;;  %1489 = vmatpush.bf16.msrb.mxu1 %v4741_v32 }
 0x5b0   :  { %1534 = vmatpush.bf16.msra.mxu3 %v1527_v16  ;;  %v3574_v16 = vld [vmem:[%s5434_s3 + $0x1c8] sm:$0x3] }
 0x5b3   :  { %1490 = vmatpush.bf16.msrb.mxu1 %v4751_v34 }
 0x5b4   :  { %v1358_v19 = vpop.f32.mrf.mxu3  ;;  %1535 = vmatpush.bf16.msra.mxu3 %v4036_v54  ;;  %v4039_v54 = vld [vmem:[%s5434_s3 + $0x1ac] sm:$0xff] }
 0x5b5   :  { %v1359_v21 = vadd.f32 %v4282_v27, %v1358_v19 }
 0x5b7   :  { %v1362_v24 = vmax.f32 %v1359_v21, 0.0  ;;  %1491 = vmatpush.bf16.msrb.mxu1 %v4760_v36 }
 0x5b8   :  { %1536 = vmatpush.bf16.msra.mxu3 %v4035_v59  ;;  %v4041_v59 = vld [vmem:[%s5434_s3 + $0x1b8] sm:$0xff] }
 0x5b9   :  { %v1363_v26 = vpack.c.bf16 %v1362_v24, %v1361_v20 }
 0x5bb   :  { %1286 = vmatmul.bf16.vlgmr.msra.gmra.mxu0 %v4025_v15  ;;  %3503 = vmatmul.msk.bf16.vlgmr.msra.gmra.mxu1 %vm174_vm2, %v1363_v26  ;;  %v3514_v15 = vld [vmem:[%s5434_s3 + $0x18c] sm:$0x3]  ;;  %v4040_v26 = vld [vmem:[%s5436_s0 + $0xb0] sm:$0xff] }
 0x5bc   :  { %1492 = vmatpush.bf16.msrb.mxu1 %v4767_v37  ;;  %v1448_v51 = vunpack.c.l.b16 %v3514_v15  ;;  %1623 = vmatpush.bf16.msrb.mxu3 %v4711_v8 }
 0x5c0   :  { %1624 = vmatpush.bf16.msrb.mxu3 %v4718_v13 }
 0x5c4   :  { %1625 = vmatpush.bf16.msrb.mxu3 %v4726_v18 }
 0x5c8   :  { %1626 = vmatpush.bf16.msrb.mxu3 %v4734_v22 }
 0x5cb   :  { %1493 = vmatmul.bf16.vlgmr.msrb.gmra.mxu1 %v4034_v38 }
 0x5cc   :  { %1627 = vmatpush.bf16.msrb.mxu3 %v4741_v32 }
 0x5d0   :  { %1628 = vmatpush.bf16.msrb.mxu3 %v4751_v34 }
 0x5d4   :  { %1629 = vmatpush.bf16.msrb.mxu3 %v4760_v36 }
 0x5d8   :  { %1630 = vmatpush.bf16.msrb.mxu3 %v4767_v37 }
 0x628   :  { %v1193_v31 = vpop.f32.mrf.mxu0 }
 0x629   :  { %v1198_v27 = vadd.f32 %v1193_v31, %v1129_v43 }
 0x62b   :  { %v4746_v33 = vadd.f32 %v1262_v53, %v1198_v27  ;;  %v1451_v53 = vpack.c.b16 %v1448_v51, %v1448_v51 }
 0x62d   :  { %v1458_v56 = vand.u32 %v1451_v53, %v4194_v6 }
 0x62f   :  { %1465 = vmatpush.bf16.msrb.mxu0 %v1458_v56 }
 0x630   :  { %v4755_v35 = vpop.f32.mrf.mxu0 }
 0x633   :  { %1466 = vmatpush.bf16.msrb.mxu0 %v4033_v58  ;;  %v4038_v58 = vld [vmem:[%s5434_s3 + $0x1a4] sm:$0xff] }
 0x637   :  { %1467 = vmatpush.bf16.msrb.mxu0 %v4032_v60 }
 0x638   :  { %v1287_v41 = vpop.f32.mrf.mxu0  ;;  %v1400_v14 = vpop.f32.mrf.mxu1 }
 0x639   :  { %v1288_v0 = vadd.f32 %v4777_v42, %v1287_v41 }
 0x63b   :  { %v1292_v7 = vmax.f32 %v1288_v0, 0.0  ;;  %1554 = vmatpush.bf16.msra.mxu0 %v4711_v8 }
 0x63f   :  { %1555 = vmatpush.bf16.msra.mxu0 %v4718_v13 }
 0x640   :  { %v1289_v1 = vpop.f32.mrf.mxu0  ;;  %v4795_v55 = vpop.f32.mrf.mxu1 }
 0x641   :  { %v1290_v43 = vadd.f32 %v4777_v42, %v1289_v1 }
 0x643   :  { %v1293_v10 = vmax.f32 %v1290_v43, 0.0  ;;  %1556 = vmatpush.bf16.msra.mxu0 %v4726_v18 }
 0x645   :  { %v1294_v12 = vpack.c.bf16 %v1293_v10, %v1292_v7  ;;  %v4037_v7 = vld [vmem:[%s5436_s0 + $0xa8] sm:$0xff]  ;;  %v232_v10 = vadd.f32 %v4354_v23, %v4309_v50  ;;  %v1589_v23 = vpack.c.b16 %v1586_v49, %v1586_v49 }
 0x647   :  { %3483 = vmatmul.msk.bf16.vlgmr.msrb.gmra.mxu2 %vm174_vm2, %v1294_v12  ;;  %1557 = vmatpush.bf16.msra.mxu0 %v4734_v22  ;;  %v302_v12 = vadd.f32 %v4364_v29, %v232_v10  ;;  %v1655_v29 = vunpack.c.l.b16 %v3574_v16  ;;  %v4048_v16 = vld [vmem:[%s5434_s3 + $0x1e8] sm:$0xff] }
 0x648   :  { %v1494_v61 = vpop.f32.mrf.mxu1 }
 0x649   :  { %v1495_v2 = vadd.f32 %v4777_v42, %v1494_v61  ;;  %v1658_v51 = vpack.c.b16 %v1655_v29, %v1655_v29  ;;  %v4045_v29 = vld [vmem:[%s5434_s3 + $0x1d4] sm:$0xff] }
 0x64b   :  { %v1499_v4 = vmax.f32 %v1495_v2, 0.0  ;;  %1558 = vmatpush.bf16.msra.mxu0 %v4741_v32 }
 0x64f   :  { %1559 = vmatpush.bf16.msra.mxu0 %v4751_v34 }
 0x650   :  { %v1496_v3 = vpop.f32.mrf.mxu1 }
 0x651   :  { %v1497_v9 = vadd.f32 %v4777_v42, %v1496_v3 }
 0x653   :  { %v1500_v17 = vmax.f32 %v1497_v9, 0.0  ;;  %1560 = vmatpush.bf16.msra.mxu0 %v4760_v36 }
 0x655   :  { %v1501_v19 = vpack.c.bf16 %v1500_v17, %v1499_v4 }
 0x657   :  { %1424 = vmatmul.bf16.vlgmr.msra.gmra.mxu2 %v4031_v45  ;;  %3543 = vmatmul.msk.bf16.vlgmr.msra.gmra.mxu3 %vm174_vm2, %v1501_v19  ;;  %v371_v45 = vadd.f32 %v4409_v62, %v302_v12  ;;  %v3614_v12 = vld [vmem:[%s5434_s3 + $0x1f0] sm:$0x3] }
 0x658   :  { %1561 = vmatpush.bf16.msra.mxu0 %v4767_v37 }
 0x667   :  { %1631 = vmatmul.bf16.vlgmr.msrb.gmra.mxu3 %v4040_v26 }
 0x6ca   :  { %v1331_v20 = vpop.f32.mrf.mxu2 }
 0x6cb   :  { %v1336_v21 = vadd.f32 %v1331_v20, %v4746_v33 }
 0x6cd   :  { %v4822_v24 = vadd.f32 %v1400_v14, %v1336_v21  ;;  %v440_v14 = vadd.f32 %v4453_v40, %v371_v45  ;;  %v1596_v40 = vand.u32 %v1589_v23, %v4194_v6  ;;  %v1793_v45 = vunpack.c.l.b16 %v3614_v12 }
 0x6cf   :  { %v509_v47 = vadd.f32 %v4467_v46, %v440_v14  ;;  %1603 = vmatpush.bf16.msrb.mxu2 %v1596_v40  ;;  %v1665_v46 = vand.u32 %v1658_v51, %v4194_v6  ;;  %v1796_v14 = vpack.c.b16 %v1793_v45, %v1793_v45  ;;  %v4044_v40 = vld [vmem:[%s5434_s3 + $0x1cc] sm:$0xff] }
 0x6d1   :  { %v578_v50 = vadd.f32 %v4434_v28, %v509_v47  ;;  %1672 = vmatpush.bf16.msra.mxu1 %v1665_v46  ;;  %v3594_v47 = vld [vmem:[%s5434_s3 + $0x1dc] sm:$0x3]  ;;  %v1803_v48 = vand.u32 %v1796_v14, %v4194_v6 }
 0x6d2   :  { %v4829_v31 = vpop.f32.mrf.mxu2  ;;  %v1724_v49 = vunpack.c.l.b16 %v3594_v47 }
 0x6d3   :  { %v647_v62 = vadd.f32 %v4515_v30, %v578_v50  ;;  %1604 = vmatpush.bf16.msrb.mxu2 %v4039_v54  ;;  %v4042_v30 = vld [vmem:[%s5434_s3 + $0x1c0] sm:$0xff]  ;;  %1810 = vmatpush.bf16.msra.mxu3 %v1803_v48 }
 0x6d5   :  { %v716_v53 = vadd.f32 %v4489_v5, %v647_v62  ;;  %1673 = vmatpush.bf16.msra.mxu1 %v4042_v30  ;;  %v4047_v62 = vld [vmem:[%s5434_s3 + $0x1e0] sm:$0xff] }
 0x6d7   :  { %v785_v28 = vadd.f32 %v4571_v11, %v716_v53  ;;  %1605 = vmatpush.bf16.msrb.mxu2 %v4038_v58  ;;  %1811 = vmatpush.bf16.msra.mxu3 %v4048_v16 }
 0x6d9   :  { %v854_v5 = vadd.f32 %v4540_v52, %v785_v28  ;;  %1674 = vmatpush.bf16.msra.mxu1 %v4041_v59 }
 0x6da   :  { %v1425_v27 = vpop.f32.mrf.mxu2  ;;  %v1538_v15 = vpop.f32.mrf.mxu3 }
 0x6db   :  { %v1426_v33 = vadd.f32 %v4777_v42, %v1425_v27  ;;  %1692 = vmatpush.bf16.msra.mxu2 %v4711_v8  ;;  %v923_v11 = vadd.f32 %v4619_v57, %v854_v5  ;;  %1812 = vmatpush.bf16.msra.mxu3 %v4047_v62 }
 0x6dd   :  { %v1430_v0 = vmax.f32 %v1426_v33, 0.0  ;;  %1761 = vmatpush.bf16.msrb.mxu1 %v4711_v8  ;;  %v992_v61 = vadd.f32 %v4593_v39, %v923_v11  ;;  %v4052_v11 = vld [vmem:[%s5436_s0 + $0xd0] sm:$0xff] }
 0x6df   :  { %1693 = vmatpush.bf16.msra.mxu2 %v4718_v13  ;;  %v1061_v52 = vadd.f32 %v4675_v44, %v992_v61  ;;  %1899 = vmatpush.bf16.msrb.mxu3 %v4711_v8 }
 0x6e1   :  { %1762 = vmatpush.bf16.msrb.mxu1 %v4718_v13  ;;  %v1130_v57 = vadd.f32 %v4644_v25, %v1061_v52 }
 0x6e2   :  { %v1427_v38 = vpop.f32.mrf.mxu2  ;;  %v1540_v56 = vpop.f32.mrf.mxu3 }
 0x6e3   :  { %v1428_v41 = vadd.f32 %v4777_v42, %v1427_v38  ;;  %1694 = vmatpush.bf16.msra.mxu2 %v4726_v18  ;;  %v1199_v39 = vadd.f32 %v4755_v35, %v1130_v57  ;;  %1900 = vmatpush.bf16.msrb.mxu3 %v4718_v13 }
 0x6e5   :  { %v1431_v1 = vmax.f32 %v1428_v41, 0.0  ;;  %1763 = vmatpush.bf16.msrb.mxu1 %v4726_v18  ;;  %v1268_v20 = vadd.f32 %v4697_v63, %v1199_v39 }
 0x6e7   :  { %v1432_v43 = vpack.c.bf16 %v1431_v1, %v1430_v0  ;;  %1695 = vmatpush.bf16.msra.mxu2 %v4734_v22  ;;  %v1337_v25 = vadd.f32 %v4829_v31, %v1268_v20  ;;  %v4046_v31 = vld [vmem:[%s5436_s0 + $0xc0] sm:$0xff]  ;;  %1901 = vmatpush.bf16.msrb.mxu3 %v4726_v18 }
 0x6e9   :  { %3523 = vmatmul.msk.bf16.vlgmr.msrb.gmra.mxu0 %vm174_vm2, %v1432_v43  ;;  %1764 = vmatpush.bf16.msrb.mxu1 %v4734_v22  ;;  %v1406_v35 = vadd.f32 %v4795_v55, %v1337_v25  ;;  %v3654_v25 = vld [vmem:[%s5434_s3 + $0x218] sm:$0x3] }
 0x6ea   :  { %v1632_v60 = vpop.f32.mrf.mxu3 }
 0x6eb   :  { %v1633_v2 = vadd.f32 %v4777_v42, %v1632_v60  ;;  %1696 = vmatpush.bf16.msra.mxu2 %v4741_v32  ;;  %1902 = vmatpush.bf16.msrb.mxu3 %v4734_v22 }
 0x6ed   :  { %v1637_v4 = vmax.f32 %v1633_v2, 0.0  ;;  %1765 = vmatpush.bf16.msrb.mxu1 %v4741_v32 }
 0x6ef   :  { %1697 = vmatpush.bf16.msra.mxu2 %v4751_v34  ;;  %1903 = vmatpush.bf16.msrb.mxu3 %v4741_v32 }
 0x6f1   :  { %1766 = vmatpush.bf16.msrb.mxu1 %v4751_v34 }
 0x6f2   :  { %v1634_v3 = vpop.f32.mrf.mxu3 }
 0x6f3   :  { %v1635_v9 = vadd.f32 %v4777_v42, %v1634_v3  ;;  %1698 = vmatpush.bf16.msra.mxu2 %v4760_v36  ;;  %1904 = vmatpush.bf16.msrb.mxu3 %v4751_v34 }
 0x6f5   :  { %v1638_v17 = vmax.f32 %v1635_v9, 0.0  ;;  %1767 = vmatpush.bf16.msrb.mxu1 %v4760_v36 }
 0x6f7   :  { %v1639_v44 = vpack.c.bf16 %v1638_v17, %v1637_v4  ;;  %1699 = vmatpush.bf16.msra.mxu2 %v4767_v37  ;;  %1905 = vmatpush.bf16.msrb.mxu3 %v4760_v36 }
 0x6f9   :  { %1562 = vmatmul.bf16.vlgmr.msra.gmra.mxu0 %v4037_v7  ;;  %3583 = vmatmul.msk.bf16.vlgmr.msra.gmra.mxu1 %vm174_vm2, %v1639_v44  ;;  %v4043_v7 = vld [vmem:[%s5436_s0 + $0xb8] sm:$0xff]  ;;  %v4049_v44 = vld [vmem:[%s5436_s0 + $0xc8] sm:$0xff] }
 0x6fa   :  { %1768 = vmatpush.bf16.msrb.mxu1 %v4767_v37 }
 0x6fb   :  { %1906 = vmatpush.bf16.msrb.mxu3 %v4767_v37 }
 0x709   :  { %1769 = vmatmul.bf16.vlgmr.msrb.gmra.mxu1 %v4046_v31  ;;  %v4051_v31 = vld [vmem:[%s5434_s3 + $0x1fc] sm:$0xff] }
 0x766   :  { %v1469_v19 = vpop.f32.mrf.mxu0 }
 0x767   :  { %v1474_v21 = vadd.f32 %v1469_v19, %v4822_v24  ;;  %v3634_v19 = vld [vmem:[%s5434_s3 + $0x204] sm:$0x3] }
 0x768   :  { %v1862_v20 = vunpack.c.l.b16 %v3634_v19 }
 0x769   :  { %v4892_v26 = vadd.f32 %v1538_v15, %v1474_v21  ;;  %v1727_v15 = vpack.c.b16 %v1724_v49, %v1724_v49 }
 0x76b   :  { %v1734_v23 = vand.u32 %v1727_v15, %v4194_v6 }
 0x76d   :  { %1741 = vmatpush.bf16.msrb.mxu0 %v1734_v23 }
 0x76e   :  { %v1471_v27 = vpop.f32.mrf.mxu0 }
 0x76f   :  { %v1475_v63 = vadd.f32 %v1471_v27, %v1406_v35  ;;  %v1931_v35 = vunpack.c.l.b16 %v3654_v25 }
 0x771   :  { %v4899_v24 = vadd.f32 %v1540_v56, %v1475_v63  ;;  %1742 = vmatpush.bf16.msrb.mxu0 %v4045_v29  ;;  %v1934_v63 = vpack.c.b16 %v1931_v35, %v1931_v35 }
 0x775   :  { %1743 = vmatpush.bf16.msrb.mxu0 %v4044_v40 }
 0x776   :  { %v1563_v33 = vpop.f32.mrf.mxu0  ;;  %v1676_v10 = vpop.f32.mrf.mxu1 }
 0x777   :  { %v1564_v55 = vadd.f32 %v4777_v42, %v1563_v33 }
 0x779   :  { %v1568_v0 = vmax.f32 %v1564_v55, 0.0  ;;  %1830 = vmatpush.bf16.msra.mxu0 %v4711_v8  ;;  %v4054_v55 = vld [vmem:[%s5434_s3 + $0x210] sm:$0xff] }
 0x77d   :  { %1831 = vmatpush.bf16.msra.mxu0 %v4718_v13 }
 0x77e   :  { %v1565_v38 = vpop.f32.mrf.mxu0  ;;  %v1678_v50 = vpop.f32.mrf.mxu1 }
 0x77f   :  { %v1566_v41 = vadd.f32 %v4777_v42, %v1565_v38  ;;  %v4050_v38 = vld [vmem:[%s5434_s3 + $0x1f4] sm:$0xff] }
 0x781   :  { %v1569_v1 = vmax.f32 %v1566_v41, 0.0  ;;  %1832 = vmatpush.bf16.msra.mxu0 %v4726_v18  ;;  %v4053_v41 = vld [vmem:[%s5434_s3 + $0x208] sm:$0xff] }
 0x783   :  { %v1570_v43 = vpack.c.bf16 %v1569_v1, %v1568_v0 }
 0x785   :  { %3563 = vmatmul.msk.bf16.vlgmr.msrb.gmra.mxu2 %vm174_vm2, %v1570_v43  ;;  %1833 = vmatpush.bf16.msra.mxu0 %v4734_v22 }
 0x786   :  { %v1770_v51 = vpop.f32.mrf.mxu1 }
 0x787   :  { %v1771_v46 = vadd.f32 %v4777_v42, %v1770_v51 }
 0x789   :  { %v1775_v54 = vmax.f32 %v1771_v46, 0.0  ;;  %1834 = vmatpush.bf16.msra.mxu0 %v4741_v32 }
 0x78d   :  { %1835 = vmatpush.bf16.msra.mxu0 %v4751_v34 }
 0x78e   :  { %v1772_v53 = vpop.f32.mrf.mxu1 }
 0x78f   :  { %v1773_v56 = vadd.f32 %v4777_v42, %v1772_v53 }
 0x791   :  { %v1776_v28 = vmax.f32 %v1773_v56, 0.0  ;;  %1836 = vmatpush.bf16.msra.mxu0 %v4760_v36 }
 0x793   :  { %v1777_v30 = vpack.c.bf16 %v1776_v28, %v1775_v54  ;;  %v4055_v54 = vld [vmem:[%s5436_s0 + $0xd8] sm:$0xff]  ;;  %v3694_v28 = vld [vmem:[%s5434_s3 + $0x240] sm:$0x3] }
 0x795   :  { %1700 = vmatmul.bf16.vlgmr.msra.gmra.mxu2 %v4043_v7  ;;  %3623 = vmatmul.msk.bf16.vlgmr.msra.gmra.mxu3 %vm174_vm2, %v1777_v30  ;;  %v2069_v30 = vunpack.c.l.b16 %v3694_v28 }
 0x796   :  { %1837 = vmatpush.bf16.msra.mxu0 %v4767_v37 }
 0x7a5   :  { %1907 = vmatmul.bf16.vlgmr.msrb.gmra.mxu3 %v4052_v11 }
 0x808   :  { %v1607_v58 = vpop.f32.mrf.mxu2 }
 0x809   :  { %v1612_v5 = vadd.f32 %v1607_v58, %v4892_v26  ;;  %v1865_v26 = vpack.c.b16 %v1862_v20, %v1862_v20  ;;  %v2072_v58 = vpack.c.b16 %v2069_v30, %v2069_v30 }
 0x80b   :  { %v1681_v59 = vadd.f32 %v1676_v10, %v1612_v5  ;;  %v1872_v27 = vand.u32 %v1865_v26, %v4194_v6  ;;  %v3674_v5 = vld [vmem:[%s5434_s3 + $0x22c] sm:$0x3] }
 0x80c   :  { %v2000_v11 = vunpack.c.l.b16 %v3674_v5 }
 0x80d   :  { %1879 = vmatpush.bf16.msrb.mxu2 %v1872_v27  ;;  %v4064_v27 = vld [vmem:[%s5436_s0 + $0xf0] sm:$0xff] }
 0x810   :  { %v1609_v60 = vpop.f32.mrf.mxu2 }
 0x811   :  { %v1613_v61 = vadd.f32 %v1609_v60, %v4899_v24  ;;  %v1941_v24 = vand.u32 %v1934_v63, %v4194_v6  ;;  %1880 = vmatpush.bf16.msrb.mxu2 %v4051_v31  ;;  %v2003_v60 = vpack.c.b16 %v2000_v11, %v2000_v11 }
 0x813   :  { %v1682_v52 = vadd.f32 %v1678_v50, %v1613_v61  ;;  %1948 = vmatpush.bf16.msra.mxu1 %v1941_v24  ;;  %v4058_v50 = vld [vmem:[%s5436_s0 + $0xe0] sm:$0xff]  ;;  %v4060_v61 = vld [vmem:[%s5434_s3 + $0x238] sm:$0xff] }
 0x815   :  { %1881 = vmatpush.bf16.msrb.mxu2 %v4050_v38 }
 0x817   :  { %1949 = vmatpush.bf16.msra.mxu1 %v4054_v55 }
 0x818   :  { %v1701_v2 = vpop.f32.mrf.mxu2  ;;  %v1814_v21 = vpop.f32.mrf.mxu3 }
 0x819   :  { %v1702_v3 = vadd.f32 %v4777_v42, %v1701_v2  ;;  %1968 = vmatpush.bf16.msra.mxu2 %v4711_v8  ;;  %v2010_v2 = vand.u32 %v2003_v60, %v4194_v6 }
 0x81b   :  { %v1706_v9 = vmax.f32 %v1702_v3, 0.0  ;;  %1950 = vmatpush.bf16.msra.mxu1 %v4053_v41  ;;  %v4057_v3 = vld [vmem:[%s5434_s3 + $0x224] sm:$0xff] }
 0x81d   :  { %1969 = vmatpush.bf16.msra.mxu2 %v4718_v13 }
 0x81f   :  { %2037 = vmatpush.bf16.msrb.mxu1 %v4711_v8 }
 0x820   :  { %v1703_v57 = vpop.f32.mrf.mxu2  ;;  %v1816_v33 = vpop.f32.mrf.mxu3 }
 0x821   :  { %v1704_v4 = vadd.f32 %v4777_v42, %v1703_v57  ;;  %1970 = vmatpush.bf16.msra.mxu2 %v4726_v18  ;;  %v4059_v57 = vld [vmem:[%s5434_s3 + $0x230] sm:$0xff] }
 0x823   :  { %v1707_v39 = vmax.f32 %v1704_v4, 0.0  ;;  %2038 = vmatpush.bf16.msrb.mxu1 %v4718_v13  ;;  %v4056_v4 = vld [vmem:[%s5434_s3 + $0x21c] sm:$0xff] }
 0x825   :  { %v1708_v17 = vpack.c.bf16 %v1707_v39, %v1706_v9  ;;  %1971 = vmatpush.bf16.msra.mxu2 %v4734_v22 }
 0x827   :  { %3603 = vmatmul.msk.bf16.vlgmr.msrb.gmra.mxu0 %vm174_vm2, %v1708_v17  ;;  %2039 = vmatpush.bf16.msrb.mxu1 %v4726_v18 }
 0x828   :  { %v1908_v0 = vpop.f32.mrf.mxu3  ;;  %2017 = vmatpush.bf16.msrb.mxu0 %v2010_v2 }
 0x829   :  { %v1909_v1 = vadd.f32 %v4777_v42, %v1908_v0  ;;  %1972 = vmatpush.bf16.msra.mxu2 %v4741_v32 }
 0x82b   :  { %v1913_v7 = vmax.f32 %v1909_v1, 0.0  ;;  %2040 = vmatpush.bf16.msrb.mxu1 %v4734_v22 }
 0x82c   :  { %2018 = vmatpush.bf16.msrb.mxu0 %v4057_v3 }
 0x82d   :  { %1973 = vmatpush.bf16.msra.mxu2 %v4751_v34 }
 0x82f   :  { %2041 = vmatpush.bf16.msrb.mxu1 %v4741_v32 }
 0x830   :  { %v1910_v43 = vpop.f32.mrf.mxu3  ;;  %2019 = vmatpush.bf16.msrb.mxu0 %v4056_v4 }
 0x831   :  { %v1911_v10 = vadd.f32 %v4777_v42, %v1910_v43  ;;  %1974 = vmatpush.bf16.msra.mxu2 %v4760_v36 }
 0x833   :  { %v1914_v12 = vmax.f32 %v1911_v10, 0.0  ;;  %2042 = vmatpush.bf16.msrb.mxu1 %v4751_v34  ;;  %v3714_v10 = vld [vmem:[%s5434_s3 + $0x254] sm:$0x3] }
 0x835   :  { %v1915_v45 = vpack.c.bf16 %v1914_v12, %v1913_v7  ;;  %1975 = vmatpush.bf16.msra.mxu2 %v4767_v37  ;;  %v4061_v7 = vld [vmem:[%s5436_s0 + $0xe8] sm:$0xff]  ;;  %v2138_v12 = vunpack.c.l.b16 %v3714_v10 }
 0x837   :  { %1838 = vmatmul.bf16.vlgmr.msra.gmra.mxu0 %v4049_v44  ;;  %3663 = vmatmul.msk.bf16.vlgmr.msra.gmra.mxu1 %vm174_vm2, %v1915_v45 }
 0x838   :  { %2043 = vmatpush.bf16.msrb.mxu1 %v4760_v36  ;;  %2106 = vmatpush.bf16.msra.mxu0 %v4711_v8 }
 0x83c   :  { %2044 = vmatpush.bf16.msrb.mxu1 %v4767_v37  ;;  %2107 = vmatpush.bf16.msra.mxu0 %v4718_v13 }
 0x840   :  { %2108 = vmatpush.bf16.msra.mxu0 %v4726_v18 }
 0x844   :  { %2109 = vmatpush.bf16.msra.mxu0 %v4734_v22 }
 0x847   :  { %2045 = vmatmul.bf16.vlgmr.msrb.gmra.mxu1 %v4058_v50  ;;  %v4063_v50 = vld [vmem:[%s5434_s3 + $0x24c] sm:$0xff] }
 0x848   :  { %2110 = vmatpush.bf16.msra.mxu0 %v4741_v32 }
 0x84c   :  { %2111 = vmatpush.bf16.msra.mxu0 %v4751_v34 }
 0x850   :  { %2112 = vmatpush.bf16.msra.mxu0 %v4760_v36 }
 0x854   :  { %2113 = vmatpush.bf16.msra.mxu0 %v4767_v37 }
 0x8a4   :  { %v1745_v14 = vpop.f32.mrf.mxu0 }
 0x8a5   :  { %v1750_v47 = vadd.f32 %v1745_v14, %v1681_v59  ;;  %v2079_v59 = vand.u32 %v2072_v58, %v4194_v6  ;;  %v3734_v14 = vld [vmem:[%s5434_s3 + $0x268] sm:$0x3] }
 0x8a7   :  { %v1819_v48 = vadd.f32 %v1814_v21, %v1750_v47  ;;  %2086 = vmatpush.bf16.msra.mxu3 %v2079_v59  ;;  %v2141_v47 = vpack.c.b16 %v2138_v12, %v2138_v12 }
 0x8ab   :  { %2087 = vmatpush.bf16.msra.mxu3 %v4060_v61 }
 0x8ac   :  { %v1747_v49 = vpop.f32.mrf.mxu0 }
 0x8ad   :  { %v1751_v15 = vadd.f32 %v1747_v49, %v1682_v52  ;;  %v2148_v49 = vand.u32 %v2141_v47, %v4194_v6 }
 0x8af   :  { %v4999_v16 = vadd.f32 %v1816_v33, %v1751_v15  ;;  %2088 = vmatpush.bf16.msra.mxu3 %v4059_v57 }
 0x8b3   :  { %2175 = vmatpush.bf16.msrb.mxu3 %v4711_v8 }
 0x8b4   :  { %v1839_v23 = vpop.f32.mrf.mxu0  ;;  %v1952_v56 = vpop.f32.mrf.mxu1 }
 0x8b5   :  { %v1840_v29 = vadd.f32 %v4777_v42, %v1839_v23 }
 0x8b7   :  { %v1844_v51 = vmax.f32 %v1840_v29, 0.0  ;;  %2176 = vmatpush.bf16.msrb.mxu3 %v4718_v13  ;;  %v4066_v29 = vld [vmem:[%s5434_s3 + $0x260] sm:$0xff] }
 0x8bb   :  { %2177 = vmatpush.bf16.msrb.mxu3 %v4726_v18 }
 0x8bc   :  { %v1841_v62 = vpop.f32.mrf.mxu0  ;;  %v1954_v52 = vpop.f32.mrf.mxu1 }
 0x8bd   :  { %v1842_v40 = vadd.f32 %v4777_v42, %v1841_v62  ;;  %v4062_v62 = vld [vmem:[%s5434_s3 + $0x244] sm:$0xff] }
 0x8bf   :  { %v1845_v46 = vmax.f32 %v1842_v40, 0.0  ;;  %2178 = vmatpush.bf16.msrb.mxu3 %v4734_v22  ;;  %v4065_v40 = vld [vmem:[%s5434_s3 + $0x258] sm:$0xff] }
 0x8c1   :  { %v1846_v53 = vpack.c.bf16 %v1845_v46, %v1844_v51 }
 0x8c3   :  { %3643 = vmatmul.msk.bf16.vlgmr.msrb.gmra.mxu2 %vm174_vm2, %v1846_v53  ;;  %2179 = vmatpush.bf16.msrb.mxu3 %v4741_v32 }
 0x8c4   :  { %v2046_v9 = vpop.f32.mrf.mxu1  ;;  %2155 = vmatpush.bf16.msrb.mxu2 %v2148_v49  ;;  %v4076_v49 = vld [vmem:[%s5436_s0 + $0x110] sm:$0xff] }
 0x8c5   :  { %v2047_v39 = vadd.f32 %v4777_v42, %v2046_v9 }
 0x8c7   :  { %v2051_v44 = vmax.f32 %v2047_v39, 0.0  ;;  %2180 = vmatpush.bf16.msrb.mxu3 %v4751_v34 }
 0x8c8   :  { %2156 = vmatpush.bf16.msrb.mxu2 %v4063_v50 }
 0x8cb   :  { %2181 = vmatpush.bf16.msrb.mxu3 %v4760_v36 }
 0x8cc   :  { %v2048_v17 = vpop.f32.mrf.mxu1  ;;  %2157 = vmatpush.bf16.msrb.mxu2 %v4062_v62 }
 0x8cd   :  { %v2049_v19 = vadd.f32 %v4777_v42, %v2048_v17 }
 0x8cf   :  { %v2052_v20 = vmax.f32 %v2049_v19, 0.0  ;;  %2182 = vmatpush.bf16.msrb.mxu3 %v4767_v37 }
 0x8d1   :  { %v2053_v21 = vpack.c.bf16 %v2052_v20, %v2051_v44  ;;  %v4067_v44 = vld [vmem:[%s5436_s0 + $0xf8] sm:$0xff]  ;;  %v3774_v20 = vld [vmem:[%s5434_s3 + $0x290] sm:$0x3] }
 0x8d3   :  { %1976 = vmatmul.bf16.vlgmr.msra.gmra.mxu2 %v4055_v54  ;;  %3703 = vmatmul.msk.bf16.vlgmr.msra.gmra.mxu3 %vm174_vm2, %v2053_v21  ;;  %v2345_v21 = vunpack.c.l.b16 %v3774_v20 }
 0x8d4   :  { %2244 = vmatpush.bf16.msra.mxu2 %v4711_v8 }
 0x8d8   :  { %2245 = vmatpush.bf16.msra.mxu2 %v4718_v13 }
 0x8dc   :  { %2246 = vmatpush.bf16.msra.mxu2 %v4726_v18 }
 0x8e0   :  { %2247 = vmatpush.bf16.msra.mxu2 %v4734_v22 }
 0x8e3   :  { %2183 = vmatmul.bf16.vlgmr.msrb.gmra.mxu3 %v4064_v27 }
 0x8e4   :  { %2248 = vmatpush.bf16.msra.mxu2 %v4741_v32 }
 0x8e8   :  { %2249 = vmatpush.bf16.msra.mxu2 %v4751_v34 }
 0x8ec   :  { %2250 = vmatpush.bf16.msra.mxu2 %v4760_v36 }
 0x8f0   :  { %2251 = vmatpush.bf16.msra.mxu2 %v4767_v37 }
 0x946   :  { %v1883_v25 = vpop.f32.mrf.mxu2 }
 0x947   :  { %v1888_v26 = vadd.f32 %v1883_v25, %v1819_v48  ;;  %v2207_v48 = vunpack.c.l.b16 %v3734_v14  ;;  %v2348_v25 = vpack.c.b16 %v2345_v21, %v2345_v21 }
 0x949   :  { %v1957_v35 = vadd.f32 %v1952_v56, %v1888_v26  ;;  %v2210_v15 = vpack.c.b16 %v2207_v48, %v2207_v48  ;;  %v3754_v26 = vld [vmem:[%s5434_s3 + $0x27c] sm:$0x3] }
 0x94a   :  { %v2276_v27 = vunpack.c.l.b16 %v3754_v26 }
 0x94e   :  { %v1885_v63 = vpop.f32.mrf.mxu2 }
 0x94f   :  { %v1889_v24 = vadd.f32 %v1885_v63, %v4999_v16  ;;  %v2217_v16 = vand.u32 %v2210_v15, %v4194_v6  ;;  %v2279_v63 = vpack.c.b16 %v2276_v27, %v2276_v27 }
 0x951   :  { %v1958_v31 = vadd.f32 %v1954_v52, %v1889_v24  ;;  %2224 = vmatpush.bf16.msra.mxu1 %v2217_v16  ;;  %v4070_v52 = vld [vmem:[%s5436_s0 + $0x100] sm:$0xff]  ;;  %v4072_v24 = vld [vmem:[%s5434_s3 + $0x288] sm:$0xff] }
 0x955   :  { %2225 = vmatpush.bf16.msra.mxu1 %v4066_v29 }
 0x956   :  { %v1977_v33 = vpop.f32.mrf.mxu2  ;;  %v2090_v45 = vpop.f32.mrf.mxu3 }
 0x957   :  { %v1978_v55 = vadd.f32 %v4777_v42, %v1977_v33  ;;  %v2286_v33 = vand.u32 %v2279_v63, %v4194_v6  ;;  %v5229_v63 = vld [vmem:[%s5433_s1] sm:$0xff] }
 0x959   :  { %v1982_v0 = vmax.f32 %v1978_v55, 0.0  ;;  %2226 = vmatpush.bf16.msra.mxu1 %v4065_v40  ;;  %v4069_v55 = vld [vmem:[%s5434_s3 + $0x274] sm:$0xff] }
 0x95d   :  { %2313 = vmatpush.bf16.msrb.mxu1 %v4711_v8 }
 0x95e   :  { %v1979_v38 = vpop.f32.mrf.mxu2  ;;  %v2092_v23 = vpop.f32.mrf.mxu3 }
 0x95f   :  { %v1980_v41 = vadd.f32 %v4777_v42, %v1979_v38  ;;  %v4071_v38 = vld [vmem:[%s5434_s3 + $0x280] sm:$0xff] }
 0x961   :  { %v1983_v1 = vmax.f32 %v1980_v41, 0.0  ;;  %2314 = vmatpush.bf16.msrb.mxu1 %v4718_v13  ;;  %v4068_v41 = vld [vmem:[%s5434_s3 + $0x26c] sm:$0xff] }
 0x963   :  { %v1984_v43 = vpack.c.bf16 %v1983_v1, %v1982_v0 }
 0x965   :  { %3683 = vmatmul.msk.bf16.vlgmr.msrb.gmra.mxu0 %vm174_vm2, %v1984_v43  ;;  %2315 = vmatpush.bf16.msrb.mxu1 %v4726_v18 }
 0x966   :  { %v2184_v51 = vpop.f32.mrf.mxu3  ;;  %2293 = vmatpush.bf16.msrb.mxu0 %v2286_v33 }
 0x967   :  { %v2185_v46 = vadd.f32 %v4777_v42, %v2184_v51 }
 0x969   :  { %v2189_v54 = vmax.f32 %v2185_v46, 0.0  ;;  %2316 = vmatpush.bf16.msrb.mxu1 %v4734_v22 }
 0x96a   :  { %2294 = vmatpush.bf16.msrb.mxu0 %v4069_v55 }
 0x96d   :  { %2317 = vmatpush.bf16.msrb.mxu1 %v4741_v32 }
 0x96e   :  { %v2186_v53 = vpop.f32.mrf.mxu3  ;;  %2295 = vmatpush.bf16.msrb.mxu0 %v4068_v41 }
 0x96f   :  { %v2187_v56 = vadd.f32 %v4777_v42, %v2186_v53 }
 0x971   :  { %v2190_v28 = vmax.f32 %v2187_v56, 0.0  ;;  %2318 = vmatpush.bf16.msrb.mxu1 %v4751_v34 }
 0x973   :  { %v2191_v30 = vpack.c.bf16 %v2190_v28, %v2189_v54  ;;  %v4073_v54 = vld [vmem:[%s5436_s0 + $0x108] sm:$0xff] }
 0x975   :  { %2114 = vmatmul.bf16.vlgmr.msra.gmra.mxu0 %v4061_v7  ;;  %3743 = vmatmul.msk.bf16.vlgmr.msra.gmra.mxu1 %vm174_vm2, %v2191_v30  ;;  %v3814_v30 = vld [vmem:[%s5434_s3 + $0x2b8] sm:$0x3] }
 0x976   :  { %2319 = vmatpush.bf16.msrb.mxu1 %v4760_v36  ;;  %2382 = vmatpush.bf16.msra.mxu0 %v4711_v8 }
 0x97a   :  { %2320 = vmatpush.bf16.msrb.mxu1 %v4767_v37  ;;  %2383 = vmatpush.bf16.msra.mxu0 %v4718_v13 }
 0x97e   :  { %2384 = vmatpush.bf16.msra.mxu0 %v4726_v18 }
 0x982   :  { %2385 = vmatpush.bf16.msra.mxu0 %v4734_v22 }
 0x985   :  { %2321 = vmatmul.bf16.vlgmr.msrb.gmra.mxu1 %v4070_v52 }
 0x986   :  { %2386 = vmatpush.bf16.msra.mxu0 %v4741_v32 }
 0x98a   :  { %2387 = vmatpush.bf16.msra.mxu0 %v4751_v34 }
 0x98e   :  { %2388 = vmatpush.bf16.msra.mxu0 %v4760_v36 }
 0x992   :  { %2389 = vmatpush.bf16.msra.mxu0 %v4767_v37 }
 0x9e2   :  { %v2021_v58 = vpop.f32.mrf.mxu0 }
 0x9e3   :  { %v2026_v5 = vadd.f32 %v2021_v58, %v1957_v35  ;;  %v2355_v35 = vand.u32 %v2348_v25, %v4194_v6 }
 0x9e5   :  { %v2095_v59 = vadd.f32 %v2090_v45, %v2026_v5  ;;  %2362 = vmatpush.bf16.msra.mxu3 %v2355_v35  ;;  %v2483_v5 = vunpack.c.l.b16 %v3814_v30  ;;  %v5221_v35 = vld [vmem:[%s5433_s1 + $0x8] sm:$0xff]  ;;  %v5288_v30 = vld [vmem:[%s5433_s1 + $0x10] sm:$0xff] }
 0x9e9   :  { %2363 = vmatpush.bf16.msra.mxu3 %v4072_v24  ;;  %v5239_v24 = vld [vmem:[%s5435_s2] ss:$0 sm:$0xff] }
 0x9ea   :  { %v2023_v11 = vpop.f32.mrf.mxu0 }
 0x9eb   :  { %v2027_v60 = vadd.f32 %v2023_v11, %v1958_v31  ;;  %v2486_v11 = vpack.c.b16 %v2483_v5, %v2483_v5 }
 0x9ed   :  { %v5098_v61 = vadd.f32 %v2092_v23, %v2027_v60  ;;  %2364 = vmatpush.bf16.msra.mxu3 %v4071_v38  ;;  %v2493_v60 = vand.u32 %v2486_v11, %v4194_v6 }
 0x9ef   :  { %2500 = vmatpush.bf16.msra.mxu1 %v2493_v60 }
 0x9f1   :  { %2451 = vmatpush.bf16.msrb.mxu3 %v4711_v8 }
 0x9f2   :  { %v2115_v2 = vpop.f32.mrf.mxu0  ;;  %v2228_v19 = vpop.f32.mrf.mxu1 }
 0x9f3   :  { %v2116_v3 = vadd.f32 %v4777_v42, %v2115_v2  ;;  %v4078_v2 = vld [vmem:[%s5434_s3 + $0x2b0] sm:$0xff] }
 0x9f4   :  { %2501 = vmatpush.bf16.msra.mxu1 %v4078_v2 }
 0x9f5   :  { %v2120_v9 = vmax.f32 %v2116_v3, 0.0  ;;  %2452 = vmatpush.bf16.msrb.mxu3 %v4718_v13  ;;  %v4074_v3 = vld [vmem:[%s5434_s3 + $0x294] sm:$0xff] }
 0x9f9   :  { %2453 = vmatpush.bf16.msrb.mxu3 %v4726_v18 }
 0x9fa   :  { %v2117_v57 = vpop.f32.mrf.mxu0  ;;  %v2230_v31 = vpop.f32.mrf.mxu1 }
 0x9fb   :  { %v2118_v4 = vadd.f32 %v4777_v42, %v2117_v57  ;;  %v4077_v57 = vld [vmem:[%s5434_s3 + $0x2a8] sm:$0xff] }
 0x9fc   :  { %2502 = vmatpush.bf16.msra.mxu1 %v4077_v57 }
 0x9fd   :  { %v2121_v39 = vmax.f32 %v2118_v4, 0.0  ;;  %2454 = vmatpush.bf16.msrb.mxu3 %v4734_v22 }
 0x9ff   :  { %v2122_v17 = vpack.c.bf16 %v2121_v39, %v2120_v9  ;;  %v5184_v9 = vld [vmem:[%s5433_s1 + $0x38] sm:$0xff] }
 0xa00   :  { %2589 = vmatpush.bf16.msrb.mxu1 %v5184_v9 }
 0xa01   :  { %3723 = vmatmul.msk.bf16.vlgmr.msrb.gmra.mxu2 %vm174_vm2, %v2122_v17  ;;  %2455 = vmatpush.bf16.msrb.mxu3 %v4741_v32 }
 0xa02   :  { %v2322_v0 = vpop.f32.mrf.mxu1 }
 0xa03   :  { %v2323_v1 = vadd.f32 %v4777_v42, %v2322_v0 }
 0xa04   :  { %2590 = vmatpush.bf16.msrb.mxu1 %v4718_v13 }
 0xa05   :  { %v2327_v7 = vmax.f32 %v2323_v1, 0.0  ;;  %2456 = vmatpush.bf16.msrb.mxu3 %v4751_v34  ;;  %v4079_v1 = vld [vmem:[%s5436_s0 + $0x118] sm:$0xff] }
 0xa09   :  { %2457 = vmatpush.bf16.msrb.mxu3 %v4760_v36 }
 0xa0a   :  { %v2324_v43 = vpop.f32.mrf.mxu1 }
 0xa0b   :  { %v2325_v10 = vadd.f32 %v4777_v42, %v2324_v43 }
 0xa0d   :  { %v2328_v12 = vmax.f32 %v2325_v10, 0.0  ;;  %2458 = vmatpush.bf16.msrb.mxu3 %v4767_v37  ;;  %v3794_v37 = vld [vmem:[%s5434_s3 + $0x2a4] sm:$0x3] }
 0xa0e   :  { %v2414_v56 = vunpack.c.l.b16 %v3794_v37 }
 0xa0f   :  { %v2329_v45 = vpack.c.bf16 %v2328_v12, %v2327_v7  ;;  %v3854_v7 = vld [vmem:[%s5434_s3 + $0x2e0] sm:$0x3] }
 0xa10   :  { %v2417_v58 = vpack.c.b16 %v2414_v56, %v2414_v56  ;;  %v2621_v10 = vunpack.c.l.b16 %v3854_v7 }
 0xa11   :  { %2252 = vmatmul.bf16.vlgmr.msra.gmra.mxu2 %v4067_v44  ;;  %3783 = vmatmul.msk.bf16.vlgmr.msra.gmra.mxu3 %vm174_vm2, %v2329_v45  ;;  %v3834_v45 = vld [vmem:[%s5434_s3 + $0x2cc] sm:$0x3] }
 0xa12   :  { %v2624_v12 = vpack.c.b16 %v2621_v10, %v2621_v10 }
 0xa21   :  { %2459 = vmatmul.bf16.vlgmr.msrb.gmra.mxu3 %v4076_v49  ;;  %v4084_v49 = vld [vmem:[%s5434_s3 + $0x2d8] sm:$0xff] }
 0xa84   :  { %v2159_v14 = vpop.f32.mrf.mxu2 }
 0xa85   :  { %v2164_v47 = vadd.f32 %v2159_v14, %v2095_v59  ;;  %v2424_v59 = vand.u32 %v2417_v58, %v4194_v6  ;;  %v2631_v14 = vand.u32 %v2624_v12, %v4194_v6 }
 0xa87   :  { %v2233_v48 = vadd.f32 %v2228_v19, %v2164_v47  ;;  %2431 = vmatpush.bf16.msrb.mxu2 %v2424_v59  ;;  %v2552_v47 = vunpack.c.l.b16 %v3834_v45  ;;  %2638 = vmatpush.bf16.msra.mxu3 %v2631_v14  ;;  %v4088_v59 = vld [vmem:[%s5436_s0 + $0x130] sm:$0xff] }
 0xa8b   :  { %2639 = vmatpush.bf16.msra.mxu3 %v4084_v49 }
 0xa8c   :  { %v2161_v15 = vpop.f32.mrf.mxu2 }
 0xa8d   :  { %v2165_v16 = vadd.f32 %v2161_v15, %v5098_v61  ;;  %v4075_v61 = vld [vmem:[%s5434_s3 + $0x29c] sm:$0xff] }
 0xa8e   :  { %2432 = vmatpush.bf16.msrb.mxu2 %v4075_v61 }
 0xa8f   :  { %v2234_v50 = vadd.f32 %v2230_v31, %v2165_v16 }
 0xa92   :  { %2433 = vmatpush.bf16.msrb.mxu2 %v4074_v3 }
 0xa94   :  { %v2253_v23 = vpop.f32.mrf.mxu2  ;;  %v2366_v28 = vpop.f32.mrf.mxu3 }
 0xa95   :  { %v2254_v29 = vadd.f32 %v4777_v42, %v2253_v23  ;;  %v4083_v23 = vld [vmem:[%s5434_s3 + $0x2d0] sm:$0xff] }
 0xa96   :  { %2520 = vmatpush.bf16.msra.mxu2 %v4711_v8  ;;  %v5194_v8 = vld [vmem:[%s5433_s1 + $0x28] sm:$0xff]  ;;  %2640 = vmatpush.bf16.msra.mxu3 %v4083_v23 }
 0xa97   :  { %v2258_v51 = vmax.f32 %v2254_v29, 0.0  ;;  %2591 = vmatpush.bf16.msrb.mxu1 %v5194_v8  ;;  %v4080_v29 = vld [vmem:[%s5434_s3 + $0x2bc] sm:$0xff] }
 0xa9a   :  { %2521 = vmatpush.bf16.msra.mxu2 %v4718_v13  ;;  %v5202_v13 = vld [vmem:[%s5433_s1 + $0x20] sm:$0xff]  ;;  %2727 = vmatpush.bf16.msrb.mxu3 %v5184_v9 }
 0xa9b   :  { %2592 = vmatpush.bf16.msrb.mxu1 %v5202_v13 }
 0xa9c   :  { %v2255_v62 = vpop.f32.mrf.mxu2  ;;  %v2368_v52 = vpop.f32.mrf.mxu3 }
 0xa9d   :  { %v2256_v40 = vadd.f32 %v4777_v42, %v2255_v62 }
 0xa9e   :  { %2522 = vmatpush.bf16.msra.mxu2 %v4726_v18 }
 0xa9f   :  { %v2259_v46 = vmax.f32 %v2256_v40, 0.0  ;;  %v5272_v40 = vld [vmem:[%s5433_s1 + $0x30] sm:$0xff] }
 0xaa0   :  { %2728 = vmatpush.bf16.msrb.mxu3 %v5272_v40 }
 0xaa1   :  { %v2260_v53 = vpack.c.bf16 %v2259_v46, %v2258_v51 }
 0xaa2   :  { %2523 = vmatpush.bf16.msra.mxu2 %v4734_v22 }
 0xaa3   :  { %3763 = vmatmul.msk.bf16.vlgmr.msrb.gmra.mxu0 %vm174_vm2, %v2260_v53 }
 0xaa4   :  { %v2460_v4 = vpop.f32.mrf.mxu3  ;;  %2729 = vmatpush.bf16.msrb.mxu3 %v5194_v8 }
 0xaa5   :  { %v2461_v39 = vadd.f32 %v4777_v42, %v2460_v4 }
 0xaa6   :  { %2524 = vmatpush.bf16.msra.mxu2 %v4741_v32 }
 0xaa7   :  { %v2465_v44 = vmax.f32 %v2461_v39, 0.0 }
 0xaa8   :  { %2730 = vmatpush.bf16.msrb.mxu3 %v5202_v13 }
 0xaaa   :  { %2525 = vmatpush.bf16.msra.mxu2 %v4751_v34 }
 0xaac   :  { %v2462_v17 = vpop.f32.mrf.mxu3 }
 0xaad   :  { %v2463_v19 = vadd.f32 %v4777_v42, %v2462_v17  ;;  %v5210_v42 = vld [vmem:[%s5433_s1 + $0x18] sm:$0xff] }
 0xaae   :  { %2593 = vmatpush.bf16.msrb.mxu1 %v5210_v42  ;;  %2526 = vmatpush.bf16.msra.mxu2 %v4760_v36 }
 0xaaf   :  { %v2466_v20 = vmax.f32 %v2463_v19, 0.0  ;;  %2731 = vmatpush.bf16.msrb.mxu3 %v5210_v42  ;;  %v3874_v19 = vld [vmem:[%s5434_s3 + $0x2f4] sm:$0x3] }
 0xab1   :  { %v2467_v18 = vpack.c.bf16 %v2466_v20, %v2465_v44  ;;  %v4085_v44 = vld [vmem:[%s5436_s0 + $0x128] sm:$0xff]  ;;  %v2690_v20 = vunpack.c.l.b16 %v3874_v19  ;;  %v4095_v19 = vld [vmem:[%s5434_s3 + $0x320] sm:$0xff] }
 0xab2   :  { %2594 = vmatpush.bf16.msrb.mxu1 %v4751_v34  ;;  %2527 = vmatpush.bf16.msra.mxu2 %v5229_v63  ;;  %v4082_v34 = vld [vmem:[%s5436_s0 + $0x120] sm:$0xff] }
 0xab3   :  { %2390 = vmatmul.bf16.vlgmr.msra.gmra.mxu0 %v4073_v54  ;;  %3823 = vmatmul.msk.bf16.vlgmr.msra.gmra.mxu1 %vm174_vm2, %v2467_v18 }
 0xab4   :  { %2732 = vmatpush.bf16.msrb.mxu3 %v5288_v30 }
 0xab6   :  { %2595 = vmatpush.bf16.msrb.mxu1 %v5221_v35 }
 0xab8   :  { %2733 = vmatpush.bf16.msrb.mxu3 %v5221_v35 }
 0xaba   :  { %2596 = vmatpush.bf16.msrb.mxu1 %v5229_v63 }
 0xabc   :  { %2734 = vmatpush.bf16.msrb.mxu3 %v5229_v63 }
 0xac3   :  { %2597 = vmatmul.bf16.vlgmr.msrb.gmra.mxu1 %v4082_v34  ;;  %v4087_v34 = vld [vmem:[%s5434_s3 + $0x2ec] sm:$0xff] }
 0xb20   :  { %v2297_v21 = vpop.f32.mrf.mxu0 }
 0xb21   :  { %v2302_v25 = vadd.f32 %v2297_v21, %v2233_v48  ;;  %v2555_v48 = vpack.c.b16 %v2552_v47, %v2552_v47  ;;  %v3894_v21 = vld [vmem:[%s5434_s3 + $0x308] sm:$0x3] }
 0xb23   :  { %v5213_v22 = vadd.f32 %v2366_v28, %v2302_v25  ;;  %v2562_v16 = vand.u32 %v2555_v48, %v4194_v6  ;;  %v2693_v25 = vpack.c.b16 %v2690_v20, %v2690_v20 }
 0xb25   :  { %2569 = vmatpush.bf16.msrb.mxu0 %v2562_v16 }
 0xb28   :  { %v2299_v26 = vpop.f32.mrf.mxu0 }
 0xb29   :  { %v2303_v32 = vadd.f32 %v2299_v26, %v2234_v50  ;;  %v4081_v50 = vld [vmem:[%s5434_s3 + $0x2c4] sm:$0xff]  ;;  %v2700_v26 = vand.u32 %v2693_v25, %v4194_v6 }
 0xb2a   :  { %2570 = vmatpush.bf16.msrb.mxu0 %v4081_v50 }
 0xb2b   :  { %v5224_v27 = vadd.f32 %v2368_v52, %v2303_v32 }
 0xb2e   :  { %2571 = vmatpush.bf16.msrb.mxu0 %v4080_v29 }
 0xb30   :  { %v2391_v36 = vpop.f32.mrf.mxu0  ;;  %v2504_v43 = vpop.f32.mrf.mxu1 }
 0xb31   :  { %v2392_v31 = vadd.f32 %v5239_v24, %v2391_v36 }
 0xb32   :  { %2658 = vmatpush.bf16.msra.mxu0 %v5184_v9 }
 0xb33   :  { %v2396_v38 = vmax.f32 %v2392_v31, 0.0  ;;  %v4090_v31 = vld [vmem:[%s5434_s3 + $0x300] sm:$0xff] }
 0xb36   :  { %2659 = vmatpush.bf16.msra.mxu0 %v5272_v40 }
 0xb38   :  { %v2393_v33 = vpop.f32.mrf.mxu0  ;;  %v2506_v15 = vpop.f32.mrf.mxu1 }
 0xb39   :  { %v2394_v55 = vadd.f32 %v5239_v24, %v2393_v33  ;;  %v4086_v33 = vld [vmem:[%s5434_s3 + $0x2e4] sm:$0xff] }
 0xb3a   :  { %2660 = vmatpush.bf16.msra.mxu0 %v5194_v8 }
 0xb3b   :  { %v2397_v41 = vmax.f32 %v2394_v55, 0.0  ;;  %v4089_v55 = vld [vmem:[%s5434_s3 + $0x2f8] sm:$0xff] }
 0xb3d   :  { %v2398_v0 = vpack.c.bf16 %v2397_v41, %v2396_v38 }
 0xb3e   :  { %2661 = vmatpush.bf16.msra.mxu0 %v5202_v13 }
 0xb3f   :  { %3803 = vmatmul.msk.bf16.vlgmr.msrb.gmra.mxu2 %vm174_vm2, %v2398_v0 }
 0xb40   :  { %v2598_v62 = vpop.f32.mrf.mxu1  ;;  %2707 = vmatpush.bf16.msrb.mxu2 %v2700_v26 }
 0xb41   :  { %v2599_v51 = vadd.f32 %v5239_v24, %v2598_v62 }
 0xb42   :  { %2662 = vmatpush.bf16.msra.mxu0 %v5210_v42 }
 0xb43   :  { %v2603_v53 = vmax.f32 %v2599_v51, 0.0 }
 0xb44   :  { %2708 = vmatpush.bf16.msrb.mxu2 %v4087_v34 }
 0xb46   :  { %2663 = vmatpush.bf16.msra.mxu0 %v5288_v30 }
 0xb48   :  { %v2600_v46 = vpop.f32.mrf.mxu1  ;;  %2709 = vmatpush.bf16.msrb.mxu2 %v4086_v33 }
 0xb49   :  { %v2601_v54 = vadd.f32 %v5239_v24, %v2600_v46 }
 0xb4a   :  { %2664 = vmatpush.bf16.msra.mxu0 %v5221_v35 }
 0xb4b   :  { %v2604_v37 = vmax.f32 %v2601_v54, 0.0 }
 0xb4d   :  { %v2605_v56 = vpack.c.bf16 %v2604_v37, %v2603_v53  ;;  %v4091_v53 = vld [vmem:[%s5436_s0 + $0x138] sm:$0xff] }
 0xb4e   :  { %2665 = vmatpush.bf16.msra.mxu0 %v5229_v63  ;;  %v3914_v37 = vld [vmem:[%s5434_s3 + $0x31c] sm:$0x3] }
 0xb4f   :  { %2528 = vmatmul.bf16.vlgmr.msra.gmra.mxu2 %v4079_v1  ;;  %3863 = vmatmul.msk.bf16.vlgmr.msra.gmra.mxu3 %vm174_vm2, %v2605_v56  ;;  %v2828_v56 = vunpack.c.l.b16 %v3914_v37 }
 0xb50   :  { %2796 = vmatpush.bf16.msra.mxu2 %v5184_v9 }
 0xb54   :  { %2797 = vmatpush.bf16.msra.mxu2 %v5272_v40 }
 0xb58   :  { %2798 = vmatpush.bf16.msra.mxu2 %v5194_v8 }
 0xb5c   :  { %2799 = vmatpush.bf16.msra.mxu2 %v5202_v13 }
 0xb5f   :  { %2735 = vmatmul.bf16.vlgmr.msrb.gmra.mxu3 %v4088_v59  ;;  %v4093_v59 = vld [vmem:[%s5434_s3 + $0x314] sm:$0xff] }
 0xb60   :  { %2800 = vmatpush.bf16.msra.mxu2 %v5210_v42 }
 0xb64   :  { %2801 = vmatpush.bf16.msra.mxu2 %v5288_v30 }
 0xb68   :  { %2802 = vmatpush.bf16.msra.mxu2 %v5221_v35 }
 0xb6c   :  { %2803 = vmatpush.bf16.msra.mxu2 %v5229_v63 }
 0xbc2   :  { %v2435_v28 = vpop.f32.mrf.mxu2 }
 0xbc3   :  { %v2440_v58 = vadd.f32 %v2435_v28, %v5213_v22  ;;  %v2759_v22 = vunpack.c.l.b16 %v3894_v21  ;;  %v2831_v28 = vpack.c.b16 %v2828_v56, %v2828_v56 }
 0xbc5   :  { %v2509_v5 = vadd.f32 %v2504_v43, %v2440_v58  ;;  %v2762_v32 = vpack.c.b16 %v2759_v22, %v2759_v22 }
 0xbca   :  { %v2437_v11 = vpop.f32.mrf.mxu2 }
 0xbcb   :  { %v2441_v60 = vadd.f32 %v2437_v11, %v5224_v27  ;;  %v2769_v27 = vand.u32 %v2762_v32, %v4194_v6  ;;  %v3934_v11 = vld [vmem:[%s5434_s3 + $0x330] sm:$0x3] }
 0xbcd   :  { %v2510_v61 = vadd.f32 %v2506_v15, %v2441_v60  ;;  %2776 = vmatpush.bf16.msra.mxu1 %v2769_v27  ;;  %v4094_v15 = vld [vmem:[%s5436_s0 + $0x140] sm:$0xff]  ;;  %v2897_v60 = vunpack.c.l.b16 %v3934_v11  ;;  %v12_v11 = vstv %s5439_s6  ;;  %s4138_s6 = smov 7  }
 0xbce   :  { %13 = vst [vmem:[#allocation2] sm:$0x1] %v12_v11 }
 0xbd1   :  { %2777 = vmatpush.bf16.msra.mxu1 %v4090_v31 }
 0xbd2   :  { %v2529_v52 = vpop.f32.mrf.mxu2  ;;  %v2642_v18 = vpop.f32.mrf.mxu3 }
 0xbd3   :  { %v2530_v2 = vadd.f32 %v5239_v24, %v2529_v52 }
 0xbd5   :  { %v2534_v4 = vmax.f32 %v2530_v2, 0.0  ;;  %2778 = vmatpush.bf16.msra.mxu1 %v4089_v55  ;;  %v2900_v2 = vpack.c.b16 %v2897_v60, %v2897_v60  ;;  %v4099_v55 = vld [vmem:[%s5434_s3 + $0x33c] sm:$0xff] }
 0xbd9   :  { %2865 = vmatpush.bf16.msrb.mxu1 %v5184_v9 }
 0xbda   :  { %v2531_v3 = vpop.f32.mrf.mxu2  ;;  %v2644_v36 = vpop.f32.mrf.mxu3 }
 0xbdb   :  { %v2532_v57 = vadd.f32 %v5239_v24, %v2531_v3  ;;  %v2907_v3 = vand.u32 %v2900_v2, %v4194_v6 }
 0xbdd   :  { %v2535_v39 = vmax.f32 %v2532_v57, 0.0  ;;  %2866 = vmatpush.bf16.msrb.mxu1 %v5272_v40  ;;  %2914 = vmatpush.bf16.msra.mxu3 %v2907_v3 }
 0xbdf   :  { %v2536_v17 = vpack.c.bf16 %v2535_v39, %v2534_v4  ;;  %v4096_v4 = vld [vmem:[%s5434_s3 + $0x328] sm:$0xff] }
 0xbe1   :  { %3843 = vmatmul.msk.bf16.vlgmr.msrb.gmra.mxu0 %vm174_vm2, %v2536_v17  ;;  %2867 = vmatpush.bf16.msrb.mxu1 %v5194_v8 }
 0xbe2   :  { %v2736_v38 = vpop.f32.mrf.mxu3  ;;  %2915 = vmatpush.bf16.msra.mxu3 %v4096_v4 }
 0xbe3   :  { %v2737_v41 = vadd.f32 %v5239_v24, %v2736_v38  ;;  %v4098_v38 = vld [vmem:[%s5434_s3 + $0x334] sm:$0xff] }
 0xbe5   :  { %v2741_v1 = vmax.f32 %v2737_v41, 0.0  ;;  %2868 = vmatpush.bf16.msrb.mxu1 %v5202_v13 }
 0xbe6   :  { %2916 = vmatpush.bf16.msra.mxu3 %v4095_v19 }
 0xbe9   :  { %2869 = vmatpush.bf16.msrb.mxu1 %v5210_v42 }
 0xbea   :  { %v2738_v0 = vpop.f32.mrf.mxu3 }
 0xbeb   :  { %v2739_v43 = vadd.f32 %v5239_v24, %v2738_v0 }
 0xbed   :  { %v2742_v7 = vmax.f32 %v2739_v43, 0.0  ;;  %2870 = vmatpush.bf16.msrb.mxu1 %v5288_v30 }
 0xbef   :  { %v2743_v10 = vpack.c.bf16 %v2742_v7, %v2741_v1 }
 0xbf1   :  { %2666 = vmatmul.bf16.vlgmr.msra.gmra.mxu0 %v4085_v44  ;;  %3903 = vmatmul.msk.bf16.vlgmr.msra.gmra.mxu1 %vm174_vm2, %v2743_v10 }
 0xbf2   :  { %2871 = vmatpush.bf16.msrb.mxu1 %v5221_v35 }
 0xbf6   :  { %2872 = vmatpush.bf16.msrb.mxu1 %v5229_v63 }
 0xc01   :  { %2873 = vmatmul.bf16.vlgmr.msrb.gmra.mxu1 %v4094_v15  ;;  %v3003_v15 = vld [vmem:[%s5438_s5 + $0x8] sm:$0xff] }
 0xc5e   :  { %v2573_v12 = vpop.f32.mrf.mxu0 }
 0xc5f   :  { %v2578_v45 = vadd.f32 %v2573_v12, %v2509_v5  ;;  %v2838_v5 = vand.u32 %v2831_v28, %v4194_v6 }
 0xc61   :  { %v2647_v14 = vadd.f32 %v2642_v18, %v2578_v45  ;;  %2845 = vmatpush.bf16.msrb.mxu0 %v2838_v5 }
 0xc65   :  { %2846 = vmatpush.bf16.msrb.mxu0 %v4093_v59 }
 0xc66   :  { %v2575_v47 = vpop.f32.mrf.mxu0 }
 0xc67   :  { %v2579_v48 = vadd.f32 %v2575_v47, %v2510_v61  ;;  %v4092_v61 = vld [vmem:[%s5434_s3 + $0x30c] sm:$0xff] }
 0xc69   :  { %v2648_v49 = vadd.f32 %v2644_v36, %v2579_v48  ;;  %2847 = vmatpush.bf16.msrb.mxu0 %v4092_v61  ;;  %v3005_v48 = vld [vmem:[%s5438_s5 + $0x18] sm:$0xff] }
 0xc6a   :  { %3029 = vmatpush.msrb.mxu3 %v3005_v48 }
 0xc6d   :  { %2934 = vmatpush.bf16.msra.mxu0 %v5184_v9 }
 0xc6e   :  { %v2667_v16 = vpop.f32.mrf.mxu0  ;;  %v2780_v54 = vpop.f32.mrf.mxu1 }
 0xc6f   :  { %v2668_v50 = vadd.f32 %v5239_v24, %v2667_v16 }
 0xc71   :  { %v2672_v62 = vmax.f32 %v2668_v50, 0.0  ;;  %2935 = vmatpush.bf16.msra.mxu0 %v5272_v40 }
 0xc75   :  { %2936 = vmatpush.bf16.msra.mxu0 %v5194_v8 }
 0xc76   :  { %v2669_v23 = vpop.f32.mrf.mxu0  ;;  %v2782_v58 = vpop.f32.mrf.mxu1 }
 0xc77   :  { %v2670_v29 = vadd.f32 %v5239_v24, %v2669_v23  ;;  %v4104_v23 = vld [vmem:[%s5437_s4] ss:$0 sm:$0xff] }
 0xc79   :  { %v2673_v51 = vmax.f32 %v2670_v29, 0.0  ;;  %2937 = vmatpush.bf16.msra.mxu0 %v5202_v13 }
 0xc7b   :  { %v2674_v46 = vpack.c.bf16 %v2673_v51, %v2672_v62 }
 0xc7d   :  { %3883 = vmatmul.msk.bf16.vlgmr.msrb.gmra.mxu2 %vm174_vm2, %v2674_v46  ;;  %2938 = vmatpush.bf16.msra.mxu0 %v5210_v42 }
 0xc7e   :  { %v2874_v52 = vpop.f32.mrf.mxu1 }
 0xc7f   :  { %v2875_v57 = vadd.f32 %v5239_v24, %v2874_v52 }
 0xc81   :  { %v2879_v17 = vmax.f32 %v2875_v57, 0.0  ;;  %2939 = vmatpush.bf16.msra.mxu0 %v5288_v30  ;;  %v4097_v30 = vld [vmem:[%s5436_s0 + $0x148] sm:$0xff] }
 0xc85   :  { %2940 = vmatpush.bf16.msra.mxu0 %v5221_v35  ;;  %v3954_v35 = vld [vmem:[%s5434_s3 + $0x344] sm:$0x3] }
 0xc86   :  { %v2876_v39 = vpop.f32.mrf.mxu1 }
 0xc87   :  { %v2877_v44 = vadd.f32 %v5239_v24, %v2876_v39 }
 0xc89   :  { %v2880_v20 = vmax.f32 %v2877_v44, 0.0  ;;  %2941 = vmatpush.bf16.msra.mxu0 %v5229_v63  ;;  %v2966_v63 = vunpack.c.l.b16 %v3954_v35 }
 0xc8b   :  { %v2881_v9 = vpack.c.bf16 %v2880_v20, %v2879_v17  ;;  %v2969_v31 = vpack.c.b16 %v2966_v63, %v2966_v63 }
 0xc8d   :  { %2804 = vmatmul.bf16.vlgmr.msra.gmra.mxu2 %v4091_v53  ;;  %3943 = vmatmul.msk.bf16.vlgmr.msra.gmra.mxu3 %vm174_vm2, %v2881_v9  ;;  %v2976_v33 = vand.u32 %v2969_v31, %v4194_v6  ;;  %v4105_v9 = vld [vmem:[#allocation2] ss:$0 sm:$0xff] }
 0xc8f   :  { %2983 = vmatpush.bf16.msrb.mxu2 %v2976_v33 }
 0xc93   :  { %2984 = vmatpush.bf16.msrb.mxu2 %v4099_v55 }
 0xc97   :  { %2985 = vmatpush.bf16.msrb.mxu2 %v4098_v38 }
 0xd00   :  { %v2711_v18 = vpop.f32.mrf.mxu2 }
 0xd01   :  { %v2716_v40 = vadd.f32 %v2711_v18, %v2647_v14 }
 0xd03   :  { %v2785_v21 = vadd.f32 %v2780_v54, %v2716_v40 }
 0xd08   :  { %v2713_v25 = vpop.f32.mrf.mxu2 }
 0xd09   :  { %v2717_v22 = vadd.f32 %v2713_v25, %v2648_v49  ;;  %v3004_v49 = vld [vmem:[%s5438_s5 + $0x10] sm:$0xff] }
 0xd0a   :  { %3030 = vmatpush.msrb.mxu3 %v3004_v49 }
 0xd0b   :  { %v2786_v26 = vadd.f32 %v2782_v58, %v2717_v22 }
 0xd0c   :  { %3031 = vmatpush.msrb.mxu3 %v3003_v15 }
 0xd10   :  { %v2805_v8 = vpop.f32.mrf.mxu2  ;;  %v2918_v16 = vpop.f32.mrf.mxu3 }
 0xd11   :  { %v2806_v32 = vadd.f32 %v5239_v24, %v2805_v8 }
 0xd13   :  { %v2810_v34 = vmax.f32 %v2806_v32, 0.0 }
 0xd18   :  { %v2807_v27 = vpop.f32.mrf.mxu2  ;;  %v2920_v46 = vpop.f32.mrf.mxu3 }
 0xd19   :  { %v2808_v13 = vadd.f32 %v5239_v24, %v2807_v27 }
 0xd1b   :  { %v2811_v36 = vmax.f32 %v2808_v13, 0.0 }
 0xd1d   :  { %v2812_v42 = vpack.c.bf16 %v2811_v36, %v2810_v34 }
 0xd1f   :  { %3923 = vmatmul.msk.bf16.vlgmr.msrb.gmra.mxu0 %vm174_vm2, %v2812_v42 }
 0xd2f   :  { %2942 = vmatmul.bf16.vlgmr.msra.gmra.mxu0 %v4097_v30 }
 0xd9c   :  { %v2849_v41 = vpop.f32.mrf.mxu0 }
 0xd9d   :  { %v2854_v0 = vadd.f32 %v2849_v41, %v2785_v21 }
 0xd9f   :  { %v2923_v50 = vadd.f32 %v2918_v16, %v2854_v0 }
 0xda4   :  { %v2851_v1 = vpop.f32.mrf.mxu0 }
 0xda5   :  { %v2855_v43 = vadd.f32 %v2851_v1, %v2786_v26 }
 0xda7   :  { %v2924_v37 = vadd.f32 %v2920_v46, %v2855_v43 }
 0xdac   :  { %v2943_v7 = vpop.f32.mrf.mxu0 }
 0xdad   :  { %v2944_v10 = vadd.f32 %v5239_v24, %v2943_v7 }
 0xdaf   :  { %v2948_v45 = vmax.f32 %v2944_v10, 0.0 }
 0xdb4   :  { %v2945_v12 = vpop.f32.mrf.mxu0 }
 0xdb5   :  { %v2946_v6 = vadd.f32 %v5239_v24, %v2945_v12  ;;  %v3002_v24 = vld [vmem:[%s5438_s5] sm:$0xff] }
 0xdb6   :  { %3032 = vmatpush.msrb.mxu3 %v3002_v24 }
 0xdb7   :  { %v2949_v14 = vmax.f32 %v2946_v6, 0.0 }
 0xdb9   :  { %v2950_v47 = vpack.c.bf16 %v2949_v14, %v2948_v45 }
 0xdbb   :  { %3963 = vmatmul.msk.bf16.vlgmr.msrb.gmra.mxu2 %vm174_vm2, %v2950_v47 }
 0xe3e   :  { %v2987_v29 = vpop.f32.mrf.mxu2 }
 0xe3f   :  { %v2992_v62 = vadd.f32 %v2987_v29, %v2923_v50 }
 0xe41   :  { %v2998_v51 = vadd.f32 %v4104_v23, %v2992_v62 }
 0xe43   :  { %v3000_v53 = vmax.f32 %v2998_v51, 0.0  ;;  %v3043_v54 = vsel %vm3042_vm3, %v2998_v51, -inf }
 0xe44   :  { %3044 = vmax.xlane.f32.xlu0 %v3043_v54 }
 0xe45   :  { %3964 = vmatmul.msk.f32.vlgmr.msrb.gmra.mxu3 %vm3010_vm4, %v3000_v53 }
 0xe46   :  { %v2989_v56 = vpop.f32.mrf.mxu2 }
 0xe47   :  { %v2993_v28 = vadd.f32 %v2989_v56, %v2924_v37 }
 0xe49   :  { %v2999_v58 = vadd.f32 %v4104_v23, %v2993_v28 }
 0xe4b   :  { %v3001_v5 = vmax.f32 %v2999_v58, 0.0  ;;  %v3046_v59 = vsel %vm3042_vm3, %v2999_v58, -inf }
 0xe4c   :  { %3047 = vmax.xlane.f32.xlu0 %v3046_v59 }
 0xe4d   :  { %3965 = vmatmul.msk.f32.gmra.mxu3 %vm3010_vm4, %v3001_v5 }
 0xeb7   :  { %v3045_v60 = vpop.xlane.xlu0 %3044 }
 0xeb8   :  { %v3049_v61 = vsub.f32 %v2998_v51, %v3045_v60 }
 0xeba   :  { %v3051_v52 = vmul.f32 1.442695, %v3049_v61 }
 0xebc   :  { %4106 = vpow2.f32 %v3051_v52 }
 0xebf   :  { %v3048_v2 = vpop.xlane.xlu0 %3047 }
 0xec0   :  { %v3050_v3 = vsub.f32 %v2999_v58, %v3048_v2 }
 0xec2   :  { %v4107_v57 = vpop.eup %4106  ;;  %v3053_v4 = vmul.f32 1.442695, %v3050_v3 }
 0xec3   :  { %3057 = vrot.lane.b32.xlu1 %v4107_v57, %s4137_s26 }
 0xec4   :  { %4108 = vpow2.f32 %v3053_v4 }
 0xec8   :  { %v3034_v18 = vpop.f32.mrf.mxu3 }
 0xec9   :  { %v3035_v40 = vadd.f32 %v4105_v9, %v3034_v18 }
 0xeca   :  { %v4109_v39 = vpop.eup %4108 }
 0xecb   :  { %3059 = vrot.lane.b32.xlu1 %v4109_v39, %s4137_s26  ;;  %4110 = vtanh.f32 %v3035_v40 }
 0xed0   :  { %v3037_v32 = vpop.f32.mrf.mxu3 }
 0xed1   :  { %v4111_v21 = vpop.eup %4110  ;;  %v3038_v13 = vadd.f32 %v4105_v9, %v3037_v32 }
 0xf35   :  { %v3058_v17 = vpop.permute.xlu1 %3057 }
 0xf36   :  { %v3064_v44 = vsel %vm3063_vm5, %v3058_v17, 0.0 }
 0xf37   :  { %3065 = vadd.xlane.f32.xlu2 %v3064_v44 }
 0xf3d   :  { %v3060_v19 = vpop.permute.xlu1 %3059 }
 0xf3e   :  { %v3067_v20 = vsel %vm3063_vm5, %v3060_v19, 0.0 }
 0xf3f   :  { %3068 = vadd.xlane.f32.xlu2 %v3067_v20 }
 0xf57   :  { %3084 = vrot.lane.b32.xlu2 %v4111_v21, %s4138_s6 }
 0xfaa   :  { %v3066_v25 = vpop.xlane.xlu2 %3065 }
 0xfab   :  { %4112 = vrcp.f32 %v3066_v25 }
 0xfb1   :  { %v4113_v22 = vpop.eup %4112 }
 0xfb2   :  { %v3069_v26 = vpop.xlane.xlu2 %3068  ;;  %v3072_v8 = vmul.f32 %v4113_v22, %v4107_v57 }
 0xfb3   :  { %4114 = vrcp.f32 %v3069_v26 }
 0xfb4   :  { %3076 = vrot.lane.b32.xlu0 %v3072_v8, %s4137_s26  ;;  %4116 = vtanh.f32 %v3038_v13 }
 0xfb9   :  { %v4115_v27 = vpop.eup %4114 }
 0xfba   :  { %v3073_v34 = vmul.f32 %v4115_v27, %v4109_v39  ;;  %v4117_v36 = vpop.eup %4116  ;;  %v3085_v42 = vpop.permute.xlu2 %3084 }
 0xfbc   :  { %3078 = vrot.lane.b32.xlu1 %v3073_v34, %s4137_s26 }
 0xfc4   :  { %3086 = vrot.lane.b32.xlu1 %v4117_v36, %s4138_s6 }
0x1026   :  { %v3077_v30 = vpop.permute.xlu0 %3076 }
0x1027   :  { %v3090_v35 = vsel %vm3063_vm5, %v3077_v30, %v3085_v42 }
0x1028   :  { %3093 = vst.msk [vmem:[%s5440_s7] sm:$0xff] %vm3092_vm6, %v3090_v35 }
0x102e   :  { %v3079_v63 = vpop.permute.xlu1 %3078 }
0x1036   :  { %v3087_v31 = vpop.permute.xlu1 %3086 }
0x1037   :  { %v3091_v33 = vsel %vm3063_vm5, %v3079_v63, %v3087_v31 }
0x1038   :  { %3094 = vst.msk [vmem:[%s5440_s7 + $0x8] sm:$0xff] %vm3092_vm6, %v3091_v33 }

</bundles_post_ra>
